<compile_context>
chip_gen: v7x
topology: tpu7x:2x2x1
jax: 0.10.0
libtpu: 0.0.40
codegen_flags: <defaults>
</compile_context>

<pallas_src>
import functools
import math

import jax
import jax.numpy as jnp
from jax.experimental import pallas as pl
from jax.experimental.pallas import tpu as pltpu


# ----------------------------------------------------------------------------
# Generation-aware VMEM budgets & tile sizing
# ----------------------------------------------------------------------------

@functools.lru_cache(maxsize=1)
def _vmem_budgets():
    """(vmem_limit_bytes, per-call block budget) sized from the local TPU generation."""
    cap = 64 * 1024 * 1024                       # conservative fallback (v7x per-TC VMEM)
    try:
        info = pltpu.get_tpu_info()
        c = getattr(info, "vmem_capacity_bytes", None)
        if c:
            cap = int(c)
    except Exception:
        pass
    # ~48 MiB on v7x (64 MiB phys), ~96 MiB on v5e/v6e (128 MiB phys).
    limit = max(16 * 1024 * 1024, min(cap * 3 // 4, cap - 8 * 1024 * 1024))
    block_budget = max(2 * 1024 * 1024, limit // 3)
    return int(limit), int(block_budget)


def _compiler_params(sem):
    return pltpu.CompilerParams(dimension_semantics=sem,
                                vmem_limit_bytes=_vmem_budgets()[0])


def _itemsize(dt):
    return jnp.dtype(dt).itemsize


def _row_tile(n_rows, bytes_per_row, fixed_bytes):
    """Byte-budgeted row tile: as big as the VMEM budget allows (multiple of 8), but
    kept to >=2 grid steps when there is enough work (megacore / v7x 2-TC sharding)."""
    budget = _vmem_budgets()[1]
    avail = max(budget - fixed_bytes, 1 << 20)
    tm = min(int(avail // max(bytes_per_row, 1)), 8192, n_rows)
    if tm >= n_rows:
        if n_rows >= 16:
            tm = min(n_rows, (((n_rows + 1) // 2) + 7) // 8 * 8)
        else:
            tm = n_rows
    else:
        tm = max(8, (tm // 8) * 8)
    return int(tm)


# ----------------------------------------------------------------------------
# Fused 1x1 projections (x @ [W_a|W_b|...] + b, split into separate outputs)
# ----------------------------------------------------------------------------

def _fused_linear_kernel(x_ref, w_ref, b_ref, *o_refs):
    x = x_ref[...]
    w = w_ref[...].astype(x.dtype)
    y = jnp.dot(x, w, preferred_element_type=jnp.float32)
    y = y + b_ref[...].astype(jnp.float32)
    d = y.shape[-1] // len(o_refs)
    for s, o_ref in enumerate(o_refs):
        o_ref[...] = y[:, s * d:(s + 1) * d].astype(o_ref.dtype)


def pallas_fused_linear(x, w, b, n_sections=1):
    """y = x @ w + b over the last axis with w of width n_sections*d.  A single wide
    MXU matmul per row tile (one HBM read of x, dense N) whose result is split in-kernel
    into `n_sections` D-wide outputs, so attention consumes K/V/Q with no XLA slicing."""
    lead = x.shape[:-1]
    din = x.shape[-1]
    dtot = w.shape[1]
    d = dtot // n_sections
    x2 = x.reshape(-1, din)
    n = x2.shape[0]
    xi = _itemsize(x.dtype)
    bytes_per_row = 2 * din * xi + 2 * dtot * xi + 4 * dtot   # in + outs (double-buffered) + f32 acc
    fixed = 2 * din * dtot * _itemsize(w.dtype) + 2 * 4 * dtot
    tm = _row_tile(n, bytes_per_row, fixed)
    outs = pl.pallas_call(
        _fused_linear_kernel,
        out_shape=tuple(jax.ShapeDtypeStruct((n, d), x.dtype) for _ in range(n_sections)),
        grid=(pl.cdiv(n, tm),),
        in_specs=[
            pl.BlockSpec((tm, din), lambda i: (i, 0)),
            pl.BlockSpec((din, dtot), lambda i: (0, 0)),
            pl.BlockSpec((1, dtot), lambda i: (0, 0)),
        ],
        out_specs=tuple(pl.BlockSpec((tm, d), lambda i: (i, 0)) for _ in range(n_sections)),
        compiler_params=_compiler_params(("parallel",)),
    )(x2, w, b.reshape(1, dtot))
    return tuple(o.reshape(*lead, d) for o in outs)


def pallas_linear(x, w, b):
    return pallas_fused_linear(x, w, b, n_sections=1)[0]


# ----------------------------------------------------------------------------
# LayerNorm (f32 statistics; optional fused `residual + LN(x)` epilogue)
# ----------------------------------------------------------------------------

def _ln_kernel(x_ref, g_ref, b_ref, o_ref):
    x = x_ref[...].astype(jnp.float32)
    mu = jnp.mean(x, axis=-1, keepdims=True)
    xc = x - mu
    var = jnp.mean(xc * xc, axis=-1, keepdims=True)
    y = xc * jax.lax.rsqrt(var + 1e-5)
    o_ref[...] = (y * g_ref[...] + b_ref[...]).astype(o_ref.dtype)


def _ln_res_kernel(x_ref, g_ref, b_ref, r_ref, o_ref):
    x = x_ref[...].astype(jnp.float32)
    mu = jnp.mean(x, axis=-1, keepdims=True)
    xc = x - mu
    var = jnp.mean(xc * xc, axis=-1, keepdims=True)
    y = xc * jax.lax.rsqrt(var + 1e-5) * g_ref[...] + b_ref[...]
    o_ref[...] = (r_ref[...].astype(jnp.float32) + y).astype(o_ref.dtype)


def pallas_layernorm(x, gamma, beta, residual=None):
    lead = x.shape[:-1]
    d = x.shape[-1]
    x2 = x.reshape(-1, d)
    n = x2.shape[0]
    xi = _itemsize(x.dtype)
    nblk = 2 if residual is None else 3
    bytes_per_row = 2 * d * xi * nblk + 8 * d
    fixed = 4 * d * 4
    tm = _row_tile(n, bytes_per_row, fixed)
    cparams = _compiler_params(("parallel",))
    g2 = gamma.reshape(1, d).astype(jnp.float32)
    b2 = beta.reshape(1, d).astype(jnp.float32)
    row_spec = pl.BlockSpec((tm, d), lambda i: (i, 0))
    vec_spec = pl.BlockSpec((1, d), lambda i: (0, 0))
    if residual is None:
        out = pl.pallas_call(
            _ln_kernel,
            out_shape=jax.ShapeDtypeStruct((n, d), x.dtype),
            grid=(pl.cdiv(n, tm),),
            in_specs=[row_spec, vec_spec, vec_spec],
            out_specs=row_spec,
            compiler_params=cparams,
        )(x2, g2, b2)
    else:
        out = pl.pallas_call(
            _ln_res_kernel,
            out_shape=jax.ShapeDtypeStruct((n, d), x.dtype),
            grid=(pl.cdiv(n, tm),),
            in_specs=[row_spec, vec_spec, vec_spec, row_spec],
            out_specs=row_spec,
            compiler_params=cparams,
        )(x2, g2, b2, residual.reshape(-1, d))
    return out.reshape(*lead, d)


# ----------------------------------------------------------------------------
# Chi attention: attend over the token axis (axis 2) of the merged layout
#   q: [B, Aq, Lq, H*C], k/v: [B, Ak, Lk, H*C]  ->  out: [B, Ak, Lq, H*C]
#   out[b,a,i,hC+c] = sum_j softmax_j(<mean_A q, mean_A k>_h / sqrt(C)) * v[b,a,j,hC+c]
# ----------------------------------------------------------------------------

def _head_groups(heads, c):
    """Split heads into `hg` channel groups whose width (hpb*c) is 128-lane aligned
    (so channel-blocked BlockSpecs stay legal); otherwise one group with all heads."""
    for hpb in range(1, heads + 1):
        if heads % hpb == 0 and (hpb * c) % 128 == 0:
            return heads // hpb, hpb
    return 1, heads


def _chi_attn_kernel(q_ref, k_ref, v_ref, o_ref, p_scr, *, heads, scale):
    # blocks: q [1, Aq, Lq, Cg], k [1, Ak, Lk, Cg], v [1, 1, Lk, Cg], o [1, 1, Lq, Cg]
    # p_scr [heads, Lq, Lk]: softmax probs, computed once per (batch, head-group).
    c = q_ref.shape[-1] // heads

    @pl.when(pl.program_id(2) == 0)
    def _():
        qm = jnp.mean(q_ref[...].astype(jnp.float32), axis=(0, 1))   # [Lq, Cg] spectator mean
        km = jnp.mean(k_ref[...].astype(jnp.float32), axis=(0, 1))   # [Lk, Cg]
        for h in range(heads):
            qh = (qm[:, h * c:(h + 1) * c] * scale).astype(q_ref.dtype)
            kh = km[:, h * c:(h + 1) * c].astype(q_ref.dtype)
            s = jax.lax.dot_general(qh, kh, (((1,), (1,)), ((), ())),
                                    preferred_element_type=jnp.float32)   # [Lq, Lk]
            s = s - jnp.max(s, axis=-1, keepdims=True)
            p = jnp.exp(s)
            p = p * pl.reciprocal(jnp.sum(p, axis=-1, keepdims=True), approx=False)
            p_scr[h] = p.astype(p_scr.dtype)

    v0 = v_ref[...][0, 0]                                             # [Lk, Cg]
    outs = []
    for h in range(heads):
        ph = p_scr[h]                                                 # [Lq, Lk]
        vh = v0[:, h * c:(h + 1) * c].astype(ph.dtype)                # [Lk, C]
        outs.append(jnp.dot(ph, vh, preferred_element_type=jnp.float32))
    out = jnp.concatenate(outs, axis=-1)                              # [Lq, Cg] lane-dense
    o_ref[...] = out[None, None].astype(o_ref.dtype)


def chi_attention(q, k, v, heads):
    """Merged-layout attention: no XLA-side head-split or value transposes; the
    (batch, head-group, spectator) grid slices heads via the channel BlockSpec and the
    per-(b, group) softmax is cached in VMEM scratch across the spectator axis."""
    b, aq, lq, d = q.shape
    _, ak, lk, _ = k.shape
    assert k.shape[-1] == d and v.shape == (b, ak, lk, d) and d % heads == 0
    c = d // heads
    hg, hpb = _head_groups(heads, c)
    cg = d // hg
    kernel = functools.partial(_chi_attn_kernel, heads=hpb, scale=1.0 / math.sqrt(c))
    return pl.pallas_call(
        kernel,
        out_shape=jax.ShapeDtypeStruct((b, ak, lq, d), q.dtype),
        grid=(b, hg, ak),
        in_specs=[
            pl.BlockSpec((1, aq, lq, cg), lambda bi, gi, ai: (bi, 0, 0, gi)),
            pl.BlockSpec((1, ak, lk, cg), lambda bi, gi, ai: (bi, 0, 0, gi)),
            pl.BlockSpec((1, 1, lk, cg), lambda bi, gi, ai: (bi, ai, 0, gi)),
        ],
        out_specs=pl.BlockSpec((1, 1, lq, cg), lambda bi, gi, ai: (bi, ai, 0, gi)),
        scratch_shapes=[pltpu.VMEM((hpb, lq, lk), q.dtype)],
        compiler_params=_compiler_params(("parallel", "parallel", "arbitrary")),
    )(q, k, v)


# ----------------------------------------------------------------------------
# Layout plumbing (single transpose per tensor; stream 2 lives in T<->S swapped layout)
# ----------------------------------------------------------------------------

def tokenize(x, dtype):
    # NCTHW [B, Ctot, T, Hs, Ws] -> [B, T, Hs*Ws, Ctot]
    b, ctot, t, hs, ws = x.shape
    return jnp.transpose(x, (0, 2, 3, 4, 1)).reshape(b, t, hs * ws, ctot).astype(dtype)


def tokenize_swapped(x, dtype):
    # NCTHW -> [B, Hs*Ws, T, Ctot]  (stream 2 reuses the same attention kernel this way)
    b, ctot, t, hs, ws = x.shape
    return jnp.transpose(x, (0, 3, 4, 2, 1)).reshape(b, hs * ws, t, ctot).astype(dtype)


def untokenize(y, orig_shape, dtype):
    b, ctot, t, hs, ws = orig_shape
    return jnp.transpose(y.reshape(b, t, hs, ws, ctot), (0, 4, 1, 2, 3)).astype(dtype)


def untokenize_swapped(y, orig_shape, dtype):
    b, ctot, t, hs, ws = orig_shape
    return jnp.transpose(y.reshape(b, hs, ws, t, ctot), (0, 4, 3, 1, 2)).astype(dtype)


# ----------------------------------------------------------------------------
# ChiStream.chi (x_dim=('s','t'), alternate_attn=False)
# ----------------------------------------------------------------------------

def chi_stream_apply(fp, x1m, p1m, x2m_sw, p2m_sw, heads):
    d = x1m.shape[-1]
    # torch expand() is the identity for this config; concat prompts along each stream's
    # attended token axis (axis 2 in that stream's own layout).
    x1c = jnp.concatenate([x1m, p1m], axis=2)           # [B, T1, S1+Sp1, D]
    x2c = jnp.concatenate([x2m_sw, p2m_sw], axis=2)     # [B, S2, T2+Tp2, D] (swapped)

    # --- stage 1: one fused (K|V|Q_next) projection per concatenated stream ---
    q11 = pallas_linear(p1m, fp["q11_w"], fp["q11_b"])
    k11, v11, q12 = pallas_fused_linear(x1c, fp["x1c_w"], fp["x1c_b"], 3)
    x1_hat = pallas_layernorm(chi_attention(q11, k11, v11, heads),
                              fp["norm1_1_g"], fp["norm1_1_b"])      # [B, T1, Sp1, D]

    q21 = pallas_linear(p2m_sw, fp["q21_w"], fp["q21_b"])
    k21, v21, q22 = pallas_fused_linear(x2c, fp["x2c_w"], fp["x2c_b"], 3)
    x2_hat_sw = pallas_layernorm(chi_attention(q21, k21, v21, heads),
                                 fp["norm2_1_g"], fp["norm2_1_b"])   # [B, S2, Tp2, D]

    # layout bridges for the cross-stream concats (small "hat" tensors only)
    x2_hat = jnp.transpose(x2_hat_sw, (0, 2, 1, 3))
    x1_hat_sw = jnp.transpose(x1_hat, (0, 2, 1, 3))
    x12_hat = jnp.concatenate([x1_hat, x2_hat], axis=2)              # [B, T1, Sp1+S2, D]
    x21_hat_sw = jnp.concatenate([x2_hat_sw, x1_hat_sw], axis=2)     # [B, S2, Tp2+T1, D]

    # --- stage 2: fused K|V projections; residual add fused into the LN epilogue ---
    k12, v12 = pallas_fused_linear(x12_hat, fp["h12_w"], fp["h12_b"], 2)
    y1full = pallas_layernorm(chi_attention(q12, k12, v12, heads),
                              fp["norm1_2_g"], fp["norm1_2_b"], residual=x1c)

    k22, v22 = pallas_fused_linear(x21_hat_sw, fp["h21_w"], fp["h21_b"], 2)
    y2full_sw = pallas_layernorm(chi_attention(q22, k22, v22, heads),
                                 fp["norm2_2_g"], fp["norm2_2_b"], residual=x2c)

    # alternate_attn=False -> Q/K/V*_3 unused; split the prompt tokens back off.
    s_p1 = p1m.shape[2]
    t_p2 = p2m_sw.shape[2]
    y1 = y1full[:, :, :y1full.shape[2] - s_p1]
    q1 = y1full[:, :, y1full.shape[2] - s_p1:]
    y2_sw = y2full_sw[:, :, :y2full_sw.shape[2] - t_p2]
    q2_sw = y2full_sw[:, :, y2full_sw.shape[2] - t_p2:]
    # 4 not in x_dim -> no channel-mean on q1/q2.
    return y1, q1, y2_sw, q2_sw


# ----------------------------------------------------------------------------
# SChiStage.forward
# ----------------------------------------------------------------------------

def schi_stage_forward(fp, x1, p1, x2, p2, *, heads,
                       compute_dtype=jnp.bfloat16, token_dim=(2, 3, 4)):
    del token_dim  # token_dim=(2,3,4) with x_dim=('s','t') -> full T / S tokenization
    out_dtype = x1.dtype
    x1m = tokenize(x1, compute_dtype)
    p1m = tokenize(p1, compute_dtype)
    x2m_sw = tokenize_swapped(x2, compute_dtype)
    p2m_sw = tokenize_swapped(p2, compute_dtype)

    y1m, q1m, y2m_sw, q2m_sw = chi_stream_apply(fp, x1m, p1m, x2m_sw, p2m_sw, heads)

    y1 = untokenize(y1m, x1.shape, out_dtype)
    q1 = untokenize(q1m, p1.shape, out_dtype)
    y2 = untokenize_swapped(y2m_sw, x2.shape, out_dtype)
    q2 = untokenize_swapped(q2m_sw, p2.shape, out_dtype)

    # TODO(synk): pw1_a / pw1_b / pw2_a / pw2_b (CBlock + MultiHeadConv2Plus1d +
    # MultiHeadResBlock Column) definitions were not provided with the module; they are
    # passed through as identity here rather than being faked.
    return y1, q1, y2, q2


# ----------------------------------------------------------------------------
# Parameters (nn.Linear / nn.LayerNorm shapes of ChiStream) + one-time fusion prep
# ----------------------------------------------------------------------------

def init_params(key, d):
    lin_names = ["Q1_1", "K1_1", "V1_1", "Q2_1", "K2_1", "V2_1",
                 "Q1_2", "K1_2", "V1_2", "Q2_2", "K2_2", "V2_2"]
    params = {}
    for i, name in enumerate(sorted(lin_names)):
        kw, kb = jax.random.split(jax.random.fold_in(key, i))
        params[name] = {
            "w": jax.random.normal(kw, (d, d), jnp.float32) * (1.0 / math.sqrt(d)),
            "b": jax.random.normal(kb, (d,), jnp.float32) * 0.01,
        }
    for name in ("norm1_1", "norm2_1", "norm1_2", "norm2_2"):
        params[name] = {"g": jnp.ones((d,), jnp.float32),
                        "b": jnp.zeros((d,), jnp.float32)}
    return params


def prepare_params(params, compute_dtype=jnp.bfloat16):
    """Pre-concatenate all same-input projection weights (once, outside the forward)
    and cast matmul weights to the bf16 compute dtype; LN params / biases stay f32."""
    def fuse(*names):
        w = jnp.concatenate([params[n]["w"] for n in names], axis=1).astype(compute_dtype)
        b = jnp.concatenate([params[n]["b"] for n in names], axis=0).astype(jnp.float32)
        return w, b

    fp = {}
    fp["q11_w"], fp["q11_b"] = fuse("Q1_1")
    fp["q21_w"], fp["q21_b"] = fuse("Q2_1")
    fp["x1c_w"], fp["x1c_b"] = fuse("K1_1", "V1_1", "Q1_2")
    fp["x2c_w"], fp["x2c_b"] = fuse("K2_1", "V2_1", "Q2_2")
    fp["h12_w"], fp["h12_b"] = fuse("K1_2", "V1_2")
    fp["h21_w"], fp["h21_b"] = fuse("K2_2", "V2_2")
    for n in ("norm1_1", "norm2_1", "norm1_2", "norm2_2"):
        fp[n + "_g"] = params[n]["g"].astype(jnp.float32)
        fp[n + "_b"] = params[n]["b"].astype(jnp.float32)
    return fp


if __name__ == "__main__":
    key = jax.random.PRNGKey(0)
    heads = 2
    cph = 8                 # channels per head; both streams must match for the chi concat
    B = 2
    # x1: [B, heads*cph, T1=4, 4, 4]  (S1 = 16)
    # x2: [B, heads*cph, T2=2, 2, 2]  (S2 = 4)
    # p1 tokens -> pw1_compr_shape = (T1, S2, cph) = (4, 4, 8) -> [B, 16, 4, 2, 2]
    # p2 tokens -> pw2_compr_shape = (T1, S2, cph) = (4, 4, 8) -> [B, 16, 4, 2, 2]
    k1, k2, k3, k4, kp = jax.random.split(key, 5)
    x1 = jax.random.normal(k1, (B, heads * cph, 4, 4, 4), jnp.float32)
    x2 = jax.random.normal(k2, (B, heads * cph, 2, 2, 2), jnp.float32)
    p1 = jax.random.normal(k3, (B, heads * cph, 4, 2, 2), jnp.float32)
    p2 = jax.random.normal(k4, (B, heads * cph, 4, 2, 2), jnp.float32)

    params = init_params(kp, heads * cph)
    fused = prepare_params(params)          # weight fusion happens once, outside jit

    fwd = jax.jit(functools.partial(schi_stage_forward, heads=heads))
    y1, q1, y2, q2 = fwd(fused, x1, p1, x2, p2)
    jax.block_until_ready((y1, q1, y2, q2))

    assert y1.shape == x1.shape and q1.shape == p1.shape
    assert y2.shape == x2.shape and q2.shape == p2.shape
    assert all(bool(jnp.all(jnp.isfinite(t))) for t in (y1, q1, y2, q2))
    print("KERNEL_OK")
</pallas_src>

<mosaic_0001>
module attributes {stable_mosaic.version = 11 : i64} {
  func.func @_fused_linear_kernel(%arg0: i32, %arg1: memref<80x16xbf16, #tpu.memory_space<vmem>>, %arg2: memref<16x48xbf16, #tpu.memory_space<vmem>>, %arg3: memref<1x48xf32, #tpu.memory_space<vmem>>, %arg4: memref<80x16xbf16, #tpu.memory_space<vmem>>, %arg5: memref<80x16xbf16, #tpu.memory_space<vmem>>, %arg6: memref<80x16xbf16, #tpu.memory_space<vmem>>) attributes {dimension_semantics = [#tpu.dimension_semantics<parallel>], iteration_bounds = array<i64: 2>, scalar_prefetch = 0 : i64, scratch_operands = 0 : i64, tpu.core_type = #tpu.core_type<tc>, window_params = [{transform_indices = @transform_0, window_bounds = array<i64: 80, 16>}, {pipeline_mode = #tpu.pipeline_mode<synchronous>, transform_indices = @transform_1, window_bounds = array<i64: 16, 48>}, {pipeline_mode = #tpu.pipeline_mode<synchronous>, transform_indices = @transform_2, window_bounds = array<i64: 1, 48>}, {transform_indices = @transform_3, window_bounds = array<i64: 80, 16>}, {transform_indices = @transform_4, window_bounds = array<i64: 80, 16>}, {transform_indices = @transform_5, window_bounds = array<i64: 80, 16>}]} {
    %c0 = arith.constant 0 : index
    %c0_0 = arith.constant 0 : index
    %0 = vector.load %arg1[%c0, %c0_0] : memref<80x16xbf16, #tpu.memory_space<vmem>>, vector<80x16xbf16>
    %c0_1 = arith.constant 0 : index
    %c0_2 = arith.constant 0 : index
    %1 = vector.load %arg2[%c0_1, %c0_2] : memref<16x48xbf16, #tpu.memory_space<vmem>>, vector<16x48xbf16>
    %cst = arith.constant dense<0.000000e+00> : vector<80x48xf32>
    %2 = tpu.matmul %0, %1, %cst {dimension_numbers = #tpu.dot_dimension_numbers<[1], [0], [0], [1], [0, 0, 1, 1], [], []>} : vector<80x16xbf16>, vector<16x48xbf16>, vector<80x48xf32> -> vector<80x48xf32>
    %c0_3 = arith.constant 0 : index
    %c0_4 = arith.constant 0 : index
    %3 = vector.load %arg3[%c0_3, %c0_4] : memref<1x48xf32, #tpu.memory_space<vmem>>, vector<1x48xf32>
    %4 = vector.broadcast %3 : vector<1x48xf32> to vector<80x48xf32>
    %5 = arith.addf %2, %4 : vector<80x48xf32>
    %6 = vector.extract_strided_slice %5 {offsets = [0, 0], sizes = [80, 16], strides = [1, 1]} : vector<80x48xf32> to vector<80x16xf32>
    %7 = arith.truncf %6 : vector<80x16xf32> to vector<80x16xbf16>
    %c0_5 = arith.constant 0 : index
    %c0_6 = arith.constant 0 : index
    %8 = vector.load %arg4[%c0_5, %c0_6] : memref<80x16xbf16, #tpu.memory_space<vmem>>, vector<80x16xbf16>
    tpu.vector_store %arg4[%c0_5, %c0_6], %7 {strides = array<i32>} : memref<80x16xbf16, #tpu.memory_space<vmem>>, vector<80x16xbf16>,
    %9 = vector.extract_strided_slice %5 {offsets = [0, 16], sizes = [80, 16], strides = [1, 1]} : vector<80x48xf32> to vector<80x16xf32>
    %10 = arith.truncf %9 : vector<80x16xf32> to vector<80x16xbf16>
    %c0_7 = arith.constant 0 : index
    %c0_8 = arith.constant 0 : index
    %11 = vector.load %arg5[%c0_7, %c0_8] : memref<80x16xbf16, #tpu.memory_space<vmem>>, vector<80x16xbf16>
    tpu.vector_store %arg5[%c0_7, %c0_8], %10 {strides = array<i32>} : memref<80x16xbf16, #tpu.memory_space<vmem>>, vector<80x16xbf16>,
    %12 = vector.extract_strided_slice %5 {offsets = [0, 32], sizes = [80, 16], strides = [1, 1]} : vector<80x48xf32> to vector<80x16xf32>
    %13 = arith.truncf %12 : vector<80x16xf32> to vector<80x16xbf16>
    %c0_9 = arith.constant 0 : index
    %c0_10 = arith.constant 0 : index
    %14 = vector.load %arg6[%c0_9, %c0_10] : memref<80x16xbf16, #tpu.memory_space<vmem>>, vector<80x16xbf16>
    tpu.vector_store %arg6[%c0_9, %c0_10], %13 {strides = array<i32>} : memref<80x16xbf16, #tpu.memory_space<vmem>>, vector<80x16xbf16>,
    return
  }
  func.func @transform_0(%arg0: i32) -> (i32, i32) {
    %c0_i32 = arith.constant 0 : i32
    %c0_i32_0 = arith.constant 0 : i32
    return %arg0, %c0_i32 : i32, i32
  }
  func.func @transform_1(%arg0: i32) -> (i32, i32) {
    %c0_i32 = arith.constant 0 : i32
    %c0_i32_0 = arith.constant 0 : i32
    %c0_i32_1 = arith.constant 0 : i32
    return %c0_i32, %c0_i32_0 : i32, i32
  }
  func.func @transform_2(%arg0: i32) -> (i32, i32) {
    %c0_i32 = arith.constant 0 : i32
    %c0_i32_0 = arith.constant 0 : i32
    %c0_i32_1 = arith.constant 0 : i32
    return %c0_i32, %c0_i32_0 : i32, i32
  }
  func.func @transform_3(%arg0: i32) -> (i32, i32) {
    %c0_i32 = arith.constant 0 : i32
    %c0_i32_0 = arith.constant 0 : i32
    return %arg0, %c0_i32 : i32, i32
  }
  func.func @transform_4(%arg0: i32) -> (i32, i32) {
    %c0_i32 = arith.constant 0 : i32
    %c0_i32_0 = arith.constant 0 : i32
    return %arg0, %c0_i32 : i32, i32
  }
  func.func @transform_5(%arg0: i32) -> (i32, i32) {
    %c0_i32 = arith.constant 0 : i32
    %c0_i32_0 = arith.constant 0 : i32
    return %arg0, %c0_i32 : i32, i32
  }
}

module attributes {stable_mosaic.version = 11 : i64} {
  func.func @_fused_linear_kernel(%arg0: i32, %arg1: memref<16x16xbf16, #tpu.memory_space<vmem>>, %arg2: memref<16x16xbf16, #tpu.memory_space<vmem>>, %arg3: memref<1x16xf32, #tpu.memory_space<vmem>>, %arg4: memref<16x16xbf16, #tpu.memory_space<vmem>>) attributes {dimension_semantics = [#tpu.dimension_semantics<parallel>], iteration_bounds = array<i64: 2>, scalar_prefetch = 0 : i64, scratch_operands = 0 : i64, tpu.core_type = #tpu.core_type<tc>, window_params = [{transform_indices = @transform_0, window_bounds = array<i64: 16, 16>}, {pipeline_mode = #tpu.pipeline_mode<synchronous>, transform_indices = @transform_1, window_bounds = array<i64: 16, 16>}, {pipeline_mode = #tpu.pipeline_mode<synchronous>, transform_indices = @transform_2, window_bounds = array<i64: 1, 16>}, {transform_indices = @transform_3, window_bounds = array<i64: 16, 16>}]} {
    %c0 = arith.constant 0 : index
    %c0_0 = arith.constant 0 : index
    %0 = vector.load %arg1[%c0, %c0_0] : memref<16x16xbf16, #tpu.memory_space<vmem>>, vector<16x16xbf16>
    %c0_1 = arith.constant 0 : index
    %c0_2 = arith.constant 0 : index
    %1 = vector.load %arg2[%c0_1, %c0_2] : memref<16x16xbf16, #tpu.memory_space<vmem>>, vector<16x16xbf16>
    %cst = arith.constant dense<0.000000e+00> : vector<16x16xf32>
    %2 = tpu.matmul %0, %1, %cst {dimension_numbers = #tpu.dot_dimension_numbers<[1], [0], [0], [1], [0, 0, 1, 1], [], []>} : vector<16x16xbf16>, vector<16x16xbf16>, vector<16x16xf32> -> vector<16x16xf32>
    %c0_3 = arith.constant 0 : index
    %c0_4 = arith.constant 0 : index
    %3 = vector.load %arg3[%c0_3, %c0_4] : memref<1x16xf32, #tpu.memory_space<vmem>>, vector<1x16xf32>
    %4 = vector.broadcast %3 : vector<1x16xf32> to vector<16x16xf32>
    %5 = arith.addf %2, %4 : vector<16x16xf32>
    %6 = arith.truncf %5 : vector<16x16xf32> to vector<16x16xbf16>
    %c0_5 = arith.constant 0 : index
    %c0_6 = arith.constant 0 : index
    %7 = vector.load %arg4[%c0_5, %c0_6] : memref<16x16xbf16, #tpu.memory_space<vmem>>, vector<16x16xbf16>
    tpu.vector_store %arg4[%c0_5, %c0_6], %6 {strides = array<i32>} : memref<16x16xbf16, #tpu.memory_space<vmem>>, vector<16x16xbf16>,
    return
  }
  func.func @transform_0(%arg0: i32) -> (i32, i32) {
    %c0_i32 = arith.constant 0 : i32
    %c0_i32_0 = arith.constant 0 : i32
    return %arg0, %c0_i32 : i32, i32
  }
  func.func @transform_1(%arg0: i32) -> (i32, i32) {
    %c0_i32 = arith.constant 0 : i32
    %c0_i32_0 = arith.constant 0 : i32
    %c0_i32_1 = arith.constant 0 : i32
    return %c0_i32, %c0_i32_0 : i32, i32
  }
  func.func @transform_2(%arg0: i32) -> (i32, i32) {
    %c0_i32 = arith.constant 0 : i32
    %c0_i32_0 = arith.constant 0 : i32
    %c0_i32_1 = arith.constant 0 : i32
    return %c0_i32, %c0_i32_0 : i32, i32
  }
  func.func @transform_3(%arg0: i32) -> (i32, i32) {
    %c0_i32 = arith.constant 0 : i32
    %c0_i32_0 = arith.constant 0 : i32
    return %arg0, %c0_i32 : i32, i32
  }
}

module attributes {stable_mosaic.version = 11 : i64} {
  func.func @_ln_kernel(%arg0: i32, %arg1: memref<16x16xbf16, #tpu.memory_space<vmem>>, %arg2: memref<1x16xf32, #tpu.memory_space<vmem>>, %arg3: memref<1x16xf32, #tpu.memory_space<vmem>>, %arg4: memref<16x16xbf16, #tpu.memory_space<vmem>>) attributes {dimension_semantics = [#tpu.dimension_semantics<parallel>], iteration_bounds = array<i64: 2>, scalar_prefetch = 0 : i64, scratch_operands = 0 : i64, tpu.core_type = #tpu.core_type<tc>, window_params = [{transform_indices = @transform_0, window_bounds = array<i64: 16, 16>}, {pipeline_mode = #tpu.pipeline_mode<synchronous>, transform_indices = @transform_1, window_bounds = array<i64: 1, 16>}, {pipeline_mode = #tpu.pipeline_mode<synchronous>, transform_indices = @transform_2, window_bounds = array<i64: 1, 16>}, {transform_indices = @transform_3, window_bounds = array<i64: 16, 16>}]} {
    %c0 = arith.constant 0 : index
    %c0_0 = arith.constant 0 : index
    %0 = vector.load %arg1[%c0, %c0_0] : memref<16x16xbf16, #tpu.memory_space<vmem>>, vector<16x16xbf16>
    %1 = arith.extf %0 : vector<16x16xbf16> to vector<16x16xf32>
    %cst = arith.constant dense<0.000000e+00> : vector<16xf32>
    %2 = vector.multi_reduction <add>, %1, %cst [1] : vector<16x16xf32> to vector<16xf32>
    %3 = vector.shape_cast %2 : vector<16xf32> to vector<16x1xf32>
    %cst_1 = arith.constant 1.600000e+01 : f32
    %4 = vector.broadcast %cst_1 : f32 to vector<16x1xf32>
    %5 = arith.divf %3, %4 : vector<16x1xf32>
    %6 = vector.broadcast %5 : vector<16x1xf32> to vector<16x16xf32>
    %7 = arith.subf %1, %6 : vector<16x16xf32>
    %8 = arith.mulf %7, %7 : vector<16x16xf32>
    %cst_2 = arith.constant dense<0.000000e+00> : vector<16xf32>
    %9 = vector.multi_reduction <add>, %8, %cst_2 [1] : vector<16x16xf32> to vector<16xf32>
    %10 = vector.shape_cast %9 : vector<16xf32> to vector<16x1xf32>
    %cst_3 = arith.constant 1.600000e+01 : f32
    %11 = vector.broadcast %cst_3 : f32 to vector<16x1xf32>
    %12 = arith.divf %10, %11 : vector<16x1xf32>
    %cst_4 = arith.constant 9.99999974E-6 : f32
    %13 = vector.broadcast %cst_4 : f32 to vector<16x1xf32>
    %14 = arith.addf %12, %13 : vector<16x1xf32>
    %15 = math.rsqrt %14 : vector<16x1xf32>
    %16 = vector.broadcast %15 : vector<16x1xf32> to vector<16x16xf32>
    %17 = arith.mulf %7, %16 : vector<16x16xf32>
    %c0_5 = arith.constant 0 : index
    %c0_6 = arith.constant 0 : index
    %18 = vector.load %arg2[%c0_5, %c0_6] : memref<1x16xf32, #tpu.memory_space<vmem>>, vector<1x16xf32>
    %19 = vector.broadcast %18 : vector<1x16xf32> to vector<16x16xf32>
    %20 = arith.mulf %17, %19 : vector<16x16xf32>
    %c0_7 = arith.constant 0 : index
    %c0_8 = arith.constant 0 : index
    %21 = vector.load %arg3[%c0_7, %c0_8] : memref<1x16xf32, #tpu.memory_space<vmem>>, vector<1x16xf32>
    %22 = vector.broadcast %21 : vector<1x16xf32> to vector<16x16xf32>
    %23 = arith.addf %20, %22 : vector<16x16xf32>
    %24 = arith.truncf %23 : vector<16x16xf32> to vector<16x16xbf16>
    %c0_9 = arith.constant 0 : index
    %c0_10 = arith.constant 0 : index
    %25 = vector.load %arg4[%c0_9, %c0_10] : memref<16x16xbf16, #tpu.memory_space<vmem>>, vector<16x16xbf16>
    tpu.vector_store %arg4[%c0_9, %c0_10], %24 {strides = array<i32>} : memref<16x16xbf16, #tpu.memory_space<vmem>>, vector<16x16xbf16>,
    return
  }
  func.func @transform_0(%arg0: i32) -> (i32, i32) {
    %c0_i32 = arith.constant 0 : i32
    %c0_i32_0 = arith.constant 0 : i32
    return %arg0, %c0_i32 : i32, i32
  }
  func.func @transform_1(%arg0: i32) -> (i32, i32) {
    %c0_i32 = arith.constant 0 : i32
    %c0_i32_0 = arith.constant 0 : i32
    %c0_i32_1 = arith.constant 0 : i32
    return %c0_i32, %c0_i32_0 : i32, i32
  }
  func.func @transform_2(%arg0: i32) -> (i32, i32) {
    %c0_i32 = arith.constant 0 : i32
    %c0_i32_0 = arith.constant 0 : i32
    %c0_i32_1 = arith.constant 0 : i32
    return %c0_i32, %c0_i32_0 : i32, i32
  }
  func.func @transform_3(%arg0: i32) -> (i32, i32) {
    %c0_i32 = arith.constant 0 : i32
    %c0_i32_0 = arith.constant 0 : i32
    return %arg0, %c0_i32 : i32, i32
  }
}

module attributes {stable_mosaic.version = 11 : i64} {
  func.func @_chi_attn_kernel(%arg0: i32, %arg1: i32, %arg2: i32, %arg3: memref<1x4x4x16xbf16, #tpu.memory_space<vmem>>, %arg4: memref<1x4x20x16xbf16, #tpu.memory_space<vmem>>, %arg5: memref<1x1x20x16xbf16, #tpu.memory_space<vmem>>, %arg6: memref<1x1x4x16xbf16, #tpu.memory_space<vmem>>, %arg7: memref<2x4x20xbf16, #tpu.memory_space<vmem>>) attributes {dimension_semantics = [#tpu.dimension_semantics<parallel>, #tpu.dimension_semantics<parallel>, #tpu.dimension_semantics<arbitrary>], iteration_bounds = array<i64: 2, 1, 4>, scalar_prefetch = 0 : i64, scratch_operands = 1 : i64, tpu.core_type = #tpu.core_type<tc>, window_params = [{transform_indices = @transform_0, window_bounds = array<i64: 1, 4, 4, 16>}, {transform_indices = @transform_1, window_bounds = array<i64: 1, 4, 20, 16>}, {transform_indices = @transform_2, window_bounds = array<i64: 1, 1, 20, 16>}, {transform_indices = @transform_3, window_bounds = array<i64: 1, 1, 4, 16>}]} {
    %c0_i32 = arith.constant 0 : i32
    %0 = arith.cmpi eq, %arg2, %c0_i32 : i32
    %1 = arith.extui %0 : i1 to i32
    %c0_i32_0 = arith.constant 0 : i32
    %2 = arith.cmpi ne, %1, %c0_i32_0 : i32
    scf.if %2 {
      %c0_14 = arith.constant 0 : index
      %c0_15 = arith.constant 0 : index
      %c0_16 = arith.constant 0 : index
      %c0_17 = arith.constant 0 : index
      %17 = vector.load %arg3[%c0_14, %c0_15, %c0_16, %c0_17] : memref<1x4x4x16xbf16, #tpu.memory_space<vmem>>, vector<1x4x4x16xbf16>
      %18 = arith.extf %17 : vector<1x4x4x16xbf16> to vector<1x4x4x16xf32>
      %cst_18 = arith.constant dense<0.000000e+00> : vector<4x16xf32>
      %19 = vector.multi_reduction <add>, %18, %cst_18 [0, 1] : vector<1x4x4x16xf32> to vector<4x16xf32>
      %cst_19 = arith.constant 4.000000e+00 : f32
      %20 = vector.broadcast %cst_19 : f32 to vector<4x16xf32>
      %21 = arith.divf %19, %20 : vector<4x16xf32>
      %c0_20 = arith.constant 0 : index
      %c0_21 = arith.constant 0 : index
      %c0_22 = arith.constant 0 : index
      %c0_23 = arith.constant 0 : index
      %22 = vector.load %arg4[%c0_20, %c0_21, %c0_22, %c0_23] : memref<1x4x20x16xbf16, #tpu.memory_space<vmem>>, vector<1x4x20x16xbf16>
      %23 = arith.extf %22 : vector<1x4x20x16xbf16> to vector<1x4x20x16xf32>
      %cst_24 = arith.constant dense<0.000000e+00> : vector<20x16xf32>
      %24 = vector.multi_reduction <add>, %23, %cst_24 [0, 1] : vector<1x4x20x16xf32> to vector<20x16xf32>
      %cst_25 = arith.constant 4.000000e+00 : f32
      %25 = vector.broadcast %cst_25 : f32 to vector<20x16xf32>
      %26 = arith.divf %24, %25 : vector<20x16xf32>
      %27 = vector.extract_strided_slice %21 {offsets = [0, 0], sizes = [4, 8], strides = [1, 1]} : vector<4x16xf32> to vector<4x8xf32>
      %cst_26 = arith.constant 0.353553385 : f32
      %28 = vector.broadcast %cst_26 : f32 to vector<4x8xf32>
      %29 = arith.mulf %27, %28 : vector<4x8xf32>
      %30 = arith.truncf %29 : vector<4x8xf32> to vector<4x8xbf16>
      %31 = vector.extract_strided_slice %26 {offsets = [0, 0], sizes = [20, 8], strides = [1, 1]} : vector<20x16xf32> to vector<20x8xf32>
      %32 = arith.truncf %31 : vector<20x8xf32> to vector<20x8xbf16>
      %cst_27 = arith.constant dense<0.000000e+00> : vector<4x20xf32>
      %33 = tpu.matmul %30, %32, %cst_27 {dimension_numbers = #tpu.dot_dimension_numbers<[1], [1], [0], [0], [0, 0, 1, 0], [], []>} : vector<4x8xbf16>, vector<20x8xbf16>, vector<4x20xf32> -> vector<4x20xf32>
      %cst_28 = arith.constant dense<0xFF800000> : vector<4xf32>
      %34 = vector.multi_reduction <maximumf>, %33, %cst_28 [1] : vector<4x20xf32> to vector<4xf32>
      %35 = vector.shape_cast %34 : vector<4xf32> to vector<4x1xf32>
      %36 = vector.broadcast %35 : vector<4x1xf32> to vector<4x20xf32>
      %37 = arith.subf %33, %36 : vector<4x20xf32>
      %38 = math.exp %37 : vector<4x20xf32>
      %cst_29 = arith.constant dense<0.000000e+00> : vector<4xf32>
      %39 = vector.multi_reduction <add>, %38, %cst_29 [1] : vector<4x20xf32> to vector<4xf32>
      %40 = vector.shape_cast %39 : vector<4xf32> to vector<4x1xf32>
      %41 = tpu.reciprocal %40 : vector<4x1xf32> -> vector<4x1xf32>
      %42 = vector.broadcast %41 : vector<4x1xf32> to vector<4x20xf32>
      %43 = arith.mulf %38, %42 : vector<4x20xf32>
      %44 = arith.truncf %43 : vector<4x20xf32> to vector<4x20xbf16>
      %c0_30 = arith.constant 0 : index
      %c0_31 = arith.constant 0 : index
      %c0_32 = arith.constant 0 : index
      %45 = vector.load %arg7[%c0_30, %c0_31, %c0_32] : memref<2x4x20xbf16, #tpu.memory_space<vmem>>, vector<1x4x20xbf16>
      %46 = vector.shape_cast %45 : vector<1x4x20xbf16> to vector<4x20xbf16>
      %47 = vector.shape_cast %44 : vector<4x20xbf16> to vector<1x4x20xbf16>
      tpu.vector_store %arg7[%c0_30, %c0_31, %c0_32], %47 {strides = array<i32>} : memref<2x4x20xbf16, #tpu.memory_space<vmem>>, vector<1x4x20xbf16>,
      %48 = vector.extract_strided_slice %21 {offsets = [0, 8], sizes = [4, 8], strides = [1, 1]} : vector<4x16xf32> to vector<4x8xf32>
      %cst_33 = arith.constant 0.353553385 : f32
      %49 = vector.broadcast %cst_33 : f32 to vector<4x8xf32>
      %50 = arith.mulf %48, %49 : vector<4x8xf32>
      %51 = arith.truncf %50 : vector<4x8xf32> to vector<4x8xbf16>
      %52 = vector.extract_strided_slice %26 {offsets = [0, 8], sizes = [20, 8], strides = [1, 1]} : vector<20x16xf32> to vector<20x8xf32>
      %53 = arith.truncf %52 : vector<20x8xf32> to vector<20x8xbf16>
      %cst_34 = arith.constant dense<0.000000e+00> : vector<4x20xf32>
      %54 = tpu.matmul %51, %53, %cst_34 {dimension_numbers = #tpu.dot_dimension_numbers<[1], [1], [0], [0], [0, 0, 1, 0], [], []>} : vector<4x8xbf16>, vector<20x8xbf16>, vector<4x20xf32> -> vector<4x20xf32>
      %cst_35 = arith.constant dense<0xFF800000> : vector<4xf32>
      %55 = vector.multi_reduction <maximumf>, %54, %cst_35 [1] : vector<4x20xf32> to vector<4xf32>
      %56 = vector.shape_cast %55 : vector<4xf32> to vector<4x1xf32>
      %57 = vector.broadcast %56 : vector<4x1xf32> to vector<4x20xf32>
      %58 = arith.subf %54, %57 : vector<4x20xf32>
      %59 = math.exp %58 : vector<4x20xf32>
      %cst_36 = arith.constant dense<0.000000e+00> : vector<4xf32>
      %60 = vector.multi_reduction <add>, %59, %cst_36 [1] : vector<4x20xf32> to vector<4xf32>
      %61 = vector.shape_cast %60 : vector<4xf32> to vector<4x1xf32>
      %62 = tpu.reciprocal %61 : vector<4x1xf32> -> vector<4x1xf32>
      %63 = vector.broadcast %62 : vector<4x1xf32> to vector<4x20xf32>
      %64 = arith.mulf %59, %63 : vector<4x20xf32>
      %65 = arith.truncf %64 : vector<4x20xf32> to vector<4x20xbf16>
      %c1_37 = arith.constant 1 : index
      %c0_38 = arith.constant 0 : index
      %c0_39 = arith.constant 0 : index
      %66 = vector.load %arg7[%c1_37, %c0_38, %c0_39] : memref<2x4x20xbf16, #tpu.memory_space<vmem>>, vector<1x4x20xbf16>
      %67 = vector.shape_cast %66 : vector<1x4x20xbf16> to vector<4x20xbf16>
      %68 = vector.shape_cast %65 : vector<4x20xbf16> to vector<1x4x20xbf16>
      tpu.vector_store %arg7[%c1_37, %c0_38, %c0_39], %68 {strides = array<i32>} : memref<2x4x20xbf16, #tpu.memory_space<vmem>>, vector<1x4x20xbf16>,
    } else {
    }
    %c0 = arith.constant 0 : index
    %c0_1 = arith.constant 0 : index
    %c0_2 = arith.constant 0 : index
    %c0_3 = arith.constant 0 : index
    %3 = vector.load %arg5[%c0, %c0_1, %c0_2, %c0_3] : memref<1x1x20x16xbf16, #tpu.memory_space<vmem>>, vector<1x1x20x16xbf16>
    %4 = vector.shape_cast %3 : vector<1x1x20x16xbf16> to vector<20x16xbf16>
    %c0_4 = arith.constant 0 : index
    %c0_5 = arith.constant 0 : index
    %c0_6 = arith.constant 0 : index
    %5 = vector.load %arg7[%c0_4, %c0_5, %c0_6] : memref<2x4x20xbf16, #tpu.memory_space<vmem>>, vector<1x4x20xbf16>
    %6 = vector.shape_cast %5 : vector<1x4x20xbf16> to vector<4x20xbf16>
    %7 = vector.extract_strided_slice %4 {offsets = [0, 0], sizes = [20, 8], strides = [1, 1]} : vector<20x16xbf16> to vector<20x8xbf16>
    %cst = arith.constant dense<0.000000e+00> : vector<4x8xf32>
    %8 = tpu.matmul %6, %7, %cst {dimension_numbers = #tpu.dot_dimension_numbers<[1], [0], [0], [1], [0, 0, 1, 1], [], []>} : vector<4x20xbf16>, vector<20x8xbf16>, vector<4x8xf32> -> vector<4x8xf32>
    %c1 = arith.constant 1 : index
    %c0_7 = arith.constant 0 : index
    %c0_8 = arith.constant 0 : index
    %9 = vector.load %arg7[%c1, %c0_7, %c0_8] : memref<2x4x20xbf16, #tpu.memory_space<vmem>>, vector<1x4x20xbf16>
    %10 = vector.shape_cast %9 : vector<1x4x20xbf16> to vector<4x20xbf16>
    %11 = vector.extract_strided_slice %4 {offsets = [0, 8], sizes = [20, 8], strides = [1, 1]} : vector<20x16xbf16> to vector<20x8xbf16>
    %cst_9 = arith.constant dense<0.000000e+00> : vector<4x8xf32>
    %12 = tpu.matmul %10, %11, %cst_9 {dimension_numbers = #tpu.dot_dimension_numbers<[1], [0], [0], [1], [0, 0, 1, 1], [], []>} : vector<4x20xbf16>, vector<20x8xbf16>, vector<4x8xf32> -> vector<4x8xf32>
    %13 = tpu.concatenate %8, %12 in 1 : vector<4x8xf32>, vector<4x8xf32> -> vector<4x16xf32>
    %14 = vector.shape_cast %13 : vector<4x16xf32> to vector<1x1x4x16xf32>
    %15 = arith.truncf %14 : vector<1x1x4x16xf32> to vector<1x1x4x16xbf16>
    %c0_10 = arith.constant 0 : index
    %c0_11 = arith.constant 0 : index
    %c0_12 = arith.constant 0 : index
    %c0_13 = arith.constant 0 : index
    %16 = vector.load %arg6[%c0_10, %c0_11, %c0_12, %c0_13] : memref<1x1x4x16xbf16, #tpu.memory_space<vmem>>, vector<1x1x4x16xbf16>
    tpu.vector_store %arg6[%c0_10, %c0_11, %c0_12, %c0_13], %15 {strides = array<i32>} : memref<1x1x4x16xbf16, #tpu.memory_space<vmem>>, vector<1x1x4x16xbf16>,
    return
  }
  func.func @transform_0(%arg0: i32, %arg1: i32, %arg2: i32) -> (i32, i32, i32, i32) {
    %c0_i32 = arith.constant 0 : i32
    %c0_i32_0 = arith.constant 0 : i32
    %c0_i32_1 = arith.constant 0 : i32
    return %arg0, %c0_i32, %c0_i32_0, %arg1 : i32, i32, i32, i32
  }
  func.func @transform_1(%arg0: i32, %arg1: i32, %arg2: i32) -> (i32, i32, i32, i32) {
    %c0_i32 = arith.constant 0 : i32
    %c0_i32_0 = arith.constant 0 : i32
    %c0_i32_1 = arith.constant 0 : i32
    return %arg0, %c0_i32, %c0_i32_0, %arg1 : i32, i32, i32, i32
  }
  func.func @transform_2(%arg0: i32, %arg1: i32, %arg2: i32) -> (i32, i32, i32, i32) {
    %c0_i32 = arith.constant 0 : i32
    %c0_i32_0 = arith.constant 0 : i32
    return %arg0, %arg2, %c0_i32, %arg1 : i32, i32, i32, i32
  }
  func.func @transform_3(%arg0: i32, %arg1: i32, %arg2: i32) -> (i32, i32, i32, i32) {
    %c0_i32 = arith.constant 0 : i32
    %c0_i32_0 = arith.constant 0 : i32
    return %arg0, %arg2, %c0_i32, %arg1 : i32, i32, i32, i32
  }
}

module attributes {stable_mosaic.version = 11 : i64} {
  func.func @_chi_attn_kernel(%arg0: i32, %arg1: i32, %arg2: i32, %arg3: memref<1x4x4x16xbf16, #tpu.memory_space<vmem>>, %arg4: memref<1x4x6x16xbf16, #tpu.memory_space<vmem>>, %arg5: memref<1x1x6x16xbf16, #tpu.memory_space<vmem>>, %arg6: memref<1x1x4x16xbf16, #tpu.memory_space<vmem>>, %arg7: memref<2x4x6xbf16, #tpu.memory_space<vmem>>) attributes {dimension_semantics = [#tpu.dimension_semantics<parallel>, #tpu.dimension_semantics<parallel>, #tpu.dimension_semantics<arbitrary>], iteration_bounds = array<i64: 2, 1, 4>, scalar_prefetch = 0 : i64, scratch_operands = 1 : i64, tpu.core_type = #tpu.core_type<tc>, window_params = [{transform_indices = @transform_0, window_bounds = array<i64: 1, 4, 4, 16>}, {transform_indices = @transform_1, window_bounds = array<i64: 1, 4, 6, 16>}, {transform_indices = @transform_2, window_bounds = array<i64: 1, 1, 6, 16>}, {transform_indices = @transform_3, window_bounds = array<i64: 1, 1, 4, 16>}]} {
    %c0_i32 = arith.constant 0 : i32
    %0 = arith.cmpi eq, %arg2, %c0_i32 : i32
    %1 = arith.extui %0 : i1 to i32
    %c0_i32_0 = arith.constant 0 : i32
    %2 = arith.cmpi ne, %1, %c0_i32_0 : i32
    scf.if %2 {
      %c0_14 = arith.constant 0 : index
      %c0_15 = arith.constant 0 : index
      %c0_16 = arith.constant 0 : index
      %c0_17 = arith.constant 0 : index
      %17 = vector.load %arg3[%c0_14, %c0_15, %c0_16, %c0_17] : memref<1x4x4x16xbf16, #tpu.memory_space<vmem>>, vector<1x4x4x16xbf16>
      %18 = arith.extf %17 : vector<1x4x4x16xbf16> to vector<1x4x4x16xf32>
      %cst_18 = arith.constant dense<0.000000e+00> : vector<4x16xf32>
      %19 = vector.multi_reduction <add>, %18, %cst_18 [0, 1] : vector<1x4x4x16xf32> to vector<4x16xf32>
      %cst_19 = arith.constant 4.000000e+00 : f32
      %20 = vector.broadcast %cst_19 : f32 to vector<4x16xf32>
      %21 = arith.divf %19, %20 : vector<4x16xf32>
      %c0_20 = arith.constant 0 : index
      %c0_21 = arith.constant 0 : index
      %c0_22 = arith.constant 0 : index
      %c0_23 = arith.constant 0 : index
      %22 = vector.load %arg4[%c0_20, %c0_21, %c0_22, %c0_23] : memref<1x4x6x16xbf16, #tpu.memory_space<vmem>>, vector<1x4x6x16xbf16>
      %23 = arith.extf %22 : vector<1x4x6x16xbf16> to vector<1x4x6x16xf32>
      %cst_24 = arith.constant dense<0.000000e+00> : vector<6x16xf32>
      %24 = vector.multi_reduction <add>, %23, %cst_24 [0, 1] : vector<1x4x6x16xf32> to vector<6x16xf32>
      %cst_25 = arith.constant 4.000000e+00 : f32
      %25 = vector.broadcast %cst_25 : f32 to vector<6x16xf32>
      %26 = arith.divf %24, %25 : vector<6x16xf32>
      %27 = vector.extract_strided_slice %21 {offsets = [0, 0], sizes = [4, 8], strides = [1, 1]} : vector<4x16xf32> to vector<4x8xf32>
      %cst_26 = arith.constant 0.353553385 : f32
      %28 = vector.broadcast %cst_26 : f32 to vector<4x8xf32>
      %29 = arith.mulf %27, %28 : vector<4x8xf32>
      %30 = arith.truncf %29 : vector<4x8xf32> to vector<4x8xbf16>
      %31 = vector.extract_strided_slice %26 {offsets = [0, 0], sizes = [6, 8], strides = [1, 1]} : vector<6x16xf32> to vector<6x8xf32>
      %32 = arith.truncf %31 : vector<6x8xf32> to vector<6x8xbf16>
      %cst_27 = arith.constant dense<0.000000e+00> : vector<4x6xf32>
      %33 = tpu.matmul %30, %32, %cst_27 {dimension_numbers = #tpu.dot_dimension_numbers<[1], [1], [0], [0], [0, 0, 1, 0], [], []>} : vector<4x8xbf16>, vector<6x8xbf16>, vector<4x6xf32> -> vector<4x6xf32>
      %cst_28 = arith.constant dense<0xFF800000> : vector<4xf32>
      %34 = vector.multi_reduction <maximumf>, %33, %cst_28 [1] : vector<4x6xf32> to vector<4xf32>
      %35 = vector.shape_cast %34 : vector<4xf32> to vector<4x1xf32>
      %36 = vector.broadcast %35 : vector<4x1xf32> to vector<4x6xf32>
      %37 = arith.subf %33, %36 : vector<4x6xf32>
      %38 = math.exp %37 : vector<4x6xf32>
      %cst_29 = arith.constant dense<0.000000e+00> : vector<4xf32>
      %39 = vector.multi_reduction <add>, %38, %cst_29 [1] : vector<4x6xf32> to vector<4xf32>
      %40 = vector.shape_cast %39 : vector<4xf32> to vector<4x1xf32>
      %41 = tpu.reciprocal %40 : vector<4x1xf32> -> vector<4x1xf32>
      %42 = vector.broadcast %41 : vector<4x1xf32> to vector<4x6xf32>
      %43 = arith.mulf %38, %42 : vector<4x6xf32>
      %44 = arith.truncf %43 : vector<4x6xf32> to vector<4x6xbf16>
      %c0_30 = arith.constant 0 : index
      %c0_31 = arith.constant 0 : index
      %c0_32 = arith.constant 0 : index
      %45 = vector.load %arg7[%c0_30, %c0_31, %c0_32] : memref<2x4x6xbf16, #tpu.memory_space<vmem>>, vector<1x4x6xbf16>
      %46 = vector.shape_cast %45 : vector<1x4x6xbf16> to vector<4x6xbf16>
      %47 = vector.shape_cast %44 : vector<4x6xbf16> to vector<1x4x6xbf16>
      tpu.vector_store %arg7[%c0_30, %c0_31, %c0_32], %47 {strides = array<i32>} : memref<2x4x6xbf16, #tpu.memory_space<vmem>>, vector<1x4x6xbf16>,
      %48 = vector.extract_strided_slice %21 {offsets = [0, 8], sizes = [4, 8], strides = [1, 1]} : vector<4x16xf32> to vector<4x8xf32>
      %cst_33 = arith.constant 0.353553385 : f32
      %49 = vector.broadcast %cst_33 : f32 to vector<4x8xf32>
      %50 = arith.mulf %48, %49 : vector<4x8xf32>
      %51 = arith.truncf %50 : vector<4x8xf32> to vector<4x8xbf16>
      %52 = vector.extract_strided_slice %26 {offsets = [0, 8], sizes = [6, 8], strides = [1, 1]} : vector<6x16xf32> to vector<6x8xf32>
      %53 = arith.truncf %52 : vector<6x8xf32> to vector<6x8xbf16>
      %cst_34 = arith.constant dense<0.000000e+00> : vector<4x6xf32>
      %54 = tpu.matmul %51, %53, %cst_34 {dimension_numbers = #tpu.dot_dimension_numbers<[1], [1], [0], [0], [0, 0, 1, 0], [], []>} : vector<4x8xbf16>, vector<6x8xbf16>, vector<4x6xf32> -> vector<4x6xf32>
      %cst_35 = arith.constant dense<0xFF800000> : vector<4xf32>
      %55 = vector.multi_reduction <maximumf>, %54, %cst_35 [1] : vector<4x6xf32> to vector<4xf32>
      %56 = vector.shape_cast %55 : vector<4xf32> to vector<4x1xf32>
      %57 = vector.broadcast %56 : vector<4x1xf32> to vector<4x6xf32>
      %58 = arith.subf %54, %57 : vector<4x6xf32>
      %59 = math.exp %58 : vector<4x6xf32>
      %cst_36 = arith.constant dense<0.000000e+00> : vector<4xf32>
      %60 = vector.multi_reduction <add>, %59, %cst_36 [1] : vector<4x6xf32> to vector<4xf32>
      %61 = vector.shape_cast %60 : vector<4xf32> to vector<4x1xf32>
      %62 = tpu.reciprocal %61 : vector<4x1xf32> -> vector<4x1xf32>
      %63 = vector.broadcast %62 : vector<4x1xf32> to vector<4x6xf32>
      %64 = arith.mulf %59, %63 : vector<4x6xf32>
      %65 = arith.truncf %64 : vector<4x6xf32> to vector<4x6xbf16>
      %c1_37 = arith.constant 1 : index
      %c0_38 = arith.constant 0 : index
      %c0_39 = arith.constant 0 : index
      %66 = vector.load %arg7[%c1_37, %c0_38, %c0_39] : memref<2x4x6xbf16, #tpu.memory_space<vmem>>, vector<1x4x6xbf16>
      %67 = vector.shape_cast %66 : vector<1x4x6xbf16> to vector<4x6xbf16>
      %68 = vector.shape_cast %65 : vector<4x6xbf16> to vector<1x4x6xbf16>
      tpu.vector_store %arg7[%c1_37, %c0_38, %c0_39], %68 {strides = array<i32>} : memref<2x4x6xbf16, #tpu.memory_space<vmem>>, vector<1x4x6xbf16>,
    } else {
    }
    %c0 = arith.constant 0 : index
    %c0_1 = arith.constant 0 : index
    %c0_2 = arith.constant 0 : index
    %c0_3 = arith.constant 0 : index
    %3 = vector.load %arg5[%c0, %c0_1, %c0_2, %c0_3] : memref<1x1x6x16xbf16, #tpu.memory_space<vmem>>, vector<1x1x6x16xbf16>
    %4 = vector.shape_cast %3 : vector<1x1x6x16xbf16> to vector<6x16xbf16>
    %c0_4 = arith.constant 0 : index
    %c0_5 = arith.constant 0 : index
    %c0_6 = arith.constant 0 : index
    %5 = vector.load %arg7[%c0_4, %c0_5, %c0_6] : memref<2x4x6xbf16, #tpu.memory_space<vmem>>, vector<1x4x6xbf16>
    %6 = vector.shape_cast %5 : vector<1x4x6xbf16> to vector<4x6xbf16>
    %7 = vector.extract_strided_slice %4 {offsets = [0, 0], sizes = [6, 8], strides = [1, 1]} : vector<6x16xbf16> to vector<6x8xbf16>
    %cst = arith.constant dense<0.000000e+00> : vector<4x8xf32>
    %8 = tpu.matmul %6, %7, %cst {dimension_numbers = #tpu.dot_dimension_numbers<[1], [0], [0], [1], [0, 0, 1, 1], [], []>} : vector<4x6xbf16>, vector<6x8xbf16>, vector<4x8xf32> -> vector<4x8xf32>
    %c1 = arith.constant 1 : index
    %c0_7 = arith.constant 0 : index
    %c0_8 = arith.constant 0 : index
    %9 = vector.load %arg7[%c1, %c0_7, %c0_8] : memref<2x4x6xbf16, #tpu.memory_space<vmem>>, vector<1x4x6xbf16>
    %10 = vector.shape_cast %9 : vector<1x4x6xbf16> to vector<4x6xbf16>
    %11 = vector.extract_strided_slice %4 {offsets = [0, 8], sizes = [6, 8], strides = [1, 1]} : vector<6x16xbf16> to vector<6x8xbf16>
    %cst_9 = arith.constant dense<0.000000e+00> : vector<4x8xf32>
    %12 = tpu.matmul %10, %11, %cst_9 {dimension_numbers = #tpu.dot_dimension_numbers<[1], [0], [0], [1], [0, 0, 1, 1], [], []>} : vector<4x6xbf16>, vector<6x8xbf16>, vector<4x8xf32> -> vector<4x8xf32>
    %13 = tpu.concatenate %8, %12 in 1 : vector<4x8xf32>, vector<4x8xf32> -> vector<4x16xf32>
    %14 = vector.shape_cast %13 : vector<4x16xf32> to vector<1x1x4x16xf32>
    %15 = arith.truncf %14 : vector<1x1x4x16xf32> to vector<1x1x4x16xbf16>
    %c0_10 = arith.constant 0 : index
    %c0_11 = arith.constant 0 : index
    %c0_12 = arith.constant 0 : index
    %c0_13 = arith.constant 0 : index
    %16 = vector.load %arg6[%c0_10, %c0_11, %c0_12, %c0_13] : memref<1x1x4x16xbf16, #tpu.memory_space<vmem>>, vector<1x1x4x16xbf16>
    tpu.vector_store %arg6[%c0_10, %c0_11, %c0_12, %c0_13], %15 {strides = array<i32>} : memref<1x1x4x16xbf16, #tpu.memory_space<vmem>>, vector<1x1x4x16xbf16>,
    return
  }
  func.func @transform_0(%arg0: i32, %arg1: i32, %arg2: i32) -> (i32, i32, i32, i32) {
    %c0_i32 = arith.constant 0 : i32
    %c0_i32_0 = arith.constant 0 : i32
    %c0_i32_1 = arith.constant 0 : i32
    return %arg0, %c0_i32, %c0_i32_0, %arg1 : i32, i32, i32, i32
  }
  func.func @transform_1(%arg0: i32, %arg1: i32, %arg2: i32) -> (i32, i32, i32, i32) {
    %c0_i32 = arith.constant 0 : i32
    %c0_i32_0 = arith.constant 0 : i32
    %c0_i32_1 = arith.constant 0 : i32
    return %arg0, %c0_i32, %c0_i32_0, %arg1 : i32, i32, i32, i32
  }
  func.func @transform_2(%arg0: i32, %arg1: i32, %arg2: i32) -> (i32, i32, i32, i32) {
    %c0_i32 = arith.constant 0 : i32
    %c0_i32_0 = arith.constant 0 : i32
    return %arg0, %arg2, %c0_i32, %arg1 : i32, i32, i32, i32
  }
  func.func @transform_3(%arg0: i32, %arg1: i32, %arg2: i32) -> (i32, i32, i32, i32) {
    %c0_i32 = arith.constant 0 : i32
    %c0_i32_0 = arith.constant 0 : i32
    return %arg0, %arg2, %c0_i32, %arg1 : i32, i32, i32, i32
  }
}

module attributes {stable_mosaic.version = 11 : i64} {
  func.func @_fused_linear_kernel(%arg0: i32, %arg1: memref<24x16xbf16, #tpu.memory_space<vmem>>, %arg2: memref<16x48xbf16, #tpu.memory_space<vmem>>, %arg3: memref<1x48xf32, #tpu.memory_space<vmem>>, %arg4: memref<24x16xbf16, #tpu.memory_space<vmem>>, %arg5: memref<24x16xbf16, #tpu.memory_space<vmem>>, %arg6: memref<24x16xbf16, #tpu.memory_space<vmem>>) attributes {dimension_semantics = [#tpu.dimension_semantics<parallel>], iteration_bounds = array<i64: 2>, scalar_prefetch = 0 : i64, scratch_operands = 0 : i64, tpu.core_type = #tpu.core_type<tc>, window_params = [{transform_indices = @transform_0, window_bounds = array<i64: 24, 16>}, {pipeline_mode = #tpu.pipeline_mode<synchronous>, transform_indices = @transform_1, window_bounds = array<i64: 16, 48>}, {pipeline_mode = #tpu.pipeline_mode<synchronous>, transform_indices = @transform_2, window_bounds = array<i64: 1, 48>}, {transform_indices = @transform_3, window_bounds = array<i64: 24, 16>}, {transform_indices = @transform_4, window_bounds = array<i64: 24, 16>}, {transform_indices = @transform_5, window_bounds = array<i64: 24, 16>}]} {
    %c0 = arith.constant 0 : index
    %c0_0 = arith.constant 0 : index
    %0 = vector.load %arg1[%c0, %c0_0] : memref<24x16xbf16, #tpu.memory_space<vmem>>, vector<24x16xbf16>
    %c0_1 = arith.constant 0 : index
    %c0_2 = arith.constant 0 : index
    %1 = vector.load %arg2[%c0_1, %c0_2] : memref<16x48xbf16, #tpu.memory_space<vmem>>, vector<16x48xbf16>
    %cst = arith.constant dense<0.000000e+00> : vector<24x48xf32>
    %2 = tpu.matmul %0, %1, %cst {dimension_numbers = #tpu.dot_dimension_numbers<[1], [0], [0], [1], [0, 0, 1, 1], [], []>} : vector<24x16xbf16>, vector<16x48xbf16>, vector<24x48xf32> -> vector<24x48xf32>
    %c0_3 = arith.constant 0 : index
    %c0_4 = arith.constant 0 : index
    %3 = vector.load %arg3[%c0_3, %c0_4] : memref<1x48xf32, #tpu.memory_space<vmem>>, vector<1x48xf32>
    %4 = vector.broadcast %3 : vector<1x48xf32> to vector<24x48xf32>
    %5 = arith.addf %2, %4 : vector<24x48xf32>
    %6 = vector.extract_strided_slice %5 {offsets = [0, 0], sizes = [24, 16], strides = [1, 1]} : vector<24x48xf32> to vector<24x16xf32>
    %7 = arith.truncf %6 : vector<24x16xf32> to vector<24x16xbf16>
    %c0_5 = arith.constant 0 : index
    %c0_6 = arith.constant 0 : index
    %8 = vector.load %arg4[%c0_5, %c0_6] : memref<24x16xbf16, #tpu.memory_space<vmem>>, vector<24x16xbf16>
    tpu.vector_store %arg4[%c0_5, %c0_6], %7 {strides = array<i32>} : memref<24x16xbf16, #tpu.memory_space<vmem>>, vector<24x16xbf16>,
    %9 = vector.extract_strided_slice %5 {offsets = [0, 16], sizes = [24, 16], strides = [1, 1]} : vector<24x48xf32> to vector<24x16xf32>
    %10 = arith.truncf %9 : vector<24x16xf32> to vector<24x16xbf16>
    %c0_7 = arith.constant 0 : index
    %c0_8 = arith.constant 0 : index
    %11 = vector.load %arg5[%c0_7, %c0_8] : memref<24x16xbf16, #tpu.memory_space<vmem>>, vector<24x16xbf16>
    tpu.vector_store %arg5[%c0_7, %c0_8], %10 {strides = array<i32>} : memref<24x16xbf16, #tpu.memory_space<vmem>>, vector<24x16xbf16>,
    %12 = vector.extract_strided_slice %5 {offsets = [0, 32], sizes = [24, 16], strides = [1, 1]} : vector<24x48xf32> to vector<24x16xf32>
    %13 = arith.truncf %12 : vector<24x16xf32> to vector<24x16xbf16>
    %c0_9 = arith.constant 0 : index
    %c0_10 = arith.constant 0 : index
    %14 = vector.load %arg6[%c0_9, %c0_10] : memref<24x16xbf16, #tpu.memory_space<vmem>>, vector<24x16xbf16>
    tpu.vector_store %arg6[%c0_9, %c0_10], %13 {strides = array<i32>} : memref<24x16xbf16, #tpu.memory_space<vmem>>, vector<24x16xbf16>,
    return
  }
  func.func @transform_0(%arg0: i32) -> (i32, i32) {
    %c0_i32 = arith.constant 0 : i32
    %c0_i32_0 = arith.constant 0 : i32
    return %arg0, %c0_i32 : i32, i32
  }
  func.func @transform_1(%arg0: i32) -> (i32, i32) {
    %c0_i32 = arith.constant 0 : i32
    %c0_i32_0 = arith.constant 0 : i32
    %c0_i32_1 = arith.constant 0 : i32
    return %c0_i32, %c0_i32_0 : i32, i32
  }
  func.func @transform_2(%arg0: i32) -> (i32, i32) {
    %c0_i32 = arith.constant 0 : i32
    %c0_i32_0 = arith.constant 0 : i32
    %c0_i32_1 = arith.constant 0 : i32
    return %c0_i32, %c0_i32_0 : i32, i32
  }
  func.func @transform_3(%arg0: i32) -> (i32, i32) {
    %c0_i32 = arith.constant 0 : i32
    %c0_i32_0 = arith.constant 0 : i32
    return %arg0, %c0_i32 : i32, i32
  }
  func.func @transform_4(%arg0: i32) -> (i32, i32) {
    %c0_i32 = arith.constant 0 : i32
    %c0_i32_0 = arith.constant 0 : i32
    return %arg0, %c0_i32 : i32, i32
  }
  func.func @transform_5(%arg0: i32) -> (i32, i32) {
    %c0_i32 = arith.constant 0 : i32
    %c0_i32_0 = arith.constant 0 : i32
    return %arg0, %c0_i32 : i32, i32
  }
}

module attributes {stable_mosaic.version = 11 : i64} {
  func.func @_fused_linear_kernel(%arg0: i32, %arg1: memref<32x16xbf16, #tpu.memory_space<vmem>>, %arg2: memref<16x32xbf16, #tpu.memory_space<vmem>>, %arg3: memref<1x32xf32, #tpu.memory_space<vmem>>, %arg4: memref<32x16xbf16, #tpu.memory_space<vmem>>, %arg5: memref<32x16xbf16, #tpu.memory_space<vmem>>) attributes {dimension_semantics = [#tpu.dimension_semantics<parallel>], iteration_bounds = array<i64: 2>, scalar_prefetch = 0 : i64, scratch_operands = 0 : i64, tpu.core_type = #tpu.core_type<tc>, window_params = [{transform_indices = @transform_0, window_bounds = array<i64: 32, 16>}, {pipeline_mode = #tpu.pipeline_mode<synchronous>, transform_indices = @transform_1, window_bounds = array<i64: 16, 32>}, {pipeline_mode = #tpu.pipeline_mode<synchronous>, transform_indices = @transform_2, window_bounds = array<i64: 1, 32>}, {transform_indices = @transform_3, window_bounds = array<i64: 32, 16>}, {transform_indices = @transform_4, window_bounds = array<i64: 32, 16>}]} {
    %c0 = arith.constant 0 : index
    %c0_0 = arith.constant 0 : index
    %0 = vector.load %arg1[%c0, %c0_0] : memref<32x16xbf16, #tpu.memory_space<vmem>>, vector<32x16xbf16>
    %c0_1 = arith.constant 0 : index
    %c0_2 = arith.constant 0 : index
    %1 = vector.load %arg2[%c0_1, %c0_2] : memref<16x32xbf16, #tpu.memory_space<vmem>>, vector<16x32xbf16>
    %cst = arith.constant dense<0.000000e+00> : vector<32x32xf32>
    %2 = tpu.matmul %0, %1, %cst {dimension_numbers = #tpu.dot_dimension_numbers<[1], [0], [0], [1], [0, 0, 1, 1], [], []>} : vector<32x16xbf16>, vector<16x32xbf16>, vector<32x32xf32> -> vector<32x32xf32>
    %c0_3 = arith.constant 0 : index
    %c0_4 = arith.constant 0 : index
    %3 = vector.load %arg3[%c0_3, %c0_4] : memref<1x32xf32, #tpu.memory_space<vmem>>, vector<1x32xf32>
    %4 = vector.broadcast %3 : vector<1x32xf32> to vector<32x32xf32>
    %5 = arith.addf %2, %4 : vector<32x32xf32>
    %6 = vector.extract_strided_slice %5 {offsets = [0, 0], sizes = [32, 16], strides = [1, 1]} : vector<32x32xf32> to vector<32x16xf32>
    %7 = arith.truncf %6 : vector<32x16xf32> to vector<32x16xbf16>
    %c0_5 = arith.constant 0 : index
    %c0_6 = arith.constant 0 : index
    %8 = vector.load %arg4[%c0_5, %c0_6] : memref<32x16xbf16, #tpu.memory_space<vmem>>, vector<32x16xbf16>
    tpu.vector_store %arg4[%c0_5, %c0_6], %7 {strides = array<i32>} : memref<32x16xbf16, #tpu.memory_space<vmem>>, vector<32x16xbf16>,
    %9 = vector.extract_strided_slice %5 {offsets = [0, 16], sizes = [32, 16], strides = [1, 1]} : vector<32x32xf32> to vector<32x16xf32>
    %10 = arith.truncf %9 : vector<32x16xf32> to vector<32x16xbf16>
    %c0_7 = arith.constant 0 : index
    %c0_8 = arith.constant 0 : index
    %11 = vector.load %arg5[%c0_7, %c0_8] : memref<32x16xbf16, #tpu.memory_space<vmem>>, vector<32x16xbf16>
    tpu.vector_store %arg5[%c0_7, %c0_8], %10 {strides = array<i32>} : memref<32x16xbf16, #tpu.memory_space<vmem>>, vector<32x16xbf16>,
    return
  }
  func.func @transform_0(%arg0: i32) -> (i32, i32) {
    %c0_i32 = arith.constant 0 : i32
    %c0_i32_0 = arith.constant 0 : i32
    return %arg0, %c0_i32 : i32, i32
  }
  func.func @transform_1(%arg0: i32) -> (i32, i32) {
    %c0_i32 = arith.constant 0 : i32
    %c0_i32_0 = arith.constant 0 : i32
    %c0_i32_1 = arith.constant 0 : i32
    return %c0_i32, %c0_i32_0 : i32, i32
  }
  func.func @transform_2(%arg0: i32) -> (i32, i32) {
    %c0_i32 = arith.constant 0 : i32
    %c0_i32_0 = arith.constant 0 : i32
    %c0_i32_1 = arith.constant 0 : i32
    return %c0_i32, %c0_i32_0 : i32, i32
  }
  func.func @transform_3(%arg0: i32) -> (i32, i32) {
    %c0_i32 = arith.constant 0 : i32
    %c0_i32_0 = arith.constant 0 : i32
    return %arg0, %c0_i32 : i32, i32
  }
  func.func @transform_4(%arg0: i32) -> (i32, i32) {
    %c0_i32 = arith.constant 0 : i32
    %c0_i32_0 = arith.constant 0 : i32
    return %arg0, %c0_i32 : i32, i32
  }
}

module attributes {stable_mosaic.version = 11 : i64} {
  func.func @_chi_attn_kernel(%arg0: i32, %arg1: i32, %arg2: i32, %arg3: memref<1x4x20x16xbf16, #tpu.memory_space<vmem>>, %arg4: memref<1x4x8x16xbf16, #tpu.memory_space<vmem>>, %arg5: memref<1x1x8x16xbf16, #tpu.memory_space<vmem>>, %arg6: memref<1x1x20x16xbf16, #tpu.memory_space<vmem>>, %arg7: memref<2x20x8xbf16, #tpu.memory_space<vmem>>) attributes {dimension_semantics = [#tpu.dimension_semantics<parallel>, #tpu.dimension_semantics<parallel>, #tpu.dimension_semantics<arbitrary>], iteration_bounds = array<i64: 2, 1, 4>, scalar_prefetch = 0 : i64, scratch_operands = 1 : i64, tpu.core_type = #tpu.core_type<tc>, window_params = [{transform_indices = @transform_0, window_bounds = array<i64: 1, 4, 20, 16>}, {transform_indices = @transform_1, window_bounds = array<i64: 1, 4, 8, 16>}, {transform_indices = @transform_2, window_bounds = array<i64: 1, 1, 8, 16>}, {transform_indices = @transform_3, window_bounds = array<i64: 1, 1, 20, 16>}]} {
    %c0_i32 = arith.constant 0 : i32
    %0 = arith.cmpi eq, %arg2, %c0_i32 : i32
    %1 = arith.extui %0 : i1 to i32
    %c0_i32_0 = arith.constant 0 : i32
    %2 = arith.cmpi ne, %1, %c0_i32_0 : i32
    scf.if %2 {
      %c0_14 = arith.constant 0 : index
      %c0_15 = arith.constant 0 : index
      %c0_16 = arith.constant 0 : index
      %c0_17 = arith.constant 0 : index
      %17 = vector.load %arg3[%c0_14, %c0_15, %c0_16, %c0_17] : memref<1x4x20x16xbf16, #tpu.memory_space<vmem>>, vector<1x4x20x16xbf16>
      %18 = arith.extf %17 : vector<1x4x20x16xbf16> to vector<1x4x20x16xf32>
      %cst_18 = arith.constant dense<0.000000e+00> : vector<20x16xf32>
      %19 = vector.multi_reduction <add>, %18, %cst_18 [0, 1] : vector<1x4x20x16xf32> to vector<20x16xf32>
      %cst_19 = arith.constant 4.000000e+00 : f32
      %20 = vector.broadcast %cst_19 : f32 to vector<20x16xf32>
      %21 = arith.divf %19, %20 : vector<20x16xf32>
      %c0_20 = arith.constant 0 : index
      %c0_21 = arith.constant 0 : index
      %c0_22 = arith.constant 0 : index
      %c0_23 = arith.constant 0 : index
      %22 = vector.load %arg4[%c0_20, %c0_21, %c0_22, %c0_23] : memref<1x4x8x16xbf16, #tpu.memory_space<vmem>>, vector<1x4x8x16xbf16>
      %23 = arith.extf %22 : vector<1x4x8x16xbf16> to vector<1x4x8x16xf32>
      %cst_24 = arith.constant dense<0.000000e+00> : vector<8x16xf32>
      %24 = vector.multi_reduction <add>, %23, %cst_24 [0, 1] : vector<1x4x8x16xf32> to vector<8x16xf32>
      %cst_25 = arith.constant 4.000000e+00 : f32
      %25 = vector.broadcast %cst_25 : f32 to vector<8x16xf32>
      %26 = arith.divf %24, %25 : vector<8x16xf32>
      %27 = vector.extract_strided_slice %21 {offsets = [0, 0], sizes = [20, 8], strides = [1, 1]} : vector<20x16xf32> to vector<20x8xf32>
      %cst_26 = arith.constant 0.353553385 : f32
      %28 = vector.broadcast %cst_26 : f32 to vector<20x8xf32>
      %29 = arith.mulf %27, %28 : vector<20x8xf32>
      %30 = arith.truncf %29 : vector<20x8xf32> to vector<20x8xbf16>
      %31 = vector.extract_strided_slice %26 {offsets = [0, 0], sizes = [8, 8], strides = [1, 1]} : vector<8x16xf32> to vector<8x8xf32>
      %32 = arith.truncf %31 : vector<8x8xf32> to vector<8x8xbf16>
      %cst_27 = arith.constant dense<0.000000e+00> : vector<20x8xf32>
      %33 = tpu.matmul %30, %32, %cst_27 {dimension_numbers = #tpu.dot_dimension_numbers<[1], [1], [0], [0], [0, 0, 1, 0], [], []>} : vector<20x8xbf16>, vector<8x8xbf16>, vector<20x8xf32> -> vector<20x8xf32>
      %cst_28 = arith.constant dense<0xFF800000> : vector<20xf32>
      %34 = vector.multi_reduction <maximumf>, %33, %cst_28 [1] : vector<20x8xf32> to vector<20xf32>
      %35 = vector.shape_cast %34 : vector<20xf32> to vector<20x1xf32>
      %36 = vector.broadcast %35 : vector<20x1xf32> to vector<20x8xf32>
      %37 = arith.subf %33, %36 : vector<20x8xf32>
      %38 = math.exp %37 : vector<20x8xf32>
      %cst_29 = arith.constant dense<0.000000e+00> : vector<20xf32>
      %39 = vector.multi_reduction <add>, %38, %cst_29 [1] : vector<20x8xf32> to vector<20xf32>
      %40 = vector.shape_cast %39 : vector<20xf32> to vector<20x1xf32>
      %41 = tpu.reciprocal %40 : vector<20x1xf32> -> vector<20x1xf32>
      %42 = vector.broadcast %41 : vector<20x1xf32> to vector<20x8xf32>
      %43 = arith.mulf %38, %42 : vector<20x8xf32>
      %44 = arith.truncf %43 : vector<20x8xf32> to vector<20x8xbf16>
      %c0_30 = arith.constant 0 : index
      %c0_31 = arith.constant 0 : index
      %c0_32 = arith.constant 0 : index
      %45 = vector.load %arg7[%c0_30, %c0_31, %c0_32] : memref<2x20x8xbf16, #tpu.memory_space<vmem>>, vector<1x20x8xbf16>
      %46 = vector.shape_cast %45 : vector<1x20x8xbf16> to vector<20x8xbf16>
      %47 = vector.shape_cast %44 : vector<20x8xbf16> to vector<1x20x8xbf16>
      tpu.vector_store %arg7[%c0_30, %c0_31, %c0_32], %47 {strides = array<i32>} : memref<2x20x8xbf16, #tpu.memory_space<vmem>>, vector<1x20x8xbf16>,
      %48 = vector.extract_strided_slice %21 {offsets = [0, 8], sizes = [20, 8], strides = [1, 1]} : vector<20x16xf32> to vector<20x8xf32>
      %cst_33 = arith.constant 0.353553385 : f32
      %49 = vector.broadcast %cst_33 : f32 to vector<20x8xf32>
      %50 = arith.mulf %48, %49 : vector<20x8xf32>
      %51 = arith.truncf %50 : vector<20x8xf32> to vector<20x8xbf16>
      %52 = vector.extract_strided_slice %26 {offsets = [0, 8], sizes = [8, 8], strides = [1, 1]} : vector<8x16xf32> to vector<8x8xf32>
      %53 = arith.truncf %52 : vector<8x8xf32> to vector<8x8xbf16>
      %cst_34 = arith.constant dense<0.000000e+00> : vector<20x8xf32>
      %54 = tpu.matmul %51, %53, %cst_34 {dimension_numbers = #tpu.dot_dimension_numbers<[1], [1], [0], [0], [0, 0, 1, 0], [], []>} : vector<20x8xbf16>, vector<8x8xbf16>, vector<20x8xf32> -> vector<20x8xf32>
      %cst_35 = arith.constant dense<0xFF800000> : vector<20xf32>
      %55 = vector.multi_reduction <maximumf>, %54, %cst_35 [1] : vector<20x8xf32> to vector<20xf32>
      %56 = vector.shape_cast %55 : vector<20xf32> to vector<20x1xf32>
      %57 = vector.broadcast %56 : vector<20x1xf32> to vector<20x8xf32>
      %58 = arith.subf %54, %57 : vector<20x8xf32>
      %59 = math.exp %58 : vector<20x8xf32>
      %cst_36 = arith.constant dense<0.000000e+00> : vector<20xf32>
      %60 = vector.multi_reduction <add>, %59, %cst_36 [1] : vector<20x8xf32> to vector<20xf32>
      %61 = vector.shape_cast %60 : vector<20xf32> to vector<20x1xf32>
      %62 = tpu.reciprocal %61 : vector<20x1xf32> -> vector<20x1xf32>
      %63 = vector.broadcast %62 : vector<20x1xf32> to vector<20x8xf32>
      %64 = arith.mulf %59, %63 : vector<20x8xf32>
      %65 = arith.truncf %64 : vector<20x8xf32> to vector<20x8xbf16>
      %c1_37 = arith.constant 1 : index
      %c0_38 = arith.constant 0 : index
      %c0_39 = arith.constant 0 : index
      %66 = vector.load %arg7[%c1_37, %c0_38, %c0_39] : memref<2x20x8xbf16, #tpu.memory_space<vmem>>, vector<1x20x8xbf16>
      %67 = vector.shape_cast %66 : vector<1x20x8xbf16> to vector<20x8xbf16>
      %68 = vector.shape_cast %65 : vector<20x8xbf16> to vector<1x20x8xbf16>
      tpu.vector_store %arg7[%c1_37, %c0_38, %c0_39], %68 {strides = array<i32>} : memref<2x20x8xbf16, #tpu.memory_space<vmem>>, vector<1x20x8xbf16>,
    } else {
    }
    %c0 = arith.constant 0 : index
    %c0_1 = arith.constant 0 : index
    %c0_2 = arith.constant 0 : index
    %c0_3 = arith.constant 0 : index
    %3 = vector.load %arg5[%c0, %c0_1, %c0_2, %c0_3] : memref<1x1x8x16xbf16, #tpu.memory_space<vmem>>, vector<1x1x8x16xbf16>
    %4 = vector.shape_cast %3 : vector<1x1x8x16xbf16> to vector<8x16xbf16>
    %c0_4 = arith.constant 0 : index
    %c0_5 = arith.constant 0 : index
    %c0_6 = arith.constant 0 : index
    %5 = vector.load %arg7[%c0_4, %c0_5, %c0_6] : memref<2x20x8xbf16, #tpu.memory_space<vmem>>, vector<1x20x8xbf16>
    %6 = vector.shape_cast %5 : vector<1x20x8xbf16> to vector<20x8xbf16>
    %7 = vector.extract_strided_slice %4 {offsets = [0, 0], sizes = [8, 8], strides = [1, 1]} : vector<8x16xbf16> to vector<8x8xbf16>
    %cst = arith.constant dense<0.000000e+00> : vector<20x8xf32>
    %8 = tpu.matmul %6, %7, %cst {dimension_numbers = #tpu.dot_dimension_numbers<[1], [0], [0], [1], [0, 0, 1, 1], [], []>} : vector<20x8xbf16>, vector<8x8xbf16>, vector<20x8xf32> -> vector<20x8xf32>
    %c1 = arith.constant 1 : index
    %c0_7 = arith.constant 0 : index
    %c0_8 = arith.constant 0 : index
    %9 = vector.load %arg7[%c1, %c0_7, %c0_8] : memref<2x20x8xbf16, #tpu.memory_space<vmem>>, vector<1x20x8xbf16>
    %10 = vector.shape_cast %9 : vector<1x20x8xbf16> to vector<20x8xbf16>
    %11 = vector.extract_strided_slice %4 {offsets = [0, 8], sizes = [8, 8], strides = [1, 1]} : vector<8x16xbf16> to vector<8x8xbf16>
    %cst_9 = arith.constant dense<0.000000e+00> : vector<20x8xf32>
    %12 = tpu.matmul %10, %11, %cst_9 {dimension_numbers = #tpu.dot_dimension_numbers<[1], [0], [0], [1], [0, 0, 1, 1], [], []>} : vector<20x8xbf16>, vector<8x8xbf16>, vector<20x8xf32> -> vector<20x8xf32>
    %13 = tpu.concatenate %8, %12 in 1 : vector<20x8xf32>, vector<20x8xf32> -> vector<20x16xf32>
    %14 = vector.shape_cast %13 : vector<20x16xf32> to vector<1x1x20x16xf32>
    %15 = arith.truncf %14 : vector<1x1x20x16xf32> to vector<1x1x20x16xbf16>
    %c0_10 = arith.constant 0 : index
    %c0_11 = arith.constant 0 : index
    %c0_12 = arith.constant 0 : index
    %c0_13 = arith.constant 0 : index
    %16 = vector.load %arg6[%c0_10, %c0_11, %c0_12, %c0_13] : memref<1x1x20x16xbf16, #tpu.memory_space<vmem>>, vector<1x1x20x16xbf16>
    tpu.vector_store %arg6[%c0_10, %c0_11, %c0_12, %c0_13], %15 {strides = array<i32>} : memref<1x1x20x16xbf16, #tpu.memory_space<vmem>>, vector<1x1x20x16xbf16>,
    return
  }
  func.func @transform_0(%arg0: i32, %arg1: i32, %arg2: i32) -> (i32, i32, i32, i32) {
    %c0_i32 = arith.constant 0 : i32
    %c0_i32_0 = arith.constant 0 : i32
    %c0_i32_1 = arith.constant 0 : i32
    return %arg0, %c0_i32, %c0_i32_0, %arg1 : i32, i32, i32, i32
  }
  func.func @transform_1(%arg0: i32, %arg1: i32, %arg2: i32) -> (i32, i32, i32, i32) {
    %c0_i32 = arith.constant 0 : i32
    %c0_i32_0 = arith.constant 0 : i32
    %c0_i32_1 = arith.constant 0 : i32
    return %arg0, %c0_i32, %c0_i32_0, %arg1 : i32, i32, i32, i32
  }
  func.func @transform_2(%arg0: i32, %arg1: i32, %arg2: i32) -> (i32, i32, i32, i32) {
    %c0_i32 = arith.constant 0 : i32
    %c0_i32_0 = arith.constant 0 : i32
    return %arg0, %arg2, %c0_i32, %arg1 : i32, i32, i32, i32
  }
  func.func @transform_3(%arg0: i32, %arg1: i32, %arg2: i32) -> (i32, i32, i32, i32) {
    %c0_i32 = arith.constant 0 : i32
    %c0_i32_0 = arith.constant 0 : i32
    return %arg0, %arg2, %c0_i32, %arg1 : i32, i32, i32, i32
  }
}

module attributes {stable_mosaic.version = 11 : i64} {
  func.func @_ln_res_kernel(%arg0: i32, %arg1: memref<80x16xbf16, #tpu.memory_space<vmem>>, %arg2: memref<1x16xf32, #tpu.memory_space<vmem>>, %arg3: memref<1x16xf32, #tpu.memory_space<vmem>>, %arg4: memref<80x16xbf16, #tpu.memory_space<vmem>>, %arg5: memref<80x16xbf16, #tpu.memory_space<vmem>>) attributes {dimension_semantics = [#tpu.dimension_semantics<parallel>], iteration_bounds = array<i64: 2>, scalar_prefetch = 0 : i64, scratch_operands = 0 : i64, tpu.core_type = #tpu.core_type<tc>, window_params = [{transform_indices = @transform_0, window_bounds = array<i64: 80, 16>}, {pipeline_mode = #tpu.pipeline_mode<synchronous>, transform_indices = @transform_1, window_bounds = array<i64: 1, 16>}, {pipeline_mode = #tpu.pipeline_mode<synchronous>, transform_indices = @transform_2, window_bounds = array<i64: 1, 16>}, {transform_indices = @transform_3, window_bounds = array<i64: 80, 16>}, {transform_indices = @transform_4, window_bounds = array<i64: 80, 16>}]} {
    %c0 = arith.constant 0 : index
    %c0_0 = arith.constant 0 : index
    %0 = vector.load %arg1[%c0, %c0_0] : memref<80x16xbf16, #tpu.memory_space<vmem>>, vector<80x16xbf16>
    %1 = arith.extf %0 : vector<80x16xbf16> to vector<80x16xf32>
    %cst = arith.constant dense<0.000000e+00> : vector<80xf32>
    %2 = vector.multi_reduction <add>, %1, %cst [1] : vector<80x16xf32> to vector<80xf32>
    %3 = vector.shape_cast %2 : vector<80xf32> to vector<80x1xf32>
    %cst_1 = arith.constant 1.600000e+01 : f32
    %4 = vector.broadcast %cst_1 : f32 to vector<80x1xf32>
    %5 = arith.divf %3, %4 : vector<80x1xf32>
    %6 = vector.broadcast %5 : vector<80x1xf32> to vector<80x16xf32>
    %7 = arith.subf %1, %6 : vector<80x16xf32>
    %8 = arith.mulf %7, %7 : vector<80x16xf32>
    %cst_2 = arith.constant dense<0.000000e+00> : vector<80xf32>
    %9 = vector.multi_reduction <add>, %8, %cst_2 [1] : vector<80x16xf32> to vector<80xf32>
    %10 = vector.shape_cast %9 : vector<80xf32> to vector<80x1xf32>
    %cst_3 = arith.constant 1.600000e+01 : f32
    %11 = vector.broadcast %cst_3 : f32 to vector<80x1xf32>
    %12 = arith.divf %10, %11 : vector<80x1xf32>
    %cst_4 = arith.constant 9.99999974E-6 : f32
    %13 = vector.broadcast %cst_4 : f32 to vector<80x1xf32>
    %14 = arith.addf %12, %13 : vector<80x1xf32>
    %15 = math.rsqrt %14 : vector<80x1xf32>
    %16 = vector.broadcast %15 : vector<80x1xf32> to vector<80x16xf32>
    %17 = arith.mulf %7, %16 : vector<80x16xf32>
    %c0_5 = arith.constant 0 : index
    %c0_6 = arith.constant 0 : index
    %18 = vector.load %arg2[%c0_5, %c0_6] : memref<1x16xf32, #tpu.memory_space<vmem>>, vector<1x16xf32>
    %19 = vector.broadcast %18 : vector<1x16xf32> to vector<80x16xf32>
    %20 = arith.mulf %17, %19 : vector<80x16xf32>
    %c0_7 = arith.constant 0 : index
    %c0_8 = arith.constant 0 : index
    %21 = vector.load %arg3[%c0_7, %c0_8] : memref<1x16xf32, #tpu.memory_space<vmem>>, vector<1x16xf32>
    %22 = vector.broadcast %21 : vector<1x16xf32> to vector<80x16xf32>
    %23 = arith.addf %20, %22 : vector<80x16xf32>
    %c0_9 = arith.constant 0 : index
    %c0_10 = arith.constant 0 : index
    %24 = vector.load %arg4[%c0_9, %c0_10] : memref<80x16xbf16, #tpu.memory_space<vmem>>, vector<80x16xbf16>
    %25 = arith.extf %24 : vector<80x16xbf16> to vector<80x16xf32>
    %26 = arith.addf %25, %23 : vector<80x16xf32>
    %27 = arith.truncf %26 : vector<80x16xf32> to vector<80x16xbf16>
    %c0_11 = arith.constant 0 : index
    %c0_12 = arith.constant 0 : index
    %28 = vector.load %arg5[%c0_11, %c0_12] : memref<80x16xbf16, #tpu.memory_space<vmem>>, vector<80x16xbf16>
    tpu.vector_store %arg5[%c0_11, %c0_12], %27 {strides = array<i32>} : memref<80x16xbf16, #tpu.memory_space<vmem>>, vector<80x16xbf16>,
    return
  }
  func.func @transform_0(%arg0: i32) -> (i32, i32) {
    %c0_i32 = arith.constant 0 : i32
    %c0_i32_0 = arith.constant 0 : i32
    return %arg0, %c0_i32 : i32, i32
  }
  func.func @transform_1(%arg0: i32) -> (i32, i32) {
    %c0_i32 = arith.constant 0 : i32
    %c0_i32_0 = arith.constant 0 : i32
    %c0_i32_1 = arith.constant 0 : i32
    return %c0_i32, %c0_i32_0 : i32, i32
  }
  func.func @transform_2(%arg0: i32) -> (i32, i32) {
    %c0_i32 = arith.constant 0 : i32
    %c0_i32_0 = arith.constant 0 : i32
    %c0_i32_1 = arith.constant 0 : i32
    return %c0_i32, %c0_i32_0 : i32, i32
  }
  func.func @transform_3(%arg0: i32) -> (i32, i32) {
    %c0_i32 = arith.constant 0 : i32
    %c0_i32_0 = arith.constant 0 : i32
    return %arg0, %c0_i32 : i32, i32
  }
  func.func @transform_4(%arg0: i32) -> (i32, i32) {
    %c0_i32 = arith.constant 0 : i32
    %c0_i32_0 = arith.constant 0 : i32
    return %arg0, %c0_i32 : i32, i32
  }
}

module attributes {stable_mosaic.version = 11 : i64} {
  func.func @_ln_res_kernel(%arg0: i32, %arg1: memref<24x16xbf16, #tpu.memory_space<vmem>>, %arg2: memref<1x16xf32, #tpu.memory_space<vmem>>, %arg3: memref<1x16xf32, #tpu.memory_space<vmem>>, %arg4: memref<24x16xbf16, #tpu.memory_space<vmem>>, %arg5: memref<24x16xbf16, #tpu.memory_space<vmem>>) attributes {dimension_semantics = [#tpu.dimension_semantics<parallel>], iteration_bounds = array<i64: 2>, scalar_prefetch = 0 : i64, scratch_operands = 0 : i64, tpu.core_type = #tpu.core_type<tc>, window_params = [{transform_indices = @transform_0, window_bounds = array<i64: 24, 16>}, {pipeline_mode = #tpu.pipeline_mode<synchronous>, transform_indices = @transform_1, window_bounds = array<i64: 1, 16>}, {pipeline_mode = #tpu.pipeline_mode<synchronous>, transform_indices = @transform_2, window_bounds = array<i64: 1, 16>}, {transform_indices = @transform_3, window_bounds = array<i64: 24, 16>}, {transform_indices = @transform_4, window_bounds = array<i64: 24, 16>}]} {
    %c0 = arith.constant 0 : index
    %c0_0 = arith.constant 0 : index
    %0 = vector.load %arg1[%c0, %c0_0] : memref<24x16xbf16, #tpu.memory_space<vmem>>, vector<24x16xbf16>
    %1 = arith.extf %0 : vector<24x16xbf16> to vector<24x16xf32>
    %cst = arith.constant dense<0.000000e+00> : vector<24xf32>
    %2 = vector.multi_reduction <add>, %1, %cst [1] : vector<24x16xf32> to vector<24xf32>
    %3 = vector.shape_cast %2 : vector<24xf32> to vector<24x1xf32>
    %cst_1 = arith.constant 1.600000e+01 : f32
    %4 = vector.broadcast %cst_1 : f32 to vector<24x1xf32>
    %5 = arith.divf %3, %4 : vector<24x1xf32>
    %6 = vector.broadcast %5 : vector<24x1xf32> to vector<24x16xf32>
    %7 = arith.subf %1, %6 : vector<24x16xf32>
    %8 = arith.mulf %7, %7 : vector<24x16xf32>
    %cst_2 = arith.constant dense<0.000000e+00> : vector<24xf32>
    %9 = vector.multi_reduction <add>, %8, %cst_2 [1] : vector<24x16xf32> to vector<24xf32>
    %10 = vector.shape_cast %9 : vector<24xf32> to vector<24x1xf32>
    %cst_3 = arith.constant 1.600000e+01 : f32
    %11 = vector.broadcast %cst_3 : f32 to vector<24x1xf32>
    %12 = arith.divf %10, %11 : vector<24x1xf32>
    %cst_4 = arith.constant 9.99999974E-6 : f32
    %13 = vector.broadcast %cst_4 : f32 to vector<24x1xf32>
    %14 = arith.addf %12, %13 : vector<24x1xf32>
    %15 = math.rsqrt %14 : vector<24x1xf32>
    %16 = vector.broadcast %15 : vector<24x1xf32> to vector<24x16xf32>
    %17 = arith.mulf %7, %16 : vector<24x16xf32>
    %c0_5 = arith.constant 0 : index
    %c0_6 = arith.constant 0 : index
    %18 = vector.load %arg2[%c0_5, %c0_6] : memref<1x16xf32, #tpu.memory_space<vmem>>, vector<1x16xf32>
    %19 = vector.broadcast %18 : vector<1x16xf32> to vector<24x16xf32>
    %20 = arith.mulf %17, %19 : vector<24x16xf32>
    %c0_7 = arith.constant 0 : index
    %c0_8 = arith.constant 0 : index
    %21 = vector.load %arg3[%c0_7, %c0_8] : memref<1x16xf32, #tpu.memory_space<vmem>>, vector<1x16xf32>
    %22 = vector.broadcast %21 : vector<1x16xf32> to vector<24x16xf32>
    %23 = arith.addf %20, %22 : vector<24x16xf32>
    %c0_9 = arith.constant 0 : index
    %c0_10 = arith.constant 0 : index
    %24 = vector.load %arg4[%c0_9, %c0_10] : memref<24x16xbf16, #tpu.memory_space<vmem>>, vector<24x16xbf16>
    %25 = arith.extf %24 : vector<24x16xbf16> to vector<24x16xf32>
    %26 = arith.addf %25, %23 : vector<24x16xf32>
    %27 = arith.truncf %26 : vector<24x16xf32> to vector<24x16xbf16>
    %c0_11 = arith.constant 0 : index
    %c0_12 = arith.constant 0 : index
    %28 = vector.load %arg5[%c0_11, %c0_12] : memref<24x16xbf16, #tpu.memory_space<vmem>>, vector<24x16xbf16>
    tpu.vector_store %arg5[%c0_11, %c0_12], %27 {strides = array<i32>} : memref<24x16xbf16, #tpu.memory_space<vmem>>, vector<24x16xbf16>,
    return
  }
  func.func @transform_0(%arg0: i32) -> (i32, i32) {
    %c0_i32 = arith.constant 0 : i32
    %c0_i32_0 = arith.constant 0 : i32
    return %arg0, %c0_i32 : i32, i32
  }
  func.func @transform_1(%arg0: i32) -> (i32, i32) {
    %c0_i32 = arith.constant 0 : i32
    %c0_i32_0 = arith.constant 0 : i32
    %c0_i32_1 = arith.constant 0 : i32
    return %c0_i32, %c0_i32_0 : i32, i32
  }
  func.func @transform_2(%arg0: i32) -> (i32, i32) {
    %c0_i32 = arith.constant 0 : i32
    %c0_i32_0 = arith.constant 0 : i32
    %c0_i32_1 = arith.constant 0 : i32
    return %c0_i32, %c0_i32_0 : i32, i32
  }
  func.func @transform_3(%arg0: i32) -> (i32, i32) {
    %c0_i32 = arith.constant 0 : i32
    %c0_i32_0 = arith.constant 0 : i32
    return %arg0, %c0_i32 : i32, i32
  }
  func.func @transform_4(%arg0: i32) -> (i32, i32) {
    %c0_i32 = arith.constant 0 : i32
    %c0_i32_0 = arith.constant 0 : i32
    return %arg0, %c0_i32 : i32, i32
  }
}

module attributes {stable_mosaic.version = 11 : i64} {
  func.func @_chi_attn_kernel(%arg0: i32, %arg1: i32, %arg2: i32, %arg3: memref<1x4x6x16xbf16, #tpu.memory_space<vmem>>, %arg4: memref<1x4x8x16xbf16, #tpu.memory_space<vmem>>, %arg5: memref<1x1x8x16xbf16, #tpu.memory_space<vmem>>, %arg6: memref<1x1x6x16xbf16, #tpu.memory_space<vmem>>, %arg7: memref<2x6x8xbf16, #tpu.memory_space<vmem>>) attributes {dimension_semantics = [#tpu.dimension_semantics<parallel>, #tpu.dimension_semantics<parallel>, #tpu.dimension_semantics<arbitrary>], iteration_bounds = array<i64: 2, 1, 4>, scalar_prefetch = 0 : i64, scratch_operands = 1 : i64, tpu.core_type = #tpu.core_type<tc>, window_params = [{transform_indices = @transform_0, window_bounds = array<i64: 1, 4, 6, 16>}, {transform_indices = @transform_1, window_bounds = array<i64: 1, 4, 8, 16>}, {transform_indices = @transform_2, window_bounds = array<i64: 1, 1, 8, 16>}, {transform_indices = @transform_3, window_bounds = array<i64: 1, 1, 6, 16>}]} {
    %c0_i32 = arith.constant 0 : i32
    %0 = arith.cmpi eq, %arg2, %c0_i32 : i32
    %1 = arith.extui %0 : i1 to i32
    %c0_i32_0 = arith.constant 0 : i32
    %2 = arith.cmpi ne, %1, %c0_i32_0 : i32
    scf.if %2 {
      %c0_14 = arith.constant 0 : index
      %c0_15 = arith.constant 0 : index
      %c0_16 = arith.constant 0 : index
      %c0_17 = arith.constant 0 : index
      %17 = vector.load %arg3[%c0_14, %c0_15, %c0_16, %c0_17] : memref<1x4x6x16xbf16, #tpu.memory_space<vmem>>, vector<1x4x6x16xbf16>
      %18 = arith.extf %17 : vector<1x4x6x16xbf16> to vector<1x4x6x16xf32>
      %cst_18 = arith.constant dense<0.000000e+00> : vector<6x16xf32>
      %19 = vector.multi_reduction <add>, %18, %cst_18 [0, 1] : vector<1x4x6x16xf32> to vector<6x16xf32>
      %cst_19 = arith.constant 4.000000e+00 : f32
      %20 = vector.broadcast %cst_19 : f32 to vector<6x16xf32>
      %21 = arith.divf %19, %20 : vector<6x16xf32>
      %c0_20 = arith.constant 0 : index
      %c0_21 = arith.constant 0 : index
      %c0_22 = arith.constant 0 : index
      %c0_23 = arith.constant 0 : index
      %22 = vector.load %arg4[%c0_20, %c0_21, %c0_22, %c0_23] : memref<1x4x8x16xbf16, #tpu.memory_space<vmem>>, vector<1x4x8x16xbf16>
      %23 = arith.extf %22 : vector<1x4x8x16xbf16> to vector<1x4x8x16xf32>
      %cst_24 = arith.constant dense<0.000000e+00> : vector<8x16xf32>
      %24 = vector.multi_reduction <add>, %23, %cst_24 [0, 1] : vector<1x4x8x16xf32> to vector<8x16xf32>
      %cst_25 = arith.constant 4.000000e+00 : f32
      %25 = vector.broadcast %cst_25 : f32 to vector<8x16xf32>
      %26 = arith.divf %24, %25 : vector<8x16xf32>
      %27 = vector.extract_strided_slice %21 {offsets = [0, 0], sizes = [6, 8], strides = [1, 1]} : vector<6x16xf32> to vector<6x8xf32>
      %cst_26 = arith.constant 0.353553385 : f32
      %28 = vector.broadcast %cst_26 : f32 to vector<6x8xf32>
      %29 = arith.mulf %27, %28 : vector<6x8xf32>
      %30 = arith.truncf %29 : vector<6x8xf32> to vector<6x8xbf16>
      %31 = vector.extract_strided_slice %26 {offsets = [0, 0], sizes = [8, 8], strides = [1, 1]} : vector<8x16xf32> to vector<8x8xf32>
      %32 = arith.truncf %31 : vector<8x8xf32> to vector<8x8xbf16>
      %cst_27 = arith.constant dense<0.000000e+00> : vector<6x8xf32>
      %33 = tpu.matmul %30, %32, %cst_27 {dimension_numbers = #tpu.dot_dimension_numbers<[1], [1], [0], [0], [0, 0, 1, 0], [], []>} : vector<6x8xbf16>, vector<8x8xbf16>, vector<6x8xf32> -> vector<6x8xf32>
      %cst_28 = arith.constant dense<0xFF800000> : vector<6xf32>
      %34 = vector.multi_reduction <maximumf>, %33, %cst_28 [1] : vector<6x8xf32> to vector<6xf32>
      %35 = vector.shape_cast %34 : vector<6xf32> to vector<6x1xf32>
      %36 = vector.broadcast %35 : vector<6x1xf32> to vector<6x8xf32>
      %37 = arith.subf %33, %36 : vector<6x8xf32>
      %38 = math.exp %37 : vector<6x8xf32>
      %cst_29 = arith.constant dense<0.000000e+00> : vector<6xf32>
      %39 = vector.multi_reduction <add>, %38, %cst_29 [1] : vector<6x8xf32> to vector<6xf32>
      %40 = vector.shape_cast %39 : vector<6xf32> to vector<6x1xf32>
      %41 = tpu.reciprocal %40 : vector<6x1xf32> -> vector<6x1xf32>
      %42 = vector.broadcast %41 : vector<6x1xf32> to vector<6x8xf32>
      %43 = arith.mulf %38, %42 : vector<6x8xf32>
      %44 = arith.truncf %43 : vector<6x8xf32> to vector<6x8xbf16>
      %c0_30 = arith.constant 0 : index
      %c0_31 = arith.constant 0 : index
      %c0_32 = arith.constant 0 : index
      %45 = vector.load %arg7[%c0_30, %c0_31, %c0_32] : memref<2x6x8xbf16, #tpu.memory_space<vmem>>, vector<1x6x8xbf16>
      %46 = vector.shape_cast %45 : vector<1x6x8xbf16> to vector<6x8xbf16>
      %47 = vector.shape_cast %44 : vector<6x8xbf16> to vector<1x6x8xbf16>
      tpu.vector_store %arg7[%c0_30, %c0_31, %c0_32], %47 {strides = array<i32>} : memref<2x6x8xbf16, #tpu.memory_space<vmem>>, vector<1x6x8xbf16>,
      %48 = vector.extract_strided_slice %21 {offsets = [0, 8], sizes = [6, 8], strides = [1, 1]} : vector<6x16xf32> to vector<6x8xf32>
      %cst_33 = arith.constant 0.353553385 : f32
      %49 = vector.broadcast %cst_33 : f32 to vector<6x8xf32>
      %50 = arith.mulf %48, %49 : vector<6x8xf32>
      %51 = arith.truncf %50 : vector<6x8xf32> to vector<6x8xbf16>
      %52 = vector.extract_strided_slice %26 {offsets = [0, 8], sizes = [8, 8], strides = [1, 1]} : vector<8x16xf32> to vector<8x8xf32>
      %53 = arith.truncf %52 : vector<8x8xf32> to vector<8x8xbf16>
      %cst_34 = arith.constant dense<0.000000e+00> : vector<6x8xf32>
      %54 = tpu.matmul %51, %53, %cst_34 {dimension_numbers = #tpu.dot_dimension_numbers<[1], [1], [0], [0], [0, 0, 1, 0], [], []>} : vector<6x8xbf16>, vector<8x8xbf16>, vector<6x8xf32> -> vector<6x8xf32>
      %cst_35 = arith.constant dense<0xFF800000> : vector<6xf32>
      %55 = vector.multi_reduction <maximumf>, %54, %cst_35 [1] : vector<6x8xf32> to vector<6xf32>
      %56 = vector.shape_cast %55 : vector<6xf32> to vector<6x1xf32>
      %57 = vector.broadcast %56 : vector<6x1xf32> to vector<6x8xf32>
      %58 = arith.subf %54, %57 : vector<6x8xf32>
      %59 = math.exp %58 : vector<6x8xf32>
      %cst_36 = arith.constant dense<0.000000e+00> : vector<6xf32>
      %60 = vector.multi_reduction <add>, %59, %cst_36 [1] : vector<6x8xf32> to vector<6xf32>
      %61 = vector.shape_cast %60 : vector<6xf32> to vector<6x1xf32>
      %62 = tpu.reciprocal %61 : vector<6x1xf32> -> vector<6x1xf32>
      %63 = vector.broadcast %62 : vector<6x1xf32> to vector<6x8xf32>
      %64 = arith.mulf %59, %63 : vector<6x8xf32>
      %65 = arith.truncf %64 : vector<6x8xf32> to vector<6x8xbf16>
      %c1_37 = arith.constant 1 : index
      %c0_38 = arith.constant 0 : index
      %c0_39 = arith.constant 0 : index
      %66 = vector.load %arg7[%c1_37, %c0_38, %c0_39] : memref<2x6x8xbf16, #tpu.memory_space<vmem>>, vector<1x6x8xbf16>
      %67 = vector.shape_cast %66 : vector<1x6x8xbf16> to vector<6x8xbf16>
      %68 = vector.shape_cast %65 : vector<6x8xbf16> to vector<1x6x8xbf16>
      tpu.vector_store %arg7[%c1_37, %c0_38, %c0_39], %68 {strides = array<i32>} : memref<2x6x8xbf16, #tpu.memory_space<vmem>>, vector<1x6x8xbf16>,
    } else {
    }
    %c0 = arith.constant 0 : index
    %c0_1 = arith.constant 0 : index
    %c0_2 = arith.constant 0 : index
    %c0_3 = arith.constant 0 : index
    %3 = vector.load %arg5[%c0, %c0_1, %c0_2, %c0_3] : memref<1x1x8x16xbf16, #tpu.memory_space<vmem>>, vector<1x1x8x16xbf16>
    %4 = vector.shape_cast %3 : vector<1x1x8x16xbf16> to vector<8x16xbf16>
    %c0_4 = arith.constant 0 : index
    %c0_5 = arith.constant 0 : index
    %c0_6 = arith.constant 0 : index
    %5 = vector.load %arg7[%c0_4, %c0_5, %c0_6] : memref<2x6x8xbf16, #tpu.memory_space<vmem>>, vector<1x6x8xbf16>
    %6 = vector.shape_cast %5 : vector<1x6x8xbf16> to vector<6x8xbf16>
    %7 = vector.extract_strided_slice %4 {offsets = [0, 0], sizes = [8, 8], strides = [1, 1]} : vector<8x16xbf16> to vector<8x8xbf16>
    %cst = arith.constant dense<0.000000e+00> : vector<6x8xf32>
    %8 = tpu.matmul %6, %7, %cst {dimension_numbers = #tpu.dot_dimension_numbers<[1], [0], [0], [1], [0, 0, 1, 1], [], []>} : vector<6x8xbf16>, vector<8x8xbf16>, vector<6x8xf32> -> vector<6x8xf32>
    %c1 = arith.constant 1 : index
    %c0_7 = arith.constant 0 : index
    %c0_8 = arith.constant 0 : index
    %9 = vector.load %arg7[%c1, %c0_7, %c0_8] : memref<2x6x8xbf16, #tpu.memory_space<vmem>>, vector<1x6x8xbf16>
    %10 = vector.shape_cast %9 : vector<1x6x8xbf16> to vector<6x8xbf16>
    %11 = vector.extract_strided_slice %4 {offsets = [0, 8], sizes = [8, 8], strides = [1, 1]} : vector<8x16xbf16> to vector<8x8xbf16>
    %cst_9 = arith.constant dense<0.000000e+00> : vector<6x8xf32>
    %12 = tpu.matmul %10, %11, %cst_9 {dimension_numbers = #tpu.dot_dimension_numbers<[1], [0], [0], [1], [0, 0, 1, 1], [], []>} : vector<6x8xbf16>, vector<8x8xbf16>, vector<6x8xf32> -> vector<6x8xf32>
    %13 = tpu.concatenate %8, %12 in 1 : vector<6x8xf32>, vector<6x8xf32> -> vector<6x16xf32>
    %14 = vector.shape_cast %13 : vector<6x16xf32> to vector<1x1x6x16xf32>
    %15 = arith.truncf %14 : vector<1x1x6x16xf32> to vector<1x1x6x16xbf16>
    %c0_10 = arith.constant 0 : index
    %c0_11 = arith.constant 0 : index
    %c0_12 = arith.constant 0 : index
    %c0_13 = arith.constant 0 : index
    %16 = vector.load %arg6[%c0_10, %c0_11, %c0_12, %c0_13] : memref<1x1x6x16xbf16, #tpu.memory_space<vmem>>, vector<1x1x6x16xbf16>
    tpu.vector_store %arg6[%c0_10, %c0_11, %c0_12, %c0_13], %15 {strides = array<i32>} : memref<1x1x6x16xbf16, #tpu.memory_space<vmem>>, vector<1x1x6x16xbf16>,
    return
  }
  func.func @transform_0(%arg0: i32, %arg1: i32, %arg2: i32) -> (i32, i32, i32, i32) {
    %c0_i32 = arith.constant 0 : i32
    %c0_i32_0 = arith.constant 0 : i32
    %c0_i32_1 = arith.constant 0 : i32
    return %arg0, %c0_i32, %c0_i32_0, %arg1 : i32, i32, i32, i32
  }
  func.func @transform_1(%arg0: i32, %arg1: i32, %arg2: i32) -> (i32, i32, i32, i32) {
    %c0_i32 = arith.constant 0 : i32
    %c0_i32_0 = arith.constant 0 : i32
    %c0_i32_1 = arith.constant 0 : i32
    return %arg0, %c0_i32, %c0_i32_0, %arg1 : i32, i32, i32, i32
  }
  func.func @transform_2(%arg0: i32, %arg1: i32, %arg2: i32) -> (i32, i32, i32, i32) {
    %c0_i32 = arith.constant 0 : i32
    %c0_i32_0 = arith.constant 0 : i32
    return %arg0, %arg2, %c0_i32, %arg1 : i32, i32, i32, i32
  }
  func.func @transform_3(%arg0: i32, %arg1: i32, %arg2: i32) -> (i32, i32, i32, i32) {
    %c0_i32 = arith.constant 0 : i32
    %c0_i32_0 = arith.constant 0 : i32
    return %arg0, %arg2, %c0_i32, %arg1 : i32, i32, i32, i32
  }
}

</mosaic_0001>

<bundles_post_ra>
// kernel: schi_stage_forward.14
= control target key start
LH: loop header
LB: loop body
LE: loop exit
PB: predicated region body
PF: predicated region fallthrough
CT: control target
= control target key end

     0   :  { %s378_s12 = smov 0   ;;  %s401_s0 = inlined_call_operand.vmem [shape: bf16[32,16], index: 0, kind: input, shape index: {}]   ;;  %s402_s1 = inlined_call_operand.vmem [shape: bf16[16,16], index: 1, kind: input, shape index: {}]   ;;  %s403_s2 = inlined_call_operand.vmem [shape: f32[1,16], index: 2, kind: input, shape index: {}]   ;;  %s404_s3 = inlined_call_operand.vmem [shape: bf16[32,16], index: 3, kind: output, shape index: {}]  }
   0x1 LB: > { %s309_s13 = sadd.s32 4294967295, %s354_s12   ;;  %p313_p0 = scmp.ge.s32.totalorder %s354_s12, 1  ;;  %s354_s12 = sphi %s378_s12, %s13_s12  }
   0x2   : > { %p138_p1 = scmp.lt.s32.totalorder %s354_s12, 3 }
   0x4   : > { %p139_p2 = pnand %p313_p0, %p138_p1 }
   0x5   : > { %v346_v0 = vld [vmem:[%s402_s1] sm:$0xff] (!%p139_p2)   ;;  %v356_v1 = vmov (!%p139_p2), 0.0   ;;  %s314_s16 = sshll.u32 (!%p139_p2), %s309_s13, 1  ;;  %vm357_vm0 = vmmov (!%p139_p2), 0   ;;  %vm197_vm1 = vcmask (!%p139_p2), 130048   ;;  %vm250_vm2 = vcmask (!%p139_p2), 125952  }
   0x6   : > { %142 = sbr.rel (%p139_p2) target bundleno = 236 (0xec), region = 32  ;;  %330 = vmatprep.subr.bf16.mxu0 (!%p139_p2), %v356_v1  ;;  %332 = vmatprep.mubr.msk.bf16.mxu0 (!%p139_p2), %vm357_vm0, %v356_v1  ;;  %p163_p3 = scmp.lt.s32.totalorder (!%p139_p2), %s314_s16, 3  ;;  %v318_v3 = vld [vmem:[%s403_s2] ss:$0 sm:$0xff] (!%p139_p2) }
   0x7   : > { %331 = vmatpush3.bf16.msra.mxu0 (!%p139_p2), %v346_v0 }
   0xd   : > { %s406_s16 = smov (!%p163_p3, %s314_s16), 3 }
   0xe   : > { %s315_s17 = sshll.u32 %s406_s16, 2 }
   0xf   : > { %s166_s20 = scalar_lea.vmem %s401_s0, %s315_s17  ;;  %s172_s25 = scalar_lea.vmem %s404_s3, %s315_s17 }
  0x10   : > { %v347_v2 = vld [vmem:[%s166_s20] sm:$0xff]  }
  0x11   : > { %333 = vmatmul.mubr.msk.bf16.vlgmr.msra.gmra.mrb[0].mxu0 %vm197_vm1, %v347_v2 }
  0xe4   : > { %v235_v4 = vpop.f32.mrb[0].mxu0 }
  0xe5   : > { %v236_v5 = vadd.f32 %v318_v3, %v235_v4  ;;  %v334_v6 = vpop.f32.mrb[1].mxu0 }
  0xe6   : > { %v238_v7 = vpop.f32.mrb[2].mxu0 }
  0xe7   : > { %v326_v8 = vpack.c.bf16 %v236_v5, %v236_v5  ;;  %v239_v9 = vadd.f32 %v318_v3, %v238_v7  ;;  %v335_v10 = vpop.f32.mrb[3].mxu0 }
  0xe9   : > { %251 = vst.msk [vmem:[%s172_s25] sm:$0xf] %vm250_vm2, %v326_v8  ;;  %v327_v11 = vpack.c.bf16 %v239_v9, %v239_v9 }
  0xeb   : > { %252 = vst.msk [vmem:[%s172_s25 + $0x4] sm:$0xf] %vm250_vm2, %v327_v11 }
  0xec PF: > { %s13_s12 = sadd.s32 1, %s354_s12  }
  0xed   : > { %p10_p4 = scmp.ge.s32.totalorder %s13_s12, 4  }
  0xef   :  { %12 = sbr.rel (!%p10_p4) target bundleno = 1 (0x1), region = 62 }

// kernel: schi_stage_forward.15
= control target key start
LH: loop header
LB: loop body
LE: loop exit
PB: predicated region body
PF: predicated region fallthrough
CT: control target
= control target key end

     0   :  { %s783_s18 = smov 0   ;;  %s909_s0 = inlined_call_operand.vmem [shape: bf16[160,16], index: 0, kind: input, shape index: {}]   ;;  %s910_s1 = inlined_call_operand.vmem [shape: bf16[16,48], index: 1, kind: input, shape index: {}]   ;;  %s911_s2 = inlined_call_operand.vmem [shape: f32[1,48], index: 2, kind: input, shape index: {}]   ;;  %s912_s3 = inlined_call_operand.vmem [shape: bf16[160,16], index: 3, kind: output, shape index: {0}]   ;;  %s913_s4 = inlined_call_operand.vmem [shape: bf16[160,16], index: 4, kind: output, shape index: {1}]   ;;  %s914_s5 = inlined_call_operand.vmem [shape: bf16[160,16], index: 5, kind: output, shape index: {2}]  }
   0x1 LB: > { %s650_s19 = sadd.s32 4294967295, %s747_s18   ;;  %p654_p0 = scmp.ge.s32.totalorder %s747_s18, 1  ;;  %s747_s18 = sphi %s783_s18, %s16_s18  }
   0x2   : > { %p193_p1 = scmp.lt.s32.totalorder %s747_s18, 3 }
   0x4   : > { %p194_p2 = pnand %p654_p0, %p193_p1 }
   0x5   : > { %v735_v0 = vld [vmem:[%s910_s1] sm:$0xff] (!%p194_p2)   ;;  %v749_v1 = vmov (!%p194_p2), 0.0   ;;  %s231_s22 = smul.u32 (!%p194_p2), 10, %s650_s19  ;;  %vm750_vm0 = vmmov (!%p194_p2), 0   ;;  %vm306_vm1 = vcmask (!%p194_p2), 130048   ;;  %vm435_vm2 = vcmask (!%p194_p2), 125952  }
   0x6   : > { %197 = sbr.rel (%p194_p2) target bundleno = 387 (0x183), region = 32  ;;  %699 = vmatprep.subr.bf16.mxu0 (!%p194_p2), %v749_v1  ;;  %721 = vmatprep.subr.bf16.mxu1 (!%p194_p2), %v749_v1  ;;  %v659_v7 = vld [vmem:[%s911_s2] ss:$0 sm:$0xff] (!%p194_p2)  ;;  %s751_s7 = smov (!%p194_p2), 112  }
   0x7   : > { %700 = vmatpush3.bf16.msra.mxu0 (!%p194_p2), %v735_v0  ;;  %722 = vmatpush3.bf16.msra.mxu1 (!%p194_p2), %v735_v0  ;;  %p232_p3 = scmp.lt.s32.totalorder (!%p194_p2), %s231_s22, 19  ;;  %s752_s8 = smov (!%p194_p2), 96  }
   0x8   : > { %701 = vmatprep.mubr.msk.bf16.mxu0 (!%p194_p2), %vm750_vm0, %v749_v1  ;;  %713 = vmatprep.mubr.msk.bf16.mxu1 (!%p194_p2), %vm750_vm0, %v749_v1 }
   0xd   : > { %s916_s22 = smov (!%p232_p3, %s231_s22), 19 }
   0xe   : > { %s796_s23 = sshll.u32 %s916_s22, 2 }
   0xf   : > { %s235_s26 = scalar_lea.vmem %s909_s0, %s796_s23  ;;  %s812_s6 = scalar_lea.vmem %s912_s3, %s796_s23 }
  0x10   : > { %v736_v2 = vld [vmem:[%s235_s26] sm:$0xff]   ;;  %v737_v3 = vld [vmem:[%s235_s26 + $0x18] sm:$0xff]   ;;  %v738_v4 = vld [vmem:[%s235_s26 + $0x8] sm:$0xff]   ;;  %s858_s11 = scalar_lea.vmem %s913_s4, %s796_s23  ;;  %s870_s14 = scalar_lea.vmem %s914_s5, %s796_s23 }
  0x11   : > { %702 = vmatmul.mubr.msk.bf16.vlgmr.msra.gmra.mrb[0].mxu0 %vm306_vm1, %v736_v2  ;;  %714 = vmatmul.mubr.msk.bf16.vlgmr.msra.gmra.mrb[0].mxu1 %vm306_vm1, %v737_v3  ;;  %v739_v5 = vld [vmem:[%s235_s26 + $0x20] sm:$0xff]   ;;  %v740_v6 = vld [vmem:[%s235_s26 + $0x10] sm:$0xff]  }
  0x12   : > { %705 = vmatprep.mubr.msk.bf16.mxu0 %vm750_vm0, %v749_v1  ;;  %717 = vmatprep.mubr.msk.bf16.mxu1 %vm750_vm0, %v749_v1 }
  0x19   : > { %706 = vmatmul.mubr.msk.bf16.gmra.mrb[4].mxu0 %vm306_vm1, %v738_v4  ;;  %718 = vmatmul.mubr.msk.bf16.gmra.mrb[4].mxu1 %vm306_vm1, %v739_v5 }
  0x1a   : > { %709 = vmatprep.mubr.msk.bf16.mxu0 %vm750_vm0, %v749_v1 }
  0x21   : > { %710 = vmatmul.mubr.msk.bf16.gmra.mrb[8].mxu0 %vm306_vm1, %v740_v6 }
  0xe4   : > { %v356_v8 = vpop.f32.mrb[0].mxu0  ;;  %v380_v10 = vpop.f32.mrb[0].mxu1 }
  0xe5   : > { %v357_v9 = vadd.f32 %v659_v7, %v356_v8  ;;  %v703_v11 = vpop.f32.mrb[1].mxu0  ;;  %v381_v12 = vadd.f32 %v659_v7, %v380_v10  ;;  %v715_v13 = vpop.f32.mrb[1].mxu1 }
  0xe6   : > { %v359_v14 = vpop.f32.mrb[2].mxu0  ;;  %v383_v17 = vpop.f32.mrb[2].mxu1 }
  0xe7   : > { %v683_v15 = vpack.c.bf16 %v357_v9, %v357_v9  ;;  %v360_v16 = vadd.f32 %v659_v7, %v359_v14  ;;  %v704_v18 = vpop.f32.mrb[3].mxu0  ;;  %v689_v19 = vpack.c.bf16 %v381_v12, %v381_v12  ;;  %v384_v20 = vadd.f32 %v659_v7, %v383_v17  ;;  %v716_v21 = vpop.f32.mrb[3].mxu1 }
  0xe9   : > { %436 = vst.msk [vmem:[%s812_s6] sm:$0xf] %vm435_vm2, %v683_v15  ;;  %v684_v22 = vpack.c.bf16 %v360_v16, %v360_v16  ;;  %446 = vrot.lane.b32.xlu0 %v683_v15, %s751_s7  ;;  %442 = vst.msk [vmem:[%s812_s6 + $0x18] sm:$0xf] %vm435_vm2, %v689_v19  ;;  %v690_v23 = vpack.c.bf16 %v384_v20, %v384_v20 }
  0xeb   : > { %437 = vst.msk [vmem:[%s812_s6 + $0x4] sm:$0xf] %vm435_vm2, %v684_v22  ;;  %443 = vst.msk [vmem:[%s812_s6 + $0x1c] sm:$0xf] %vm435_vm2, %v690_v23  ;;  %460 = vrot.lane.b32.xlu1 %v690_v23, %s751_s7 }
  0xec   : > { %v364_v24 = vpop.f32.mrb[4].mxu0  ;;  %v388_v27 = vpop.f32.mrb[4].mxu1 }
  0xed   : > { %458 = vrot.lane.b32.xlu0 %v689_v19, %s751_s7  ;;  %v365_v25 = vadd.f32 %v659_v7, %v364_v24  ;;  %v707_v26 = vpop.f32.mrb[5].mxu0  ;;  %v389_v29 = vadd.f32 %v659_v7, %v388_v27  ;;  %v719_v30 = vpop.f32.mrb[5].mxu1 }
  0xee   : > { %v367_v28 = vpop.f32.mrb[6].mxu0  ;;  %v391_v34 = vpop.f32.mrb[6].mxu1 }
  0xef   : > { %v685_v31 = vpack.c.bf16 %v365_v25, %v365_v25  ;;  %v368_v32 = vadd.f32 %v659_v7, %v367_v28  ;;  %v708_v33 = vpop.f32.mrb[7].mxu0  ;;  %488 = vrot.lane.b32.xlu1 %v684_v22, %s752_s8  ;;  %v691_v35 = vpack.c.bf16 %v389_v29, %v389_v29  ;;  %v392_v36 = vadd.f32 %v659_v7, %v391_v34  ;;  %v720_v37 = vpop.f32.mrb[7].mxu1 }
  0xf1   : > { %438 = vst.msk [vmem:[%s812_s6 + $0x8] sm:$0xf] %vm435_vm2, %v685_v31  ;;  %486 = vrot.lane.b32.xlu0 %v683_v15, %s752_s8  ;;  %v686_v38 = vpack.c.bf16 %v368_v32, %v368_v32  ;;  %444 = vst.msk [vmem:[%s812_s6 + $0x20] sm:$0xf] %vm435_vm2, %v691_v35  ;;  %v692_v39 = vpack.c.bf16 %v392_v36, %v392_v36 }
  0xf3   : > { %439 = vst.msk [vmem:[%s812_s6 + $0xc] sm:$0xf] %vm435_vm2, %v686_v38  ;;  %500 = vrot.lane.b32.xlu1 %v690_v23, %s752_s8  ;;  %445 = vst.msk [vmem:[%s812_s6 + $0x24] sm:$0xf] %vm435_vm2, %v692_v39 }
  0xf4   : > { %v372_v40 = vpop.f32.mrb[8].mxu0 }
  0xf5   : > { %498 = vrot.lane.b32.xlu0 %v689_v19, %s752_s8  ;;  %v373_v41 = vadd.f32 %v659_v7, %v372_v40  ;;  %v711_v42 = vpop.f32.mrb[9].mxu0 }
  0xf6   : > { %v375_v43 = vpop.f32.mrb[10].mxu0 }
  0xf7   : > { %v687_v44 = vpack.c.bf16 %v373_v41, %v373_v41  ;;  %v376_v45 = vadd.f32 %v659_v7, %v375_v43  ;;  %v712_v46 = vpop.f32.mrb[11].mxu0  ;;  %450 = vrot.lane.b32.xlu1 %v685_v31, %s751_s7 }
  0xf9   : > { %448 = vrot.lane.b32.xlu0 %v684_v22, %s751_s7  ;;  %440 = vst.msk [vmem:[%s812_s6 + $0x10] sm:$0xf] %vm435_vm2, %v687_v44  ;;  %v688_v47 = vpack.c.bf16 %v376_v45, %v376_v45 }
  0xfb   : > { %441 = vst.msk [vmem:[%s812_s6 + $0x14] sm:$0xf] %vm435_vm2, %v688_v47  ;;  %452 = vrot.lane.b32.xlu1 %v686_v38, %s751_s7 }
  0xfd   : > { %462 = vrot.lane.b32.xlu0 %v691_v35, %s751_s7 }
  0xff   : > { %464 = vrot.lane.b32.xlu1 %v692_v39, %s751_s7 }
 0x101   : > { %490 = vrot.lane.b32.xlu0 %v685_v31, %s752_s8 }
 0x103   : > { %492 = vrot.lane.b32.xlu1 %v686_v38, %s752_s8 }
 0x105   : > { %454 = vrot.lane.b32.xlu0 %v687_v44, %s751_s7 }
 0x107   : > { %456 = vrot.lane.b32.xlu1 %v688_v47, %s751_s7 }
 0x109   : > { %494 = vrot.lane.b32.xlu0 %v687_v44, %s752_s8 }
 0x10b   : > { %496 = vrot.lane.b32.xlu1 %v688_v47, %s752_s8 }
 0x10d   : > { %502 = vrot.lane.b32.xlu0 %v691_v35, %s752_s8 }
 0x10f   : > { %504 = vrot.lane.b32.xlu1 %v692_v39, %s752_s8 }
 0x15b   : > { %v447_v48 = vpop.permute.xlu0 %446 }
 0x15c   : > { %476 = vst.msk [vmem:[%s858_s11] sm:$0xf] %vm435_vm2, %v447_v48 }
 0x15d   : > { %v461_v49 = vpop.permute.xlu1 %460 }
 0x15e   : > { %483 = vst.msk [vmem:[%s858_s11 + $0x1c] sm:$0xf] %vm435_vm2, %v461_v49 }
 0x15f   : > { %v459_v50 = vpop.permute.xlu0 %458 }
 0x160   : > { %482 = vst.msk [vmem:[%s858_s11 + $0x18] sm:$0xf] %vm435_vm2, %v459_v50 }
 0x161   : > { %v489_v51 = vpop.permute.xlu1 %488 }
 0x162   : > { %517 = vst.msk [vmem:[%s870_s14 + $0x4] sm:$0xf] %vm435_vm2, %v489_v51 }
 0x163   : > { %v487_v52 = vpop.permute.xlu0 %486 }
 0x164   : > { %516 = vst.msk [vmem:[%s870_s14] sm:$0xf] %vm435_vm2, %v487_v52 }
 0x165   : > { %v501_v53 = vpop.permute.xlu1 %500 }
 0x166   : > { %523 = vst.msk [vmem:[%s870_s14 + $0x1c] sm:$0xf] %vm435_vm2, %v501_v53 }
 0x167   : > { %v499_v54 = vpop.permute.xlu0 %498 }
 0x168   : > { %522 = vst.msk [vmem:[%s870_s14 + $0x18] sm:$0xf] %vm435_vm2, %v499_v54 }
 0x169   : > { %v451_v55 = vpop.permute.xlu1 %450 }
 0x16a   : > { %478 = vst.msk [vmem:[%s858_s11 + $0x8] sm:$0xf] %vm435_vm2, %v451_v55 }
 0x16b   : > { %v449_v56 = vpop.permute.xlu0 %448 }
 0x16c   : > { %477 = vst.msk [vmem:[%s858_s11 + $0x4] sm:$0xf] %vm435_vm2, %v449_v56 }
 0x16d   : > { %v453_v57 = vpop.permute.xlu1 %452 }
 0x16e   : > { %479 = vst.msk [vmem:[%s858_s11 + $0xc] sm:$0xf] %vm435_vm2, %v453_v57 }
 0x16f   : > { %v463_v58 = vpop.permute.xlu0 %462 }
 0x170   : > { %484 = vst.msk [vmem:[%s858_s11 + $0x20] sm:$0xf] %vm435_vm2, %v463_v58 }
 0x171   : > { %v465_v59 = vpop.permute.xlu1 %464 }
 0x172   : > { %485 = vst.msk [vmem:[%s858_s11 + $0x24] sm:$0xf] %vm435_vm2, %v465_v59 }
 0x173   : > { %v491_v60 = vpop.permute.xlu0 %490 }
 0x174   : > { %518 = vst.msk [vmem:[%s870_s14 + $0x8] sm:$0xf] %vm435_vm2, %v491_v60 }
 0x175   : > { %v493_v61 = vpop.permute.xlu1 %492 }
 0x176   : > { %519 = vst.msk [vmem:[%s870_s14 + $0xc] sm:$0xf] %vm435_vm2, %v493_v61 }
 0x177   : > { %v455_v62 = vpop.permute.xlu0 %454 }
 0x178   : > { %480 = vst.msk [vmem:[%s858_s11 + $0x10] sm:$0xf] %vm435_vm2, %v455_v62 }
 0x179   : > { %v457_v63 = vpop.permute.xlu1 %456 }
 0x17a   : > { %481 = vst.msk [vmem:[%s858_s11 + $0x14] sm:$0xf] %vm435_vm2, %v457_v63 }
 0x17b   : > { %v495_v0 = vpop.permute.xlu0 %494 }
 0x17c   : > { %520 = vst.msk [vmem:[%s870_s14 + $0x10] sm:$0xf] %vm435_vm2, %v495_v0 }
 0x17d   : > { %v497_v1 = vpop.permute.xlu1 %496 }
 0x17e   : > { %521 = vst.msk [vmem:[%s870_s14 + $0x14] sm:$0xf] %vm435_vm2, %v497_v1 }
 0x17f   : > { %v503_v2 = vpop.permute.xlu0 %502 }
 0x180   : > { %524 = vst.msk [vmem:[%s870_s14 + $0x20] sm:$0xf] %vm435_vm2, %v503_v2 }
 0x181   : > { %v505_v3 = vpop.permute.xlu1 %504 }
 0x182   : > { %525 = vst.msk [vmem:[%s870_s14 + $0x24] sm:$0xf] %vm435_vm2, %v505_v3 }
 0x183 PF: > { %s16_s18 = sadd.s32 1, %s747_s18  }
 0x184   : > { %p13_p4 = scmp.ge.s32.totalorder %s16_s18, 4  }
 0x186   :  { %15 = sbr.rel (!%p13_p4) target bundleno = 1 (0x1), region = 86 }

// kernel: schi_stage_forward.17
= control target key start
LH: loop header
LB: loop body
LE: loop exit
PB: predicated region body
PF: predicated region fallthrough
CT: control target
= control target key end

     0   :  { %s352_s12 = smov 0   ;;  %s386_s0 = inlined_call_operand.vmem [shape: bf16[32,16], index: 0, kind: input, shape index: {}]   ;;  %s387_s1 = inlined_call_operand.vmem [shape: f32[1,16], index: 1, kind: input, shape index: {}]   ;;  %s388_s2 = inlined_call_operand.vmem [shape: f32[1,16], index: 2, kind: input, shape index: {}]   ;;  %s389_s3 = inlined_call_operand.vmem [shape: bf16[32,16], index: 3, kind: output, shape index: {}]  }
   0x1 LB: > { %s291_s13 = sadd.s32 4294967295, %s330_s12   ;;  %p295_p0 = scmp.ge.s32.totalorder %s330_s12, 1  ;;  %s330_s12 = sphi %s352_s12, %s13_s12  }
   0x2   : > { %p138_p1 = scmp.lt.s32.totalorder %s330_s12, 3 }
   0x4   : > { %p139_p2 = pnand %p295_p0, %p138_p1 }
   0x5   : > { %s296_s14 = sshll.u32 (!%p139_p2), %s291_s13, 1  ;;  %vm178_vm0 = vcmask (!%p139_p2), 130048   ;;  %v300_v22 = vld [vmem:[%s387_s1] ss:$0 sm:$0xff] (!%p139_p2)  ;;  %vm232_vm1 = vcmask (!%p139_p2), 125952  }
   0x6   : > { %142 = sbr.rel (%p139_p2) target bundleno = 339 (0x153), region = 32  ;;  %p163_p3 = scmp.lt.s32.totalorder (!%p139_p2), %s296_s14, 3  ;;  %v301_v24 = vld [vmem:[%s388_s2] ss:$0 sm:$0xff] (!%p139_p2) }
   0xd   : > { %s391_s14 = smov (!%p163_p3, %s296_s14), 3 }
   0xe   : > { %s297_s15 = sshll.u32 %s391_s14, 2 }
   0xf   : > { %s166_s18 = scalar_lea.vmem %s386_s0, %s297_s15  ;;  %s172_s25 = scalar_lea.vmem %s389_s3, %s297_s15 }
  0x10   : > { %v309_v0 = vld [vmem:[%s166_s18] sm:$0xff]  }
  0x11   : > { %v310_v1 = vunpack.c.l.bf16 %v309_v0  ;;  %v311_v2 = vunpack.c.h.bf16 %v309_v0 }
  0x13   : > { %v179_v3 = vsel %vm178_vm0, %v310_v1, 0.0  ;;  %v182_v4 = vsel %vm178_vm0, %v311_v2, 0.0 }
  0x14   : > { %180 = vadd.xlane.f32.xlu0 %v179_v3 }
  0x18   : > { %183 = vadd.xlane.f32.xlu0 %v182_v4 }
  0xa1   : > { %v181_v5 = vpop.xlane.xlu0 %180 }
  0xa2   : > { %v186_v6 = vmul.f32 0.0625, %v181_v5 }
  0xa4   : > { %v188_v7 = vsub.f32 %v310_v1, %v186_v6 }
  0xa5   : > { %v184_v8 = vpop.xlane.xlu0 %183 }
  0xa6   : > { %v187_v9 = vmul.f32 0.0625, %v184_v8  ;;  %v190_v10 = vmul.f32 %v188_v7, %v188_v7 }
  0xa8   : > { %v189_v11 = vsub.f32 %v311_v2, %v187_v9  ;;  %v192_v12 = vsel %vm178_vm0, %v190_v10, 0.0 }
  0xa9   : > { %193 = vadd.xlane.f32.xlu1 %v192_v12 }
  0xaa   : > { %v191_v13 = vmul.f32 %v189_v11, %v189_v11 }
  0xac   : > { %v195_v14 = vsel %vm178_vm0, %v191_v13, 0.0 }
  0xad   : > { %196 = vadd.xlane.f32.xlu1 %v195_v14 }
 0x136   : > { %v194_v15 = vpop.xlane.xlu1 %193 }
 0x137   : > { %v198_v16 = vmul.f32 0.0625, %v194_v15 }
 0x139   : > { %v200_v17 = vadd.f32 1e-05, %v198_v16 }
 0x13a   : > { %v197_v18 = vpop.xlane.xlu1 %196 }
 0x13b   : > { %320 = vrsqrt.f32 %v200_v17  ;;  %v199_v19 = vmul.f32 0.0625, %v197_v18 }
 0x13d   : > { %v201_v20 = vadd.f32 1e-05, %v199_v19 }
 0x13f   : > { %322 = vrsqrt.f32 %v201_v20 }
 0x145   : > { %v321_v21 = vpop.eup %320 }
 0x146   : > { %v204_v23 = vmul.f32 %v321_v21, %v188_v7 }
 0x148   : > { %v213_v25 = vmul.f32 %v300_v22, %v204_v23 }
 0x149   : > { %v323_v26 = vpop.eup %322 }
 0x14a   : > { %v222_v27 = vadd.f32 %v301_v24, %v213_v25  ;;  %v205_v28 = vmul.f32 %v323_v26, %v189_v11 }
 0x14c   : > { %v306_v29 = vpack.c.bf16 %v222_v27, %v222_v27  ;;  %v214_v30 = vmul.f32 %v300_v22, %v205_v28 }
 0x14e   : > { %233 = vst.msk [vmem:[%s172_s25] sm:$0xf] %vm232_vm1, %v306_v29  ;;  %v223_v31 = vadd.f32 %v301_v24, %v214_v30 }
 0x150   : > { %v307_v32 = vpack.c.bf16 %v223_v31, %v223_v31 }
 0x152   : > { %234 = vst.msk [vmem:[%s172_s25 + $0x4] sm:$0xf] %vm232_vm1, %v307_v32 }
 0x153 PF: > { %s13_s12 = sadd.s32 1, %s330_s12  }
 0x154   : > { %p10_p4 = scmp.ge.s32.totalorder %s13_s12, 4  }
 0x156   :  { %12 = sbr.rel (!%p10_p4) target bundleno = 1 (0x1), region = 62 }

// kernel: schi_stage_forward.16
= control target key start
LH: loop header
LB: loop body
LE: loop exit
PB: predicated region body
PF: predicated region fallthrough
CT: control target
= control target key end

     0   :  { %s971_s12 = smov 0   ;;  %s973_s13 = smov 0   ;;  %s1088_s0 = inlined_call_operand.vmem [shape: bf16[2,4,4,16], index: 0, kind: input, shape index: {}]   ;;  %s1089_s1 = inlined_call_operand.vmem [shape: bf16[2,4,20,16], index: 1, kind: input, shape index: {}]   ;;  %s1090_s2 = inlined_call_operand.vmem [shape: bf16[2,4,20,16], index: 2, kind: input, shape index: {}]   ;;  %s1091_s3 = inlined_call_operand.vmem [shape: bf16[2,4,4,16], index: 3, kind: output, shape index: {}]  }
   0x1   :  { %s975_s14 = smov 0   ;;  %s977_s15 = smov 0  }
   0x2   :  { %s979_s16 = smov 0  }
   0x3 LB: > { %s25_s17 = sadd.s32 1, %s934_s14  ;;  %s32_s18 = sadd.s32 1, %s938_s15  ;;  %s942_s16 = sphi %s979_s16, %s13_s16   ;;  %s938_s15 = sphi %s977_s15, %s1095_s15   ;;  %s934_s14 = sphi %s975_s14, %s1094_s14   ;;  %s930_s13 = sphi %s973_s13, %s1093_s13   ;;  %s926_s12 = sphi %s971_s12, %s1092_s12  }
   0x4   : > { %p26_p0 = scmp.ge.s32.totalorder %s25_s17, 4  ;;  %p774_p1 = scmp.ge.s32.totalorder %s942_s16, 1 }
   0x5   : > { %p201_p2 = scmp.lt.s32.totalorder %s942_s16, 9 }
   0x6   : > { %s1097_s17 = smov (%p26_p0, %s25_s17), 0  ;;  %s1099_s18 = smov (!%p26_p0, %s32_s18), %s938_s15 }
   0x7   : > { %p202_p3 = pnand %p774_p1, %p201_p2  ;;  %p34_p4 = scmp.ge.s32.totalorder %s1099_s18, 2 }
   0x8   : > { %p254_p5 = scmp.lt.s32.totalorder (!%p202_p3), %s930_s13, 1  ;;  %p272_p6 = scmp.lt.s32.totalorder (!%p202_p3), %s926_s12, 3 }
   0x9   : > { %s1101_s18 = smov (%p34_p4, %s1099_s18), 0  ;;  %205 = sbr.rel (%p202_p3) target bundleno = 1151 (0x47f), region = 32 }
   0xa   : > { %p781_p7 = scmp.ne.s32.totalorder (!%p202_p3), %s926_s12, 0 }
  0x10   : > { %s1103_s13 = smov (!%p254_p5, %s930_s13), 1  ;;  %vm340_vm0 = vcmask (!%p781_p7), 130048   ;;  %v944_v3 = vmov (!%p781_p7), 0.0   ;;  %vm306_vm1 = vcmask (!%p781_p7), 125952   ;;  %vm945_vm2 = vmmov (!%p781_p7), 0  }
  0x11   : > { %s273_s19 = scalar_select %p272_p6, %s926_s12, 3 }
  0x12   : > { %s790_s20 = sshll.u32 %s1103_s13, 3  ;;  %s844_s21 = smul.u32 48, %s1103_s13  ;;  %812 = vmatprep.subr.bf16.mxu0 (!%p781_p7), %v944_v3  ;;  %820 = vmatprep.subr.bf16.mxu1 (!%p781_p7), %v944_v3  ;;  %vm369_vm3 = vcmask (!%p781_p7), 64512   ;;  %vm419_vm4 = vcmask (!%p781_p7), 158720   ;;  %vm432_vm5 = vcmask (!%p781_p7), 156672  }
  0x13   : > { %s1008_s24 = scalar_lea.vmem %s1088_s0, %s790_s20  ;;  %s845_s25 = smul.u32 3, %s273_s19  ;;  %816 = vmatprep.mubr.msk.bf16.mxu0 (!%p781_p7), %vm945_vm2, %v944_v3  ;;  %824 = vmatprep.mubr.msk.bf16.mxu1 (!%p781_p7), %vm945_vm2, %v944_v3 }
  0x14   : > { %s1013_s28 = scalar_lea.vmem %s1089_s1, %s844_s21  ;;  %s846_s29 = smul.u32 12, %s1103_s13  ;;  %v298_v24 = vld [vmem:[%s1008_s24] sm:$0x3] (!%p781_p7)  ;;  %v299_v32 = vld [vmem:[%s1008_s24 + $0x2] sm:$0x3] (!%p781_p7) }
  0x15   : > { %s779_s30 = sshll.u32 %s1103_s13, 2  ;;  %297 = sbr.rel (%p781_p7) target bundleno = 696 (0x2b8), region = 36  ;;  %v792_v0 = vld [vmem:[%s1013_s28] sm:$0xff] (!%p781_p7)   ;;  %v319_v1 = vld [vmem:[%s1013_s28 + $0xc] sm:$0xff] (!%p781_p7)   ;;  %v799_v2 = vld [vmem:[%s1013_s28 + $0x18] sm:$0xff] (!%p781_p7)   ;;  %v302_v37 = vunpack.c.l.bf16 (!%p781_p7), %v298_v24  ;;  %v303_v44 = vunpack.c.l.bf16 (!%p781_p7), %v299_v32 }
  0x16   : > { %s279_s4 = sadd.s32 %s846_s29, %s845_s25  ;;  %s290_s5 = sadd.s32 %s779_s30, %s273_s19  ;;  %v793_v4 = vunpack.c.l.bf16 (!%p781_p7), %v792_v0  ;;  %v794_v5 = vunpack.c.h.bf16 (!%p781_p7), %v792_v0  ;;  %v797_v6 = vunpack.c.l.bf16 (!%p781_p7), %v799_v2  ;;  %v798_v7 = vunpack.c.h.bf16 (!%p781_p7), %v799_v2  ;;  %v325_v8 = vld [vmem:[%s1013_s28 + $0x24] sm:$0xff] (!%p781_p7)   ;;  %v321_v14 = vld [vmem:[%s1013_s28 + $0x14] sm:$0x3] (!%p781_p7)  ;;  %v324_v15 = vld [vmem:[%s1013_s28 + $0x20] sm:$0x3] (!%p781_p7) }
  0x17   : > { %s778_s6 = sshll.u32 %s279_s4, 2  ;;  %s780_s7 = sshll.u32 %s290_s5, 1  ;;  %v331_v9 = vunpack.c.l.bf16 (!%p781_p7), %v319_v1  ;;  %v332_v10 = vunpack.c.h.bf16 (!%p781_p7), %v319_v1  ;;  %v337_v11 = vunpack.c.l.bf16 (!%p781_p7), %v325_v8  ;;  %v338_v12 = vunpack.c.h.bf16 (!%p781_p7), %v325_v8  ;;  %v318_v13 = vld [vmem:[%s1013_s28 + $0x8] sm:$0x3] (!%p781_p7)  ;;  %v327_v19 = vld [vmem:[%s1013_s28 + $0x2c] sm:$0x3] (!%p781_p7) }
  0x18   : > { %s1018_s10 = scalar_lea.vmem %s1090_s2, %s778_s6  ;;  %s1023_s22 = scalar_lea.vmem %s1091_s3, %s780_s7  ;;  %v341_v16 = vsel (!%p781_p7), %vm340_vm0, %v793_v4, 0.0  ;;  %v344_v17 = vsel (!%p781_p7), %vm340_vm0, %v797_v6, 0.0  ;;  %v348_v18 = vsel (!%p781_p7), %vm340_vm0, %v794_v5, 0.0  ;;  %v351_v23 = vsel (!%p781_p7), %vm340_vm0, %v798_v7, 0.0  ;;  %v300_v35 = vld [vmem:[%s1008_s24 + $0x4] sm:$0x3] (!%p781_p7) }
  0x19   : > { %v342_v20 = vsel (!%p781_p7), %vm340_vm0, %v331_v9, 0.0  ;;  %v346_v21 = vsel (!%p781_p7), %vm340_vm0, %v337_v11, 0.0  ;;  %v349_v22 = vsel (!%p781_p7), %vm340_vm0, %v332_v10, 0.0  ;;  %v353_v27 = vsel (!%p781_p7), %vm340_vm0, %v338_v12, 0.0  ;;  %v301_v36 = vld [vmem:[%s1008_s24 + $0x6] sm:$0x3] (!%p781_p7) }
  0x1a   : > { %v343_v25 = vadd.f32 (!%p781_p7), %v342_v20, %v341_v16  ;;  %v350_v26 = vadd.f32 (!%p781_p7), %v349_v22, %v348_v18  ;;  %v330_v28 = vunpack.c.l.bf16 (!%p781_p7), %v318_v13  ;;  %v333_v29 = vunpack.c.l.bf16 (!%p781_p7), %v321_v14  ;;  %s946_s12 = smov (!%p781_p7), 120  }
  0x1b   : > { %v336_v30 = vunpack.c.l.bf16 (!%p781_p7), %v324_v15  ;;  %v339_v31 = vunpack.c.l.bf16 (!%p781_p7), %v327_v19  ;;  %v304_v46 = vunpack.c.l.bf16 (!%p781_p7), %v300_v35  ;;  %v305_v47 = vunpack.c.l.bf16 (!%p781_p7), %v301_v36 }
  0x1c   : > { %v345_v33 = vadd.f32 %v344_v17, %v343_v25  ;;  %v352_v34 = vadd.f32 %v351_v23, %v350_v26  ;;  %v355_v38 = vsel %vm306_vm1, %v330_v28, 0.0  ;;  %v356_v39 = vsel %vm306_vm1, %v333_v29, 0.0 }
  0x1d   : > { %v358_v40 = vsel %vm306_vm1, %v336_v30, 0.0  ;;  %v357_v43 = vadd.f32 %v356_v39, %v355_v38  ;;  %v360_v45 = vsel %vm306_vm1, %v339_v31, 0.0  ;;  %v307_v48 = vsel %vm306_vm1, %v302_v37, 0.0 }
  0x1e   : > { %v347_v41 = vadd.f32 %v346_v21, %v345_v33  ;;  %v354_v42 = vadd.f32 %v353_v27, %v352_v34  ;;  %v308_v52 = vsel %vm306_vm1, %v303_v44, 0.0  ;;  %v310_v54 = vsel %vm306_vm1, %v304_v46, 0.0 }
  0x1f   : > { %v359_v51 = vadd.f32 %v358_v40, %v357_v43  ;;  %v309_v53 = vadd.f32 %v308_v52, %v307_v48  ;;  %v312_v57 = vsel %vm306_vm1, %v305_v47, 0.0 }
  0x20   : > { %v362_v49 = vmul.f32 0.25, %v347_v41  ;;  %v363_v50 = vmul.f32 0.25, %v354_v42 }
  0x21   : > { %v361_v56 = vadd.f32 %v360_v45, %v359_v51  ;;  %v311_v58 = vadd.f32 %v310_v54, %v309_v53 }
  0x22   : > { %v367_v55 = vpack.c.bf16 %v363_v50, %v362_v49 }
  0x23   : > { %v364_v60 = vmul.f32 0.25, %v361_v56  ;;  %v313_v61 = vadd.f32 %v312_v57, %v311_v58 }
  0x24   : > { %439 = vrot.lane.b32.xlu0 %v367_v55, %s946_s12  ;;  %v374_v59 = vsel %vm369_vm3, %v367_v55, 0 }
  0x25   : > { %813 = vmatpush3.bf16.xpose.msra.mxu0 %v374_v59  ;;  %v368_v62 = vpack.c.bf16 %v364_v60, %v364_v60  ;;  %v315_v63 = vmul.f32 0.25, %v313_v61 }
  0x26   : > { %814 = vmatprep.subr.bf16.mxu0 %v944_v3 }
  0x27   : > { %v365_v0 = vmul.f32 0.35355338, %v315_v63  ;;  %v377_v1 = vsel %vm369_vm3, %v368_v62, 0 }
  0x28   : > { %441 = vrot.lane.b32.xlu0 %v368_v62, %s946_s12 }
  0x29   : > { %v366_v2 = vpack.c.bf16 %v365_v0, %v365_v0 }
  0x2b   : > { %435 = vrot.lane.b32.xlu1 %v366_v2, %s946_s12 }
  0x2d   : > { %815 = vmatpush3.bf16.xpose.msra.mxu0 %v377_v1 }
  0x34   : > { %817 = vmatmul.mubr.msk.bf16.vlgmr.msra.gmra.mrb[0].mxu0 %vm369_vm3, %v366_v2 }
  0x96   : > { %v440_v4 = vpop.permute.xlu0 %439 }
  0x97   : > { %v447_v5 = vsel %vm369_vm3, %v440_v4, 0 }
  0x98   : > { %821 = vmatpush3.bf16.xpose.msra.mxu1 %v447_v5 }
  0x99   : > { %822 = vmatprep.subr.bf16.mxu1 %v944_v3 }
  0x9a   : > { %v442_v6 = vpop.permute.xlu0 %441 }
  0x9b   : > { %v450_v7 = vsel %vm369_vm3, %v442_v6, 0 }
  0x9d   : > { %v436_v8 = vpop.permute.xlu1 %435 }
  0xa0   : > { %823 = vmatpush3.bf16.xpose.msra.mxu1 %v450_v7 }
  0xa7   : > { %825 = vmatmul.mubr.msk.bf16.vlgmr.msra.gmra.mrb[0].mxu1 %vm369_vm3, %v436_v8 }
 0x107   : > { %v413_v9 = vpop.f32.mrb[0].mxu0 }
 0x108   : > { %v420_v10 = vsel %vm419_vm4, %v413_v9, -inf  ;;  %v818_v11 = vpop.f32.mrb[1].mxu0 }
 0x109   : > { %421 = vmax.xlane.f32.xlu1 %v420_v10  ;;  %v416_v12 = vpop.f32.mrb[2].mxu0 }
 0x10a   : > { %v819_v13 = vpop.f32.mrb[3].mxu0 }
 0x17a   : > { %v486_v14 = vpop.f32.mrb[0].mxu1 }
 0x17b   : > { %v826_v15 = vpop.f32.mrb[1].mxu1  ;;  %v492_v16 = vsel %vm419_vm4, %v486_v14, -inf }
 0x17c   : > { %493 = vmax.xlane.f32.xlu0 %v492_v16  ;;  %v489_v3 = vpop.f32.mrb[2].mxu1 }
 0x17d   : > { %v827_v17 = vpop.f32.mrb[3].mxu1 }
 0x196   : > { %v422_v18 = vpop.xlane.xlu1 %421 }
 0x197   : > { %v423_v19 = vsub.f32 %v413_v9, %v422_v18 }
 0x199   : > { %v424_v20 = vmul.f32 1.442695, %v423_v19 }
 0x19b   : > { %894 = vpow2.f32 %v424_v20 }
 0x1a5   : > { %v895_v21 = vpop.eup %894 }
 0x1a6   : > { %v426_v22 = vsel %vm419_vm4, %v895_v21, 0.0 }
 0x1a7   : > { %427 = vadd.xlane.f32.xlu0 %v426_v22 }
 0x209   : > { %v494_v23 = vpop.xlane.xlu0 %493 }
 0x20a   : > { %v495_v24 = vsub.f32 %v486_v14, %v494_v23 }
 0x20c   : > { %v496_v25 = vmul.f32 1.442695, %v495_v24 }
 0x20e   : > { %896 = vpow2.f32 %v496_v25 }
 0x218   : > { %v897_v26 = vpop.eup %896 }
 0x219   : > { %v498_v27 = vsel %vm419_vm4, %v897_v26, 0.0 }
 0x21a   : > { %499 = vadd.xlane.f32.xlu1 %v498_v27 }
 0x234   : > { %v428_v28 = vpop.xlane.xlu0 %427 }
 0x235   : > { %898 = vrcp.f32 %v428_v28 }
 0x23f   : > { %v899_v29 = vpop.eup %898 }
 0x240   : > { %v430_v30 = vmul.f32 %v899_v29, %v895_v21 }
 0x242   : > { %v431_v31 = vpack.c.bf16 %v430_v30, %v430_v30 }
 0x244   : > { %433 = vst.msk [vmem:[#allocation2] sm:$0x3] %vm432_vm5, %v431_v31 }
 0x2a7   : > { %v500_v32 = vpop.xlane.xlu1 %499 }
 0x2a8   : > { %900 = vrcp.f32 %v500_v32 }
 0x2b2   : > { %v901_v33 = vpop.eup %900 }
 0x2b3   : > { %v502_v34 = vmul.f32 %v901_v33, %v897_v26 }
 0x2b5   : > { %v503_v35 = vpack.c.bf16 %v502_v34, %v502_v34 }
 0x2b7   : > { %505 = vst.msk [vmem:[#allocation2 + $0x2] sm:$0x3] %vm432_vm5, %v503_v35 }
 0x2b8 PF: > { %v902_v36 = vld [vmem:[%s1018_s10] sm:$0xff]   ;;  %s947_s13 = smov 120   ;;  %v903_v37 = vld [vmem:[%s1018_s10 + $0x8] ss:$0 sps:$4 sm:$0x33]   ;;  %v948_v38 = vmov 0.0  }
 0x2b9   : > { %569 = vrot.lane.b32.xlu0 %v902_v36, %s947_s13  ;;  %836 = vmatprep.subr.bf16.mxu1 %v948_v38  ;;  %vm949_vm6 = vmmov 0   ;;  %vm523_vm7 = vcmask 1041408   ;;  %v509_v40 = vld [vmem:[#allocation2] sm:$0x3]  ;;  %vm519_vm8 = vcmask 162816   ;;  %s950_s19 = smov 8  }
 0x2ba   : > { %840 = vmatprep.mubr.msk.bf16.mxu1 %vm949_vm6, %v948_v38  ;;  %828 = vmatprep.subr.bf16.mxu0 %v948_v38  ;;  %v525_v39 = vsel %vm523_vm7, %v903_v37, 0  ;;  %vm624_vm9 = vcmask 64512   ;;  %vm627_vm10 = vcmask 123904  }
 0x2bb   : > { %829 = vmatpush3.bf16.msra.mxu0 %v902_v36  ;;  %832 = vmatprep.mubr.msk.bf16.mxu0 %vm949_vm6, %v948_v38 }
 0x2bc   : > { %830 = vmatprep.subr.bf16.mxu0 %v948_v38 }
 0x2bd   : > { %571 = vrot.lane.b32.xlu0 %v903_v37, %s947_s13 }
 0x2be   : > { %v568_v44 = vld [vmem:[#allocation2 + $0x2] sm:$0x3] }
 0x2bf   : > { %831 = vmatpush3.bf16.msra.mxu0 %v525_v39 }
 0x2c2   : > { %833 = vmatmul.mubr.msk.bf16.vlgmr.msra.gmra.mrb[0].mxu0 %vm519_vm8, %v509_v40 }
 0x32b   : > { %v570_v41 = vpop.permute.xlu0 %569 }
 0x32c   : > { %837 = vmatpush3.bf16.msra.mxu1 %v570_v41 }
 0x32d   : > { %838 = vmatprep.subr.bf16.mxu1 %v948_v38 }
 0x32f   : > { %v572_v42 = vpop.permute.xlu0 %571 }
 0x330   : > { %v578_v43 = vsel %vm523_vm7, %v572_v42, 0 }
 0x331   : > { %839 = vmatpush3.bf16.msra.mxu1 %v578_v43 }
 0x334   : > { %841 = vmatmul.mubr.msk.bf16.vlgmr.msra.gmra.mrb[0].mxu1 %vm519_vm8, %v568_v44 }
 0x395   : > { %v561_v45 = vpop.f32.mrb[0].mxu0 }
 0x396   : > { %v834_v46 = vpop.f32.mrb[1].mxu0 }
 0x397   : > { %v564_v47 = vpop.f32.mrb[2].mxu0 }
 0x398   : > { %v835_v48 = vpop.f32.mrb[3].mxu0 }
 0x407   : > { %v614_v49 = vpop.f32.mrb[0].mxu1 }
 0x408   : > { %621 = vrot.lane.b32.xlu1 %v614_v49, %s950_s19  ;;  %v842_v50 = vpop.f32.mrb[1].mxu1 }
 0x409   : > { %v617_v51 = vpop.f32.mrb[2].mxu1 }
 0x40a   : > { %v843_v52 = vpop.f32.mrb[3].mxu1 }
 0x47a   : > { %v622_v53 = vpop.permute.xlu1 %621 }
 0x47b   : > { %v625_v54 = vsel %vm624_vm9, %v561_v45, %v622_v53 }
 0x47c   : > { %v626_v55 = vpack.c.bf16 %v625_v54, %v625_v54 }
 0x47e   : > { %628 = vst.msk [vmem:[%s1023_s22] sm:$0x3] %vm627_vm10, %v626_v55 }
 0x47f PF: > { %s13_s16 = sadd.s32 1, %s942_s16   ;;  %s1092_s12 = smov %s934_s14 }
 0x480   : > { %p10_p8 = scmp.ge.s32.totalorder %s13_s16, 10   ;;  %s1093_s13 = smov %s938_s15 }
 0x481   : > { %s1094_s14 = smov %s1097_s17  ;;  %s1095_s15 = smov %s1101_s18 }
 0x482   :  { %12 = sbr.rel (!%p10_p8) target bundleno = 3 (0x3), region = 74 }

// kernel: schi_stage_forward.19
= control target key start
LH: loop header
LB: loop body
LE: loop exit
PB: predicated region body
PF: predicated region fallthrough
CT: control target
= control target key end

     0   :  { %s587_s18 = smov 0   ;;  %s631_s0 = inlined_call_operand.vmem [shape: bf16[48,16], index: 0, kind: input, shape index: {}]   ;;  %s632_s1 = inlined_call_operand.vmem [shape: bf16[16,48], index: 1, kind: input, shape index: {}]   ;;  %s633_s2 = inlined_call_operand.vmem [shape: f32[1,48], index: 2, kind: input, shape index: {}]   ;;  %s634_s3 = inlined_call_operand.vmem [shape: bf16[48,16], index: 3, kind: output, shape index: {0}]   ;;  %s635_s4 = inlined_call_operand.vmem [shape: bf16[48,16], index: 4, kind: output, shape index: {1}]   ;;  %s636_s5 = inlined_call_operand.vmem [shape: bf16[48,16], index: 5, kind: output, shape index: {2}]  }
   0x1 LB: > { %s502_s19 = sadd.s32 4294967295, %s553_s18   ;;  %p506_p0 = scmp.ge.s32.totalorder %s553_s18, 1  ;;  %s553_s18 = sphi %s587_s18, %s16_s18  }
   0x2   : > { %p193_p1 = scmp.lt.s32.totalorder %s553_s18, 3 }
   0x4   : > { %p194_p2 = pnand %p506_p0, %p193_p1 }
   0x5   : > { %v544_v0 = vld [vmem:[%s632_s1] sm:$0xff] (!%p194_p2)   ;;  %s231_s22 = smul.u32 (!%p194_p2), 3, %s502_s19  ;;  %vm282_vm0 = vcmask (!%p194_p2), 130048   ;;  %vm350_vm1 = vcmask (!%p194_p2), 125952   ;;  %s555_s7 = smov (!%p194_p2), 112  }
   0x6   : > { %197 = sbr.rel (%p194_p2) target bundleno = 359 (0x167), region = 32  ;;  %528 = vmatprep.subr.bf16.mxu0 (!%p194_p2), %v544_v0  ;;  %v511_v3 = vld [vmem:[%s633_s2] ss:$0 sm:$0xff] (!%p194_p2)  ;;  %s556_s8 = smov (!%p194_p2), 96  }
   0x7   : > { %p232_p3 = scmp.lt.s32.totalorder (!%p194_p2), %s231_s22, 5  ;;  %529 = vmatpush3.bf16.msra.mxu0 (!%p194_p2), %v544_v0 }
   0xd   : > { %s638_s22 = smov (!%p232_p3, %s231_s22), 5 }
   0xe   : > { %s598_s23 = sshll.u32 %s638_s22, 2 }
   0xf   : > { %s235_s26 = scalar_lea.vmem %s631_s0, %s598_s23  ;;  %s241_s6 = scalar_lea.vmem %s634_s3, %s598_s23 }
  0x10   : > { %v545_v1 = vld [vmem:[%s235_s26] sm:$0xff]   ;;  %v546_v2 = vld [vmem:[%s235_s26 + $0x8] ss:$0 sps:$4 sm:$0xff]   ;;  %s247_s11 = scalar_lea.vmem %s635_s4, %s598_s23  ;;  %s253_s14 = scalar_lea.vmem %s636_s5, %s598_s23 }
  0x11   : > { %530 = vmatprep.mubr.msk.bf16.mxu0 %vm282_vm0, %v545_v1 }
  0x12   : > { %531 = vmatmul.mubr.msk.bf16.vlgmr.msra.gmra.mrb[0].mxu0 %vm282_vm0, %v546_v2 }
  0xe5   : > { %v532_v4 = vpop.f32.mrb[0].mxu0 }
  0xe6   : > { %v332_v5 = vadd.f32 %v532_v4, %v511_v3  ;;  %v323_v6 = vpop.f32.mrb[1].mxu0 }
  0xe7   : > { %v324_v7 = vadd.f32 %v511_v3, %v323_v6  ;;  %v533_v8 = vpop.f32.mrb[2].mxu0 }
  0xe8   : > { %v524_v9 = vpack.c.bf16 %v332_v5, %v332_v5  ;;  %v326_v10 = vpop.f32.mrb[3].mxu0 }
  0xe9   : > { %v522_v11 = vpack.c.bf16 %v324_v7, %v324_v7  ;;  %v327_v12 = vadd.f32 %v511_v3, %v326_v10 }
  0xea   : > { %353 = vst.msk [vmem:[%s241_s6 + $0x8] sm:$0xf] %vm350_vm1, %v524_v9  ;;  %358 = vrot.lane.b32.xlu1 %v524_v9, %s555_s7 }
  0xeb   : > { %351 = vst.msk [vmem:[%s241_s6] sm:$0xf] %vm350_vm1, %v522_v11  ;;  %v523_v13 = vpack.c.bf16 %v327_v12, %v327_v12  ;;  %354 = vrot.lane.b32.xlu0 %v522_v11, %s555_s7 }
  0xed   : > { %352 = vst.msk [vmem:[%s241_s6 + $0x4] sm:$0xf] %vm350_vm1, %v523_v13 }
  0xee   : > { %366 = vrot.lane.b32.xlu1 %v522_v11, %s556_s8 }
  0xef   : > { %356 = vrot.lane.b32.xlu0 %v523_v13, %s555_s7 }
  0xf2   : > { %370 = vrot.lane.b32.xlu1 %v524_v9, %s556_s8 }
  0xf3   : > { %368 = vrot.lane.b32.xlu0 %v523_v13, %s556_s8 }
 0x15c   : > { %v359_v14 = vpop.permute.xlu1 %358 }
 0x15d   : > { %365 = vst.msk [vmem:[%s247_s11 + $0x8] sm:$0xf] %vm350_vm1, %v359_v14  ;;  %v355_v15 = vpop.permute.xlu0 %354 }
 0x15e   : > { %363 = vst.msk [vmem:[%s247_s11] sm:$0xf] %vm350_vm1, %v355_v15 }
 0x160   : > { %v367_v16 = vpop.permute.xlu1 %366 }
 0x161   : > { %375 = vst.msk [vmem:[%s253_s14] sm:$0xf] %vm350_vm1, %v367_v16  ;;  %v357_v17 = vpop.permute.xlu0 %356 }
 0x162   : > { %364 = vst.msk [vmem:[%s247_s11 + $0x4] sm:$0xf] %vm350_vm1, %v357_v17 }
 0x164   : > { %v371_v18 = vpop.permute.xlu1 %370 }
 0x165   : > { %377 = vst.msk [vmem:[%s253_s14 + $0x8] sm:$0xf] %vm350_vm1, %v371_v18  ;;  %v369_v19 = vpop.permute.xlu0 %368 }
 0x166   : > { %376 = vst.msk [vmem:[%s253_s14 + $0x4] sm:$0xf] %vm350_vm1, %v369_v19 }
 0x167 PF: > { %s16_s18 = sadd.s32 1, %s553_s18  }
 0x168   : > { %p13_p4 = scmp.ge.s32.totalorder %s16_s18, 4  }
 0x16a   :  { %15 = sbr.rel (!%p13_p4) target bundleno = 1 (0x1), region = 86 }

// kernel: schi_stage_forward.20
= control target key start
LH: loop header
LB: loop body
LE: loop exit
PB: predicated region body
PF: predicated region fallthrough
CT: control target
= control target key end

     0   :  { %s889_s12 = smov 0   ;;  %s891_s13 = smov 0   ;;  %s971_s0 = inlined_call_operand.vmem [shape: bf16[2,4,4,16], index: 0, kind: input, shape index: {}]   ;;  %s972_s1 = inlined_call_operand.vmem [shape: bf16[2,4,6,16], index: 1, kind: input, shape index: {}]   ;;  %s973_s2 = inlined_call_operand.vmem [shape: bf16[2,4,6,16], index: 2, kind: input, shape index: {}]   ;;  %s974_s3 = inlined_call_operand.vmem [shape: bf16[2,4,4,16], index: 3, kind: output, shape index: {}]  }
   0x1   :  { %s893_s14 = smov 0   ;;  %s895_s15 = smov 0  }
   0x2   :  { %s897_s16 = smov 0  }
   0x3 LB: > { %s25_s17 = sadd.s32 1, %s852_s14  ;;  %s32_s18 = sadd.s32 1, %s856_s15  ;;  %s860_s16 = sphi %s897_s16, %s13_s16   ;;  %s856_s15 = sphi %s895_s15, %s978_s15   ;;  %s852_s14 = sphi %s893_s14, %s977_s14   ;;  %s848_s13 = sphi %s891_s13, %s976_s13   ;;  %s844_s12 = sphi %s889_s12, %s975_s12  }
   0x4   : > { %p26_p0 = scmp.ge.s32.totalorder %s25_s17, 4  ;;  %p715_p1 = scmp.ge.s32.totalorder %s860_s16, 1 }
   0x5   : > { %p200_p2 = scmp.lt.s32.totalorder %s860_s16, 9 }
   0x6   : > { %s980_s17 = smov (%p26_p0, %s25_s17), 0  ;;  %s982_s18 = smov (!%p26_p0, %s32_s18), %s856_s15 }
   0x7   : > { %p201_p3 = pnand %p715_p1, %p200_p2  ;;  %p34_p4 = scmp.ge.s32.totalorder %s982_s18, 2 }
   0x8   : > { %p252_p5 = scmp.lt.s32.totalorder (!%p201_p3), %s848_s13, 1  ;;  %p270_p6 = scmp.lt.s32.totalorder (!%p201_p3), %s844_s12, 3 }
   0x9   : > { %s984_s18 = smov (%p34_p4, %s982_s18), 0  ;;  %204 = sbr.rel (%p201_p3) target bundleno = 1139 (0x473), region = 32 }
   0xa   : > { %p724_p7 = scmp.ne.s32.totalorder (!%p201_p3), %s844_s12, 0 }
  0x10   : > { %s986_s13 = smov (!%p252_p5, %s848_s13), 1  ;;  %vm321_vm0 = vcmask (!%p724_p7), 128000   ;;  %v862_v2 = vmov (!%p724_p7), 0.0   ;;  %vm303_vm1 = vcmask (!%p724_p7), 125952   ;;  %vm863_vm2 = vmmov (!%p724_p7), 0   ;;  %s864_s11 = smov (!%p724_p7), 120  }
  0x11   : > { %s271_s19 = scalar_select %p270_p6, %s844_s12, 3 }
  0x12   : > { %s732_s20 = sshll.u32 %s986_s13, 3  ;;  %s733_s21 = sshll.u32 %s986_s13, 4  ;;  %742 = vmatprep.subr.bf16.mxu0 (!%p724_p7), %v862_v2  ;;  %748 = vmatprep.subr.bf16.mxu1 (!%p724_p7), %v862_v2  ;;  %vm333_vm3 = vcmask (!%p724_p7), 64512   ;;  %vm380_vm4 = vcmask (!%p724_p7), 44032   ;;  %vm393_vm5 = vcmask (!%p724_p7), 41984  }
  0x13   : > { %s259_s24 = scalar_lea.vmem %s971_s0, %s732_s20  ;;  %s267_s27 = scalar_lea.vmem %s972_s1, %s733_s21  ;;  %744 = vmatprep.mubr.msk.bf16.mxu0 (!%p724_p7), %vm863_vm2, %v862_v2  ;;  %750 = vmatprep.mubr.msk.bf16.mxu1 (!%p724_p7), %vm863_vm2, %v862_v2 }
  0x14   : > { %s720_s28 = sshll.u32 %s986_s13, 2  ;;  %294 = sbr.rel (%p724_p7) target bundleno = 686 (0x2ae), region = 36  ;;  %v313_v0 = vld [vmem:[%s267_s27] sm:$0x7] (!%p724_p7)  ;;  %v314_v1 = vld [vmem:[%s267_s27 + $0x4] sm:$0x7] (!%p724_p7) }
  0x15   : > { %s276_s29 = sadd.s32 %s720_s28, %s271_s19  ;;  %v315_v3 = vld [vmem:[%s267_s27 + $0x8] sm:$0x7] (!%p724_p7)  ;;  %v316_v4 = vld [vmem:[%s267_s27 + $0xc] sm:$0x7] (!%p724_p7)  ;;  %v317_v5 = vunpack.c.l.bf16 (!%p724_p7), %v313_v0  ;;  %v318_v6 = vunpack.c.l.bf16 (!%p724_p7), %v314_v1  ;;  %v295_v9 = vld [vmem:[%s259_s24] sm:$0x3] (!%p724_p7) }
  0x16   : > { %s721_s30 = sshll.u32 %s276_s29, 2  ;;  %s723_s4 = sshll.u32 %s276_s29, 1  ;;  %v319_v7 = vunpack.c.l.bf16 (!%p724_p7), %v315_v3  ;;  %v320_v8 = vunpack.c.l.bf16 (!%p724_p7), %v316_v4  ;;  %v296_v10 = vld [vmem:[%s259_s24 + $0x2] sm:$0x3] (!%p724_p7)  ;;  %v297_v13 = vld [vmem:[%s259_s24 + $0x4] sm:$0x3] (!%p724_p7)  ;;  %v299_v15 = vunpack.c.l.bf16 (!%p724_p7), %v295_v9 }
  0x17   : > { %s932_s7 = scalar_lea.vmem %s973_s2, %s721_s30  ;;  %s937_s10 = scalar_lea.vmem %s974_s3, %s723_s4  ;;  %v322_v11 = vsel (!%p724_p7), %vm321_vm0, %v317_v5, 0.0  ;;  %v323_v12 = vsel (!%p724_p7), %vm321_vm0, %v318_v6, 0.0  ;;  %v298_v14 = vld [vmem:[%s259_s24 + $0x6] sm:$0x3] (!%p724_p7)  ;;  %v300_v16 = vunpack.c.l.bf16 (!%p724_p7), %v296_v10  ;;  %v301_v19 = vunpack.c.l.bf16 (!%p724_p7), %v297_v13 }
  0x18   : > { %v324_v17 = vadd.f32 (!%p724_p7), %v323_v12, %v322_v11  ;;  %v325_v18 = vsel (!%p724_p7), %vm321_vm0, %v319_v7, 0.0  ;;  %v327_v20 = vsel (!%p724_p7), %vm321_vm0, %v320_v8, 0.0  ;;  %v302_v21 = vunpack.c.l.bf16 (!%p724_p7), %v298_v14 }
  0x19   : > { %v304_v22 = vsel (!%p724_p7), %vm303_vm1, %v299_v15, 0.0  ;;  %v305_v23 = vsel (!%p724_p7), %vm303_vm1, %v300_v16, 0.0  ;;  %v307_v26 = vsel (!%p724_p7), %vm303_vm1, %v301_v19, 0.0 }
  0x1a   : > { %v326_v24 = vadd.f32 (!%p724_p7), %v325_v18, %v324_v17  ;;  %v306_v25 = vadd.f32 (!%p724_p7), %v305_v23, %v304_v22  ;;  %v309_v27 = vsel (!%p724_p7), %vm303_vm1, %v302_v21, 0.0 }
  0x1c   : > { %v328_v28 = vadd.f32 %v327_v20, %v326_v24  ;;  %v308_v29 = vadd.f32 %v307_v26, %v306_v25 }
  0x1e   : > { %v329_v30 = vmul.f32 0.25, %v328_v28  ;;  %v310_v31 = vadd.f32 %v309_v27, %v308_v29 }
  0x20   : > { %v332_v32 = vpack.c.bf16 %v329_v30, %v329_v30  ;;  %v312_v33 = vmul.f32 0.25, %v310_v31 }
  0x22   : > { %399 = vrot.lane.b32.xlu0 %v332_v32, %s864_s11  ;;  %v338_v34 = vsel %vm333_vm3, %v332_v32, 0  ;;  %v330_v35 = vmul.f32 0.35355338, %v312_v33 }
  0x23   : > { %743 = vmatpush3.bf16.xpose.msra.mxu0 %v338_v34 }
  0x24   : > { %v331_v36 = vpack.c.bf16 %v330_v35, %v330_v35 }
  0x26   : > { %396 = vrot.lane.b32.xlu0 %v331_v36, %s864_s11 }
  0x2a   : > { %745 = vmatmul.mubr.msk.bf16.vlgmr.msra.gmra.mrb[0].mxu0 %vm333_vm3, %v331_v36 }
  0x94   : > { %v400_v37 = vpop.permute.xlu0 %399 }
  0x95   : > { %v405_v38 = vsel %vm333_vm3, %v400_v37, 0 }
  0x96   : > { %749 = vmatpush3.bf16.xpose.msra.mxu1 %v405_v38 }
  0x98   : > { %v397_v39 = vpop.permute.xlu0 %396 }
  0x9d   : > { %751 = vmatmul.mubr.msk.bf16.vlgmr.msra.gmra.mrb[0].mxu1 %vm333_vm3, %v397_v39 }
  0xfd   : > { %v374_v40 = vpop.f32.mrb[0].mxu0 }
  0xfe   : > { %v381_v41 = vsel %vm380_vm4, %v374_v40, -inf  ;;  %v746_v42 = vpop.f32.mrb[1].mxu0 }
  0xff   : > { %382 = vmax.xlane.f32.xlu1 %v381_v41  ;;  %v377_v43 = vpop.f32.mrb[2].mxu0 }
 0x100   : > { %v747_v44 = vpop.f32.mrb[3].mxu0 }
 0x170   : > { %v441_v45 = vpop.f32.mrb[0].mxu1 }
 0x171   : > { %v752_v46 = vpop.f32.mrb[1].mxu1  ;;  %v447_v47 = vsel %vm380_vm4, %v441_v45, -inf }
 0x172   : > { %v444_v48 = vpop.f32.mrb[2].mxu1  ;;  %448 = vmax.xlane.f32.xlu1 %v447_v47 }
 0x173   : > { %v753_v49 = vpop.f32.mrb[3].mxu1 }
 0x18c   : > { %v383_v50 = vpop.xlane.xlu1 %382 }
 0x18d   : > { %v384_v51 = vsub.f32 %v374_v40, %v383_v50 }
 0x18f   : > { %v385_v52 = vmul.f32 1.442695, %v384_v51 }
 0x191   : > { %813 = vpow2.f32 %v385_v52 }
 0x19b   : > { %v814_v53 = vpop.eup %813 }
 0x19c   : > { %v387_v54 = vsel %vm380_vm4, %v814_v53, 0.0 }
 0x19d   : > { %388 = vadd.xlane.f32.xlu0 %v387_v54 }
 0x1ff   : > { %v449_v55 = vpop.xlane.xlu1 %448 }
 0x200   : > { %v450_v56 = vsub.f32 %v441_v45, %v449_v55 }
 0x202   : > { %v451_v57 = vmul.f32 1.442695, %v450_v56 }
 0x204   : > { %815 = vpow2.f32 %v451_v57 }
 0x20e   : > { %v816_v58 = vpop.eup %815 }
 0x20f   : > { %v453_v59 = vsel %vm380_vm4, %v816_v58, 0.0 }
 0x210   : > { %454 = vadd.xlane.f32.xlu1 %v453_v59 }
 0x22a   : > { %v389_v60 = vpop.xlane.xlu0 %388 }
 0x22b   : > { %817 = vrcp.f32 %v389_v60 }
 0x235   : > { %v818_v61 = vpop.eup %817 }
 0x236   : > { %v391_v62 = vmul.f32 %v818_v61, %v814_v53 }
 0x238   : > { %v392_v63 = vpack.c.bf16 %v391_v62, %v391_v62 }
 0x23a   : > { %394 = vst.msk [vmem:[#allocation2] sm:$0x3] %vm393_vm5, %v392_v63 }
 0x29d   : > { %v455_v0 = vpop.xlane.xlu1 %454 }
 0x29e   : > { %819 = vrcp.f32 %v455_v0 }
 0x2a8   : > { %v820_v1 = vpop.eup %819 }
 0x2a9   : > { %v457_v2 = vmul.f32 %v820_v1, %v816_v58 }
 0x2ab   : > { %v458_v3 = vpack.c.bf16 %v457_v2, %v457_v2 }
 0x2ad   : > { %460 = vst.msk [vmem:[#allocation2 + $0x2] sm:$0x3] %vm393_vm5, %v458_v3 }
 0x2ae PF: > { %v461_v4 = vld [vmem:[%s932_s7] sm:$0x7]  ;;  %vm467_vm6 = vcmask 1042432   ;;  %v865_v6 = vmov 0.0   ;;  %vm866_vm7 = vmmov 0   ;;  %s867_s12 = smov 120  }
 0x2af   : > { %v728_v5 = vcombine.low %v461_v4, %v461_v4  ;;  %760 = vmatprep.subr.bf16.mxu1 %v865_v6  ;;  %762 = vmatprep.mubr.msk.bf16.mxu1 %vm866_vm7, %v865_v6  ;;  %v469_v7 = vsel %vm467_vm6, %v461_v4, 0  ;;  %v462_v8 = vld [vmem:[#allocation2] sm:$0x3]  ;;  %vm463_vm8 = vcmask 48128   ;;  %s868_s13 = smov 8   ;;  %vm568_vm9 = vcmask 64512  }
 0x2b0   : > { %754 = vmatprep.subr.bf16.mxu0 %v865_v6  ;;  %756 = vmatprep.mubr.msk.bf16.mxu0 %vm866_vm7, %v865_v6  ;;  %vm571_vm10 = vcmask 123904  }
 0x2b1   : > { %516 = vrot.lane.b32.xlu0 %v728_v5, %s867_s12  ;;  %755 = vmatpush3.bf16.msra.mxu0 %v469_v7 }
 0x2b4   : > { %757 = vmatmul.mubr.msk.bf16.vlgmr.msra.gmra.mrb[0].mxu0 %vm463_vm8, %v462_v8  ;;  %v512_v11 = vld [vmem:[#allocation2 + $0x2] sm:$0x3] }
 0x323   : > { %v517_v9 = vpop.permute.xlu0 %516 }
 0x324   : > { %v522_v10 = vsel %vm467_vm6, %v517_v9, 0 }
 0x325   : > { %761 = vmatpush3.bf16.msra.mxu1 %v522_v10 }
 0x328   : > { %763 = vmatmul.mubr.msk.bf16.vlgmr.msra.gmra.mrb[0].mxu1 %vm463_vm8, %v512_v11 }
 0x387   : > { %v505_v12 = vpop.f32.mrb[0].mxu0 }
 0x388   : > { %v758_v13 = vpop.f32.mrb[1].mxu0 }
 0x389   : > { %v508_v14 = vpop.f32.mrb[2].mxu0 }
 0x38a   : > { %v759_v15 = vpop.f32.mrb[3].mxu0 }
 0x3fb   : > { %v558_v16 = vpop.f32.mrb[0].mxu1 }
 0x3fc   : > { %565 = vrot.lane.b32.xlu0 %v558_v16, %s868_s13  ;;  %v764_v17 = vpop.f32.mrb[1].mxu1 }
 0x3fd   : > { %v561_v18 = vpop.f32.mrb[2].mxu1 }
 0x3fe   : > { %v765_v19 = vpop.f32.mrb[3].mxu1 }
 0x46e   : > { %v566_v20 = vpop.permute.xlu0 %565 }
 0x46f   : > { %v569_v21 = vsel %vm568_vm9, %v505_v12, %v566_v20 }
 0x470   : > { %v570_v22 = vpack.c.bf16 %v569_v21, %v569_v21 }
 0x472   : > { %572 = vst.msk [vmem:[%s937_s10] sm:$0x3] %vm571_vm10, %v570_v22 }
 0x473 PF: > { %s13_s16 = sadd.s32 1, %s860_s16   ;;  %s975_s12 = smov %s852_s14 }
 0x474   : > { %p10_p8 = scmp.ge.s32.totalorder %s13_s16, 10   ;;  %s976_s13 = smov %s856_s15 }
 0x475   : > { %s977_s14 = smov %s980_s17  ;;  %s978_s15 = smov %s984_s18 }
 0x476   :  { %12 = sbr.rel (!%p10_p8) target bundleno = 3 (0x3), region = 74 }

// kernel: schi_stage_forward.22
= control target key start
LH: loop header
LB: loop body
LE: loop exit
PB: predicated region body
PF: predicated region fallthrough
CT: control target
= control target key end

     0   :  { %s510_s15 = smov 0   ;;  %s549_s0 = inlined_call_operand.vmem [shape: bf16[64,16], index: 0, kind: input, shape index: {}]   ;;  %s550_s1 = inlined_call_operand.vmem [shape: bf16[16,32], index: 1, kind: input, shape index: {}]   ;;  %s551_s2 = inlined_call_operand.vmem [shape: f32[1,32], index: 2, kind: input, shape index: {}]   ;;  %s552_s3 = inlined_call_operand.vmem [shape: bf16[64,16], index: 3, kind: output, shape index: {0}]   ;;  %s553_s4 = inlined_call_operand.vmem [shape: bf16[64,16], index: 4, kind: output, shape index: {1}]  }
   0x1 LB: > { %s428_s16 = sadd.s32 4294967295, %s482_s15   ;;  %p432_p0 = scmp.ge.s32.totalorder %s482_s15, 1  ;;  %s482_s15 = sphi %s510_s15, %s15_s15  }
   0x2   : > { %p166_p1 = scmp.lt.s32.totalorder %s482_s15, 3 }
   0x4   : > { %p167_p2 = pnand %p432_p0, %p166_p1 }
   0x5   : > { %v473_v0 = vld [vmem:[%s550_s1] sm:$0xff] (!%p167_p2)   ;;  %s433_s19 = sshll.u32 (!%p167_p2), %s428_s16, 2  ;;  %vm245_vm0 = vcmask (!%p167_p2), 130048   ;;  %vm317_vm1 = vcmask (!%p167_p2), 125952   ;;  %s484_s29 = smov (!%p167_p2), 112  }
   0x6   : > { %170 = sbr.rel (%p167_p2) target bundleno = 355 (0x163), region = 32  ;;  %p198_p3 = scmp.lt.s32.totalorder (!%p167_p2), %s433_s19, 7  ;;  %458 = vmatprep.subr.bf16.mxu0 (!%p167_p2), %v473_v0  ;;  %v439_v3 = vld [vmem:[%s551_s2] ss:$0 sm:$0xff] (!%p167_p2) }
   0x7   : > { %459 = vmatpush3.bf16.msra.mxu0 (!%p167_p2), %v473_v0 }
   0xd   : > { %s555_s19 = smov (!%p198_p3, %s433_s19), 7 }
   0xe   : > { %s521_s20 = sshll.u32 %s555_s19, 2 }
   0xf   : > { %s201_s23 = scalar_lea.vmem %s549_s0, %s521_s20  ;;  %s207_s28 = scalar_lea.vmem %s552_s3, %s521_s20 }
  0x10   : > { %v474_v1 = vld [vmem:[%s201_s23] sm:$0xff]   ;;  %v475_v2 = vld [vmem:[%s201_s23 + $0x8] sm:$0xff]   ;;  %s213_s6 = scalar_lea.vmem %s553_s4, %s521_s20 }
  0x11   : > { %460 = vmatprep.mubr.msk.bf16.mxu0 %vm245_vm0, %v474_v1 }
  0x12   : > { %461 = vmatmul.mubr.msk.bf16.vlgmr.msra.gmra.mrb[0].mxu0 %vm245_vm0, %v475_v2 }
  0xe5   : > { %v462_v4 = vpop.f32.mrb[0].mxu0 }
  0xe6   : > { %v295_v5 = vadd.f32 %v462_v4, %v439_v3  ;;  %v286_v6 = vpop.f32.mrb[1].mxu0 }
  0xe7   : > { %v287_v7 = vadd.f32 %v439_v3, %v286_v6  ;;  %v463_v8 = vpop.f32.mrb[2].mxu0 }
  0xe8   : > { %v453_v9 = vpack.c.bf16 %v295_v5, %v295_v5  ;;  %v298_v10 = vadd.f32 %v463_v8, %v439_v3  ;;  %v289_v11 = vpop.f32.mrb[3].mxu0 }
  0xe9   : > { %v451_v12 = vpack.c.bf16 %v287_v7, %v287_v7  ;;  %v290_v13 = vadd.f32 %v439_v3, %v289_v11 }
  0xea   : > { %326 = vrot.lane.b32.xlu1 %v453_v9, %s484_s29  ;;  %v454_v15 = vpack.c.bf16 %v298_v10, %v298_v10  ;;  %320 = vst.msk [vmem:[%s207_s28 + $0x8] sm:$0xf] %vm317_vm1, %v453_v9 }
  0xeb   : > { %318 = vst.msk [vmem:[%s207_s28] sm:$0xf] %vm317_vm1, %v451_v12  ;;  %v452_v14 = vpack.c.bf16 %v290_v13, %v290_v13  ;;  %322 = vrot.lane.b32.xlu0 %v451_v12, %s484_s29 }
  0xec   : > { %321 = vst.msk [vmem:[%s207_s28 + $0xc] sm:$0xf] %vm317_vm1, %v454_v15 }
  0xed   : > { %319 = vst.msk [vmem:[%s207_s28 + $0x4] sm:$0xf] %vm317_vm1, %v452_v14 }
  0xee   : > { %328 = vrot.lane.b32.xlu1 %v454_v15, %s484_s29 }
  0xef   : > { %324 = vrot.lane.b32.xlu0 %v452_v14, %s484_s29 }
 0x15c   : > { %v327_v16 = vpop.permute.xlu1 %326 }
 0x15d   : > { %v323_v17 = vpop.permute.xlu0 %322  ;;  %336 = vst.msk [vmem:[%s213_s6 + $0x8] sm:$0xf] %vm317_vm1, %v327_v16 }
 0x15e   : > { %334 = vst.msk [vmem:[%s213_s6] sm:$0xf] %vm317_vm1, %v323_v17 }
 0x160   : > { %v329_v19 = vpop.permute.xlu1 %328 }
 0x161   : > { %v325_v18 = vpop.permute.xlu0 %324  ;;  %337 = vst.msk [vmem:[%s213_s6 + $0xc] sm:$0xf] %vm317_vm1, %v329_v19 }
 0x162   : > { %335 = vst.msk [vmem:[%s213_s6 + $0x4] sm:$0xf] %vm317_vm1, %v325_v18 }
 0x163 PF: > { %s15_s15 = sadd.s32 1, %s482_s15  }
 0x164   : > { %p12_p4 = scmp.ge.s32.totalorder %s15_s15, 4  }
 0x166   :  { %14 = sbr.rel (!%p12_p4) target bundleno = 1 (0x1), region = 74 }

// kernel: schi_stage_forward.24
= control target key start
LH: loop header
LB: loop body
LE: loop exit
PB: predicated region body
PF: predicated region fallthrough
CT: control target
= control target key end

     0   :  { %s699_s15 = smov 0   ;;  %s861_s0 = inlined_call_operand.vmem [shape: bf16[160,16], index: 0, kind: input, shape index: {}]   ;;  %s862_s1 = inlined_call_operand.vmem [shape: f32[1,16], index: 1, kind: input, shape index: {}]   ;;  %s863_s2 = inlined_call_operand.vmem [shape: f32[1,16], index: 2, kind: input, shape index: {}]   ;;  %s864_s3 = inlined_call_operand.vmem [shape: bf16[160,16], index: 3, kind: input, shape index: {}]   ;;  %s865_s4 = inlined_call_operand.vmem [shape: bf16[160,16], index: 4, kind: output, shape index: {}]  }
   0x1 LB: > { %s558_s16 = sadd.s32 4294967295, %s672_s15   ;;  %p562_p0 = scmp.ge.s32.totalorder %s672_s15, 1  ;;  %s672_s15 = sphi %s699_s15, %s14_s15  }
   0x2   : > { %p174_p1 = scmp.lt.s32.totalorder %s672_s15, 3 }
   0x4   : > { %p175_p2 = pnand %p562_p0, %p174_p1 }
   0x5   : > { %s205_s17 = smul.u32 (!%p175_p2), 10, %s558_s16  ;;  %vm243_vm0 = vcmask (!%p175_p2), 130048   ;;  %vm479_vm1 = vcmask (!%p175_p2), 125952  }
   0x6   : > { %178 = sbr.rel (%p175_p2) target bundleno = 357 (0x165), region = 36 }
   0x7   : > { %p206_p3 = scmp.lt.s32.totalorder (!%p175_p2), %s205_s17, 19 }
   0xd   : > { %s867_s17 = smov (!%p206_p3, %s205_s17), 19 }
   0xe   : > { %s707_s18 = sshll.u32 %s867_s17, 2 }
   0xf   : > { %s209_s21 = scalar_lea.vmem %s861_s0, %s707_s18  ;;  %s785_s24 = scalar_lea.vmem %s864_s3, %s707_s18 }
  0x10   : > { %v591_v0 = vld [vmem:[%s209_s21] sm:$0xff]   ;;  %v630_v3 = vld [vmem:[%s209_s21 + $0x8] sm:$0xff]   ;;  %v631_v4 = vld [vmem:[%s209_s21 + $0x10] sm:$0xff]   ;;  %s809_s5 = scalar_lea.vmem %s865_s4, %s707_s18 }
  0x11   : > { %v592_v1 = vunpack.c.l.bf16 %v591_v0  ;;  %v593_v2 = vunpack.c.h.bf16 %v591_v0  ;;  %v596_v6 = vunpack.c.l.bf16 %v630_v3  ;;  %v597_v7 = vunpack.c.h.bf16 %v630_v3  ;;  %v716_v11 = vld [vmem:[%s209_s21 + $0x18] sm:$0xff]   ;;  %v721_v16 = vld [vmem:[%s209_s21 + $0x20] sm:$0xff]  }
  0x12   : > { %v600_v10 = vunpack.c.l.bf16 %v631_v4  ;;  %v601_v13 = vunpack.c.h.bf16 %v631_v4  ;;  %v604_v15 = vunpack.c.l.bf16 %v716_v11  ;;  %v605_v18 = vunpack.c.h.bf16 %v716_v11 }
  0x13   : > { %v244_v5 = vsel %vm243_vm0, %v592_v1, 0.0  ;;  %v250_v8 = vsel %vm243_vm0, %v596_v6, 0.0  ;;  %v247_v9 = vsel %vm243_vm0, %v593_v2, 0.0  ;;  %v253_v12 = vsel %vm243_vm0, %v597_v7, 0.0 }
  0x14   : > { %245 = vadd.xlane.f32.xlu0 %v244_v5  ;;  %251 = vadd.xlane.f32.xlu1 %v250_v8  ;;  %v256_v14 = vsel %vm243_vm0, %v600_v10, 0.0  ;;  %v259_v17 = vsel %vm243_vm0, %v601_v13, 0.0  ;;  %v262_v19 = vsel %vm243_vm0, %v604_v15, 0.0  ;;  %v608_v20 = vunpack.c.l.bf16 %v721_v16 }
  0x15   : > { %v265_v21 = vsel %vm243_vm0, %v605_v18, 0.0  ;;  %v609_v22 = vunpack.c.h.bf16 %v721_v16 }
  0x16   : > { %v268_v23 = vsel %vm243_vm0, %v608_v20, 0.0 }
  0x17   : > { %v271_v24 = vsel %vm243_vm0, %v609_v22, 0.0 }
  0x18   : > { %248 = vadd.xlane.f32.xlu0 %v247_v9  ;;  %254 = vadd.xlane.f32.xlu1 %v253_v12 }
  0x1c   : > { %257 = vadd.xlane.f32.xlu0 %v256_v14  ;;  %260 = vadd.xlane.f32.xlu1 %v259_v17 }
  0x20   : > { %263 = vadd.xlane.f32.xlu0 %v262_v19  ;;  %266 = vadd.xlane.f32.xlu1 %v265_v21 }
  0x24   : > { %269 = vadd.xlane.f32.xlu0 %v268_v23  ;;  %272 = vadd.xlane.f32.xlu1 %v271_v24 }
  0xa1   : > { %v246_v25 = vpop.xlane.xlu0 %245  ;;  %v252_v27 = vpop.xlane.xlu1 %251 }
  0xa2   : > { %v275_v26 = vmul.f32 0.0625, %v246_v25  ;;  %v277_v29 = vmul.f32 0.0625, %v252_v27 }
  0xa4   : > { %v731_v28 = vsub.f32 %v592_v1, %v275_v26  ;;  %v733_v31 = vsub.f32 %v596_v6, %v277_v29 }
  0xa5   : > { %v249_v30 = vpop.xlane.xlu0 %248  ;;  %v255_v34 = vpop.xlane.xlu1 %254 }
  0xa6   : > { %v276_v32 = vmul.f32 0.0625, %v249_v30  ;;  %v295_v33 = vmul.f32 %v731_v28, %v731_v28  ;;  %v278_v36 = vmul.f32 0.0625, %v255_v34  ;;  %v297_v38 = vmul.f32 %v733_v31, %v733_v31  ;;  %v791_v34 = vld [vmem:[%s862_s1] ss:$0 sm:$0xff] }
  0xa8   : > { %v737_v35 = vsub.f32 %v593_v2, %v276_v32  ;;  %v305_v37 = vsel %vm243_vm0, %v295_v33, 0.0  ;;  %v742_v40 = vsub.f32 %v597_v7, %v278_v36  ;;  %v311_v42 = vsel %vm243_vm0, %v297_v38, 0.0  ;;  %v611_v32 = vld [vmem:[%s785_s24] sm:$0xff]  }
  0xa9   : > { %306 = vadd.xlane.f32.xlu0 %v305_v37  ;;  %v258_v39 = vpop.xlane.xlu0 %257  ;;  %v261_v44 = vpop.xlane.xlu1 %260 }
  0xaa   : > { %v279_v41 = vmul.f32 0.0625, %v258_v39  ;;  %v296_v43 = vmul.f32 %v737_v35, %v737_v35  ;;  %v280_v46 = vmul.f32 0.0625, %v261_v44  ;;  %v298_v48 = vmul.f32 %v742_v40, %v742_v40 }
  0xac   : > { %v747_v45 = vsub.f32 %v600_v10, %v279_v41  ;;  %v308_v47 = vsel %vm243_vm0, %v296_v43, 0.0  ;;  %v752_v50 = vsub.f32 %v601_v13, %v280_v46  ;;  %v314_v52 = vsel %vm243_vm0, %v298_v48, 0.0 }
  0xad   : > { %312 = vadd.xlane.f32.xlu0 %v311_v42  ;;  %309 = vadd.xlane.f32.xlu1 %v308_v47  ;;  %v264_v49 = vpop.xlane.xlu0 %263  ;;  %v267_v54 = vpop.xlane.xlu1 %266  ;;  %v797_v42 = vld [vmem:[%s863_s2] ss:$0 sm:$0xff]  ;;  %v612_v46 = vunpack.c.l.bf16 %v611_v32 }
  0xae   : > { %v281_v51 = vmul.f32 0.0625, %v264_v49  ;;  %v299_v53 = vmul.f32 %v747_v45, %v747_v45  ;;  %v282_v56 = vmul.f32 0.0625, %v267_v54  ;;  %v300_v58 = vmul.f32 %v752_v50, %v752_v50 }
  0xb0   : > { %v757_v55 = vsub.f32 %v604_v15, %v281_v51  ;;  %v317_v57 = vsel %vm243_vm0, %v299_v53, 0.0  ;;  %v762_v60 = vsub.f32 %v605_v18, %v282_v56  ;;  %v320_v62 = vsel %vm243_vm0, %v300_v58, 0.0 }
  0xb1   : > { %315 = vadd.xlane.f32.xlu1 %v314_v52  ;;  %318 = vadd.xlane.f32.xlu0 %v317_v57  ;;  %v270_v59 = vpop.xlane.xlu0 %269  ;;  %v273_v0 = vpop.xlane.xlu1 %272 }
  0xb2   : > { %v283_v61 = vmul.f32 0.0625, %v270_v59  ;;  %v301_v63 = vmul.f32 %v757_v55, %v757_v55  ;;  %v284_v2 = vmul.f32 0.0625, %v273_v0  ;;  %v302_v4 = vmul.f32 %v762_v60, %v762_v60 }
  0xb4   : > { %v767_v1 = vsub.f32 %v608_v20, %v283_v61  ;;  %v323_v3 = vsel %vm243_vm0, %v301_v63, 0.0  ;;  %v772_v5 = vsub.f32 %v609_v22, %v284_v2  ;;  %v326_v6 = vsel %vm243_vm0, %v302_v4, 0.0 }
  0xb5   : > { %321 = vadd.xlane.f32.xlu1 %v320_v62  ;;  %324 = vadd.xlane.f32.xlu0 %v323_v3  ;;  %v613_v61 = vunpack.c.h.bf16 %v611_v32  ;;  %v635_v3 = vld [vmem:[%s785_s24 + $0x10] sm:$0xff]   ;;  %v637_v32 = vld [vmem:[%s785_s24 + $0x20] sm:$0xff]  }
  0xb6   : > { %v303_v7 = vmul.f32 %v767_v1, %v767_v1  ;;  %v304_v9 = vmul.f32 %v772_v5, %v772_v5 }
  0xb8   : > { %v329_v8 = vsel %vm243_vm0, %v303_v7, 0.0  ;;  %v332_v10 = vsel %vm243_vm0, %v304_v9, 0.0 }
  0xb9   : > { %327 = vadd.xlane.f32.xlu1 %v326_v6  ;;  %330 = vadd.xlane.f32.xlu0 %v329_v8 }
  0xbd   : > { %333 = vadd.xlane.f32.xlu1 %v332_v10 }
 0x136   : > { %v307_v11 = vpop.xlane.xlu0 %306 }
 0x137   : > { %v335_v12 = vmul.f32 0.0625, %v307_v11 }
 0x139   : > { %v345_v13 = vadd.f32 1e-05, %v335_v12 }
 0x13a   : > { %v310_v14 = vpop.xlane.xlu1 %309  ;;  %v313_v15 = vpop.xlane.xlu0 %312 }
 0x13b   : > { %646 = vrsqrt.f32 %v345_v13  ;;  %v336_v16 = vmul.f32 0.0625, %v310_v14  ;;  %v337_v17 = vmul.f32 0.0625, %v313_v15  ;;  %v620_v15 = vunpack.c.l.bf16 %v635_v3 }
 0x13d   : > { %v346_v18 = vadd.f32 1e-05, %v336_v16  ;;  %v347_v19 = vadd.f32 1e-05, %v337_v17 }
 0x13e   : > { %v316_v20 = vpop.xlane.xlu1 %315  ;;  %v319_v21 = vpop.xlane.xlu0 %318 }
 0x13f   : > { %648 = vrsqrt.f32 %v346_v18  ;;  %v338_v22 = vmul.f32 0.0625, %v316_v20  ;;  %v339_v23 = vmul.f32 0.0625, %v319_v21 }
 0x140   : > { %650 = vrsqrt.f32 %v347_v19 }
 0x141   : > { %v348_v24 = vadd.f32 1e-05, %v338_v22  ;;  %v349_v25 = vadd.f32 1e-05, %v339_v23 }
 0x142   : > { %v322_v26 = vpop.xlane.xlu1 %321  ;;  %v325_v27 = vpop.xlane.xlu0 %324 }
 0x143   : > { %652 = vrsqrt.f32 %v348_v24  ;;  %v340_v29 = vmul.f32 0.0625, %v322_v26  ;;  %v341_v30 = vmul.f32 0.0625, %v325_v27  ;;  %v621_v24 = vunpack.c.h.bf16 %v635_v3 }
 0x144   : > { %654 = vrsqrt.f32 %v349_v25 }
 0x145   : > { %v647_v33 = vpop.eup %646  ;;  %v350_v36 = vadd.f32 1e-05, %v340_v29  ;;  %v351_v37 = vadd.f32 1e-05, %v341_v30 }
 0x146   : > { %v365_v38 = vmul.f32 %v647_v33, %v731_v28  ;;  %v328_v39 = vpop.xlane.xlu1 %327  ;;  %v331_v41 = vpop.xlane.xlu0 %330  ;;  %v634_v28 = vld [vmem:[%s785_s24 + $0x8] sm:$0xff]  }
 0x147   : > { %656 = vrsqrt.f32 %v350_v36  ;;  %v342_v43 = vmul.f32 0.0625, %v328_v39  ;;  %v343_v44 = vmul.f32 0.0625, %v331_v41  ;;  %v617_v11 = vunpack.c.h.bf16 %v634_v28 }
 0x148   : > { %v382_v47 = vmul.f32 %v791_v34, %v365_v38  ;;  %658 = vrsqrt.f32 %v351_v37 }
 0x149   : > { %v649_v48 = vpop.eup %648  ;;  %v352_v49 = vadd.f32 1e-05, %v342_v43  ;;  %v353_v51 = vadd.f32 1e-05, %v343_v44 }
 0x14a   : > { %v651_v52 = vpop.eup %650  ;;  %v399_v53 = vadd.f32 %v797_v42, %v382_v47  ;;  %v366_v54 = vmul.f32 %v649_v48, %v737_v35  ;;  %v334_v56 = vpop.xlane.xlu1 %333  ;;  %v616_v35 = vunpack.c.l.bf16 %v634_v28  ;;  %v628_v48 = vunpack.c.l.bf16 %v637_v32 }
 0x14b   : > { %v367_v57 = vmul.f32 %v651_v52, %v733_v31  ;;  %660 = vrsqrt.f32 %v352_v49  ;;  %v344_v58 = vmul.f32 0.0625, %v334_v56 }
 0x14c   : > { %v429_v59 = vadd.f32 %v612_v46, %v399_v53  ;;  %v383_v62 = vmul.f32 %v791_v34, %v366_v54  ;;  %662 = vrsqrt.f32 %v353_v51  ;;  %v629_v54 = vunpack.c.h.bf16 %v637_v32 }
 0x14d   : > { %v653_v63 = vpop.eup %652  ;;  %v384_v0 = vmul.f32 %v791_v34, %v367_v57  ;;  %v354_v2 = vadd.f32 1e-05, %v344_v58 }
 0x14e   : > { %v655_v31 = vpop.eup %654  ;;  %v580_v4 = vpack.c.bf16 %v429_v59, %v429_v59  ;;  %v400_v6 = vadd.f32 %v797_v42, %v383_v62  ;;  %v368_v7 = vmul.f32 %v653_v63, %v742_v40  ;;  %v636_v40 = vld [vmem:[%s785_s24 + $0x18] sm:$0xff]  }
 0x14f   : > { %v401_v8 = vadd.f32 %v797_v42, %v384_v0  ;;  %v369_v9 = vmul.f32 %v655_v31, %v747_v45  ;;  %664 = vrsqrt.f32 %v354_v2  ;;  %v624_v29 = vunpack.c.l.bf16 %v636_v40 }
 0x150   : > { %480 = vst.msk [vmem:[%s809_s5] sm:$0xf] %vm479_vm1, %v580_v4  ;;  %v430_v10 = vadd.f32 %v613_v61, %v400_v6  ;;  %v385_v12 = vmul.f32 %v791_v34, %v368_v7  ;;  %v625_v43 = vunpack.c.h.bf16 %v636_v40 }
 0x151   : > { %v657_v13 = vpop.eup %656  ;;  %v431_v14 = vadd.f32 %v616_v35, %v401_v8  ;;  %v386_v16 = vmul.f32 %v791_v34, %v369_v9 }
 0x152   : > { %v659_v17 = vpop.eup %658  ;;  %v581_v18 = vpack.c.bf16 %v430_v10, %v430_v10  ;;  %v402_v45 = vadd.f32 %v797_v42, %v385_v12  ;;  %v370_v19 = vmul.f32 %v657_v13, %v752_v50 }
 0x153   : > { %v582_v20 = vpack.c.bf16 %v431_v14, %v431_v14  ;;  %v403_v21 = vadd.f32 %v797_v42, %v386_v16  ;;  %v371_v22 = vmul.f32 %v659_v17, %v757_v55 }
 0x154   : > { %481 = vst.msk [vmem:[%s809_s5 + $0x4] sm:$0xf] %vm479_vm1, %v581_v18  ;;  %v432_v23 = vadd.f32 %v617_v11, %v402_v45  ;;  %v387_v25 = vmul.f32 %v791_v34, %v370_v19 }
 0x155   : > { %v661_v26 = vpop.eup %660  ;;  %482 = vst.msk [vmem:[%s809_s5 + $0x8] sm:$0xf] %vm479_vm1, %v582_v20  ;;  %v433_v27 = vadd.f32 %v620_v15, %v403_v21  ;;  %v388_v50 = vmul.f32 %v791_v34, %v371_v22 }
 0x156   : > { %v663_v30 = vpop.eup %662  ;;  %v583_v33 = vpack.c.bf16 %v432_v23, %v432_v23  ;;  %v404_v55 = vadd.f32 %v797_v42, %v387_v25  ;;  %v372_v36 = vmul.f32 %v661_v26, %v762_v60 }
 0x157   : > { %v584_v37 = vpack.c.bf16 %v433_v27, %v433_v27  ;;  %v405_v38 = vadd.f32 %v797_v42, %v388_v50  ;;  %v373_v39 = vmul.f32 %v663_v30, %v767_v1 }
 0x158   : > { %483 = vst.msk [vmem:[%s809_s5 + $0xc] sm:$0xf] %vm479_vm1, %v583_v33  ;;  %v434_v41 = vadd.f32 %v621_v24, %v404_v55  ;;  %v389_v44 = vmul.f32 %v791_v34, %v372_v36 }
 0x159   : > { %v665_v46 = vpop.eup %664  ;;  %484 = vst.msk [vmem:[%s809_s5 + $0x10] sm:$0xf] %vm479_vm1, %v584_v37  ;;  %v435_v47 = vadd.f32 %v624_v29, %v405_v38  ;;  %v390_v60 = vmul.f32 %v791_v34, %v373_v39 }
 0x15a   : > { %v585_v49 = vpack.c.bf16 %v434_v41, %v434_v41  ;;  %v406_v51 = vadd.f32 %v797_v42, %v389_v44  ;;  %v374_v1 = vmul.f32 %v665_v46, %v772_v5 }
 0x15b   : > { %v586_v52 = vpack.c.bf16 %v435_v47, %v435_v47  ;;  %v407_v28 = vadd.f32 %v797_v42, %v390_v60 }
 0x15c   : > { %485 = vst.msk [vmem:[%s809_s5 + $0x14] sm:$0xf] %vm479_vm1, %v585_v49  ;;  %v436_v53 = vadd.f32 %v625_v43, %v406_v51  ;;  %v391_v56 = vmul.f32 %v791_v34, %v374_v1 }
 0x15d   : > { %486 = vst.msk [vmem:[%s809_s5 + $0x18] sm:$0xf] %vm479_vm1, %v586_v52  ;;  %v437_v57 = vadd.f32 %v628_v48, %v407_v28 }
 0x15e   : > { %v587_v58 = vpack.c.bf16 %v436_v53, %v436_v53  ;;  %v408_v59 = vadd.f32 %v797_v42, %v391_v56 }
 0x15f   : > { %v588_v61 = vpack.c.bf16 %v437_v57, %v437_v57 }
 0x160   : > { %487 = vst.msk [vmem:[%s809_s5 + $0x1c] sm:$0xf] %vm479_vm1, %v587_v58  ;;  %v438_v5 = vadd.f32 %v629_v54, %v408_v59 }
 0x161   : > { %488 = vst.msk [vmem:[%s809_s5 + $0x20] sm:$0xf] %vm479_vm1, %v588_v61 }
 0x162   : > { %v589_v62 = vpack.c.bf16 %v438_v5, %v438_v5 }
 0x164   : > { %489 = vst.msk [vmem:[%s809_s5 + $0x24] sm:$0xf] %vm479_vm1, %v589_v62 }
 0x165 PF: > { %s14_s15 = sadd.s32 1, %s672_s15  }
 0x166   : > { %p11_p4 = scmp.ge.s32.totalorder %s14_s15, 4  }
 0x168   :  { %13 = sbr.rel (!%p11_p4) target bundleno = 1 (0x1), region = 69 }

// kernel: schi_stage_forward.23
= control target key start
LH: loop header
LB: loop body
LE: loop exit
PB: predicated region body
PF: predicated region fallthrough
CT: control target
= control target key end

     0   :  { %s1164_s12 = smov 0   ;;  %s1166_s13 = smov 0   ;;  %s1293_s0 = inlined_call_operand.vmem [shape: bf16[2,4,20,16], index: 0, kind: input, shape index: {}]   ;;  %s1294_s1 = inlined_call_operand.vmem [shape: bf16[2,4,8,16], index: 1, kind: input, shape index: {}]   ;;  %s1295_s2 = inlined_call_operand.vmem [shape: bf16[2,4,8,16], index: 2, kind: input, shape index: {}]   ;;  %s1296_s3 = inlined_call_operand.vmem [shape: bf16[2,4,20,16], index: 3, kind: output, shape index: {}]  }
   0x1   :  { %s1168_s14 = smov 0   ;;  %s1170_s15 = smov 0  }
   0x2   :  { %s1172_s16 = smov 0  }
   0x3 LB: > { %s25_s17 = sadd.s32 1, %s1131_s14  ;;  %s32_s18 = sadd.s32 1, %s1135_s15  ;;  %s1139_s16 = sphi %s1172_s16, %s13_s16   ;;  %s1135_s15 = sphi %s1170_s15, %s1300_s15   ;;  %s1131_s14 = sphi %s1168_s14, %s1299_s14   ;;  %s1127_s13 = sphi %s1166_s13, %s1298_s13   ;;  %s1123_s12 = sphi %s1164_s12, %s1297_s12  }
   0x4   : > { %p26_p0 = scmp.ge.s32.totalorder %s25_s17, 4  ;;  %p921_p1 = scmp.ge.s32.totalorder %s1139_s16, 1 }
   0x5   : > { %p200_p2 = scmp.lt.s32.totalorder %s1139_s16, 9 }
   0x6   : > { %s1302_s17 = smov (%p26_p0, %s25_s17), 0  ;;  %s1304_s18 = smov (!%p26_p0, %s32_s18), %s1135_s15 }
   0x7   : > { %p201_p3 = pnand %p921_p1, %p200_p2  ;;  %p34_p4 = scmp.ge.s32.totalorder %s1304_s18, 2 }
   0x8   : > { %p253_p5 = scmp.lt.s32.totalorder (!%p201_p3), %s1127_s13, 1  ;;  %p271_p6 = scmp.lt.s32.totalorder (!%p201_p3), %s1123_s12, 3 }
   0x9   : > { %s1306_s18 = smov (%p34_p4, %s1304_s18), 0  ;;  %204 = sbr.rel (%p201_p3) target bundleno = 1152 (0x480), region = 32 }
   0xa   : > { %p928_p7 = scmp.ne.s32.totalorder (!%p201_p3), %s1123_s12, 0 }
  0x10   : > { %s1308_s13 = smov (!%p253_p5, %s1127_s13), 1  ;;  %vm321_vm0 = vcmask (!%p928_p7), 130048   ;;  %vm336_vm1 = vcmask (!%p928_p7), 125952   ;;  %vm370_vm2 = vcmask (!%p928_p7), 64512   ;;  %vm434_vm3 = vcmask (!%p928_p7), 60416  }
  0x11   : > { %s272_s19 = scalar_select %p271_p6, %s1123_s12, 3 }
  0x12   : > { %s1021_s20 = smul.u32 48, %s1308_s13  ;;  %s953_s21 = sshll.u32 %s1308_s13, 4  ;;  %vm477_vm4 = vcmask (!%p928_p7), 58368  }
  0x13   : > { %s268_s24 = scalar_lea.vmem %s1294_s1, %s953_s21  ;;  %s925_s25 = sshll.u32 %s1308_s13, 2 }
  0x14   : > { %s1204_s28 = scalar_lea.vmem %s1293_s0, %s1021_s20  ;;  %s277_s29 = sadd.s32 %s925_s25, %s272_s19  ;;  %v972_v0 = vld [vmem:[%s268_s24] sm:$0xff] (!%p928_p7)   ;;  %v980_v1 = vld [vmem:[%s268_s24 + $0x8] sm:$0xff] (!%p928_p7)  }
  0x15   : > { %s926_s30 = sshll.u32 %s277_s29, 2  ;;  %s1022_s4 = smul.u32 3, %s272_s19  ;;  %v964_v2 = vld [vmem:[%s1204_s28] sm:$0xff] (!%p928_p7)   ;;  %v973_v3 = vunpack.c.l.bf16 (!%p928_p7), %v972_v0  ;;  %v974_v4 = vunpack.c.h.bf16 (!%p928_p7), %v972_v0  ;;  %v977_v5 = vunpack.c.l.bf16 (!%p928_p7), %v980_v1  ;;  %v978_v6 = vunpack.c.h.bf16 (!%p928_p7), %v980_v1  ;;  %v300_v7 = vld [vmem:[%s1204_s28 + $0xc] sm:$0xff] (!%p928_p7)   ;;  %v979_v8 = vld [vmem:[%s1204_s28 + $0x18] sm:$0xff] (!%p928_p7)  }
  0x16   : > { %s1209_s7 = scalar_lea.vmem %s1295_s2, %s926_s30  ;;  %s1023_s8 = smul.u32 12, %s1308_s13  ;;  %v306_v9 = vld [vmem:[%s1204_s28 + $0x24] sm:$0xff] (!%p928_p7)   ;;  %v965_v10 = vunpack.c.l.bf16 (!%p928_p7), %v964_v2  ;;  %v966_v11 = vunpack.c.h.bf16 (!%p928_p7), %v964_v2  ;;  %v969_v12 = vunpack.c.l.bf16 (!%p928_p7), %v979_v8  ;;  %v970_v13 = vunpack.c.h.bf16 (!%p928_p7), %v979_v8  ;;  %v302_v23 = vld [vmem:[%s1204_s28 + $0x14] sm:$0x3] (!%p928_p7)  ;;  %v305_v28 = vld [vmem:[%s1204_s28 + $0x20] sm:$0x3] (!%p928_p7) }
  0x17   : > { %296 = sbr.rel (%p928_p7) target bundleno = 692 (0x2b4), region = 36  ;;  %v356_v14 = vsel (!%p928_p7), %vm321_vm0, %v973_v3, 0.0  ;;  %v357_v15 = vsel (!%p928_p7), %vm321_vm0, %v974_v4, 0.0  ;;  %v359_v16 = vsel (!%p928_p7), %vm321_vm0, %v977_v5, 0.0  ;;  %v361_v17 = vsel (!%p928_p7), %vm321_vm0, %v978_v6, 0.0  ;;  %s1141_s12 = smov (!%p928_p7), 120  }
  0x18   : > { %s289_s9 = sadd.s32 %s1023_s8, %s1022_s4  ;;  %v358_v18 = vadd.f32 (!%p928_p7), %v357_v15, %v356_v14  ;;  %v312_v19 = vunpack.c.l.bf16 (!%p928_p7), %v300_v7  ;;  %v313_v20 = vunpack.c.h.bf16 (!%p928_p7), %v300_v7  ;;  %v318_v21 = vunpack.c.l.bf16 (!%p928_p7), %v306_v9  ;;  %v299_v22 = vld [vmem:[%s1204_s28 + $0x8] sm:$0x3] (!%p928_p7)  ;;  %v308_v33 = vld [vmem:[%s1204_s28 + $0x2c] sm:$0x3] (!%p928_p7) }
  0x19   : > { %s927_s10 = sshll.u32 %s289_s9, 2  ;;  %v319_v24 = vunpack.c.h.bf16 (!%p928_p7), %v306_v9  ;;  %v322_v25 = vsel (!%p928_p7), %vm321_vm0, %v965_v10, 0.0  ;;  %v325_v26 = vsel (!%p928_p7), %vm321_vm0, %v969_v12, 0.0  ;;  %v329_v27 = vsel (!%p928_p7), %vm321_vm0, %v966_v11, 0.0 }
  0x1a   : > { %s1214_s21 = scalar_lea.vmem %s1296_s3, %s927_s10  ;;  %v360_v29 = vadd.f32 (!%p928_p7), %v359_v16, %v358_v18  ;;  %v323_v30 = vsel (!%p928_p7), %vm321_vm0, %v312_v19, 0.0  ;;  %v327_v31 = vsel (!%p928_p7), %vm321_vm0, %v318_v21, 0.0  ;;  %v330_v32 = vsel (!%p928_p7), %vm321_vm0, %v313_v20, 0.0 }
  0x1b   : > { %v324_v34 = vadd.f32 (!%p928_p7), %v323_v30, %v322_v25  ;;  %v331_v35 = vadd.f32 (!%p928_p7), %v330_v32, %v329_v27  ;;  %v332_v36 = vsel (!%p928_p7), %vm321_vm0, %v970_v13, 0.0  ;;  %v334_v37 = vsel (!%p928_p7), %vm321_vm0, %v319_v24, 0.0 }
  0x1c   : > { %v362_v38 = vadd.f32 (!%p928_p7), %v361_v17, %v360_v29  ;;  %v311_v39 = vunpack.c.l.bf16 (!%p928_p7), %v299_v22  ;;  %v314_v40 = vunpack.c.l.bf16 (!%p928_p7), %v302_v23  ;;  %v317_v41 = vunpack.c.l.bf16 (!%p928_p7), %v305_v28 }
  0x1d   : > { %v326_v42 = vadd.f32 (!%p928_p7), %v325_v26, %v324_v34  ;;  %v333_v43 = vadd.f32 (!%p928_p7), %v332_v36, %v331_v35  ;;  %v320_v44 = vunpack.c.l.bf16 (!%p928_p7), %v308_v33 }
  0x1e   : > { %v363_v45 = vmul.f32 0.25, %v362_v38  ;;  %v337_v46 = vsel %vm336_vm1, %v311_v39, 0.0  ;;  %v338_v47 = vsel %vm336_vm1, %v314_v40, 0.0  ;;  %v340_v48 = vsel %vm336_vm1, %v317_v41, 0.0 }
  0x1f   : > { %v328_v49 = vadd.f32 %v327_v31, %v326_v42  ;;  %v335_v50 = vadd.f32 %v334_v37, %v333_v43  ;;  %v339_v51 = vadd.f32 %v338_v47, %v337_v46  ;;  %v342_v53 = vsel %vm336_vm1, %v320_v44, 0.0 }
  0x20   : > { %v369_v52 = vpack.c.bf16 %v363_v45, %v363_v45 }
  0x21   : > { %v345_v54 = vmul.f32 0.25, %v328_v49  ;;  %v346_v55 = vmul.f32 0.25, %v335_v50  ;;  %v341_v56 = vadd.f32 %v340_v48, %v339_v51 }
  0x22   : > { %486 = vrot.lane.b32.xlu0 %v369_v52, %s1141_s12  ;;  %1017 = vmatprep.subr.msk.bf16.mxu0 %vm370_vm2, %v369_v52  ;;  %v378_v57 = vsel %vm370_vm2, %v369_v52, 0 }
  0x23   : > { %994 = vmatpush3.bf16.xpose.msra.mxu0 %v378_v57  ;;  %v364_v58 = vmul.f32 0.35355338, %v345_v54  ;;  %v365_v59 = vmul.f32 0.35355338, %v346_v55  ;;  %v343_v60 = vadd.f32 %v342_v53, %v341_v56 }
  0x25   : > { %v367_v61 = vpack.c.bf16 %v365_v59, %v364_v58  ;;  %v347_v62 = vmul.f32 0.25, %v343_v60 }
  0x27   : > { %481 = vrot.lane.b32.xlu0 %v367_v61, %s1141_s12  ;;  %995 = vmatprep.mubr.msk.bf16.mxu0 %vm370_vm2, %v367_v61  ;;  %v366_v63 = vmul.f32 0.35355338, %v347_v62 }
  0x29   : > { %v368_v0 = vpack.c.bf16 %v366_v63, %v366_v63 }
  0x2b   : > { %483 = vrot.lane.b32.xlu1 %v368_v0, %s1141_s12  ;;  %996 = vmatmul.mubr.msk.bf16.vlgmr.msra.gmra.mrb[0].mxu0 %vm370_vm2, %v368_v0 }
  0x94   : > { %v487_v1 = vpop.permute.xlu0 %486 }
  0x95   : > { %1018 = vmatprep.subr.msk.bf16.mxu1 %vm370_vm2, %v487_v1  ;;  %v495_v2 = vsel %vm370_vm2, %v487_v1, 0 }
  0x96   : > { %1000 = vmatpush3.bf16.xpose.msra.mxu1 %v495_v2 }
  0x99   : > { %v482_v3 = vpop.permute.xlu0 %481 }
  0x9a   : > { %1001 = vmatprep.mubr.msk.bf16.mxu1 %vm370_vm2, %v482_v3 }
  0x9d   : > { %v484_v4 = vpop.permute.xlu1 %483 }
  0x9e   : > { %1002 = vmatmul.mubr.msk.bf16.vlgmr.msra.gmra.mrb[0].mxu1 %vm370_vm2, %v484_v4 }
  0xfe   : > { %v997_v5 = vpop.f32.mrb[0].mxu0 }
  0xff   : > { %v414_v6 = vpop.f32.mrb[1].mxu0  ;;  %v435_v7 = vsel %vm434_vm3, %v997_v5, -inf }
 0x100   : > { %436 = vmax.xlane.f32.xlu0 %v435_v7  ;;  %v428_v8 = vsel %vm370_vm2, %v414_v6, -inf  ;;  %v998_v9 = vpop.f32.mrb[2].mxu0 }
 0x101   : > { %429 = vmax.xlane.f32.xlu1 %v428_v8  ;;  %v417_v10 = vpop.f32.mrb[3].mxu0 }
 0x102   : > { %v431_v11 = vsel %vm370_vm2, %v417_v10, -inf }
 0x104   : > { %432 = vmax.xlane.f32.xlu0 %v431_v11 }
 0x171   : > { %v1003_v12 = vpop.f32.mrb[0].mxu1 }
 0x172   : > { %v531_v13 = vpop.f32.mrb[1].mxu1  ;;  %v551_v18 = vsel %vm434_vm3, %v1003_v12, -inf }
 0x173   : > { %v1004_v14 = vpop.f32.mrb[2].mxu1  ;;  %v545_v15 = vsel %vm370_vm2, %v531_v13, -inf }
 0x174   : > { %v534_v16 = vpop.f32.mrb[3].mxu1  ;;  %546 = vmax.xlane.f32.xlu1 %v545_v15 }
 0x175   : > { %v548_v17 = vsel %vm370_vm2, %v534_v16, -inf }
 0x176   : > { %549 = vmax.xlane.f32.xlu0 %v548_v17 }
 0x178   : > { %552 = vmax.xlane.f32.xlu1 %v551_v18 }
 0x18d   : > { %v437_v19 = vpop.xlane.xlu0 %436 }
 0x18e   : > { %v440_v20 = vsub.f32 %v997_v5, %v437_v19  ;;  %v430_v21 = vpop.xlane.xlu1 %429 }
 0x18f   : > { %v438_v22 = vsub.f32 %v414_v6, %v430_v21 }
 0x190   : > { %v445_v23 = vmul.f32 1.442695, %v440_v20 }
 0x191   : > { %v441_v24 = vmul.f32 1.442695, %v438_v22  ;;  %v433_v25 = vpop.xlane.xlu0 %432 }
 0x192   : > { %1067 = vpow2.f32 %v445_v23  ;;  %v439_v26 = vsub.f32 %v417_v10, %v433_v25 }
 0x193   : > { %1069 = vpow2.f32 %v441_v24 }
 0x194   : > { %v443_v27 = vmul.f32 1.442695, %v439_v26 }
 0x196   : > { %1071 = vpow2.f32 %v443_v27 }
 0x19c   : > { %v1068_v28 = vpop.eup %1067 }
 0x19d   : > { %v453_v29 = vsel %vm434_vm3, %v1068_v28, 0.0  ;;  %v1070_v30 = vpop.eup %1069 }
 0x19e   : > { %454 = vadd.xlane.f32.xlu0 %v453_v29  ;;  %v447_v32 = vsel %vm370_vm2, %v1070_v30, 0.0 }
 0x1a0   : > { %v1072_v31 = vpop.eup %1071 }
 0x1a1   : > { %v450_v33 = vsel %vm370_vm2, %v1072_v31, 0.0 }
 0x1a2   : > { %448 = vadd.xlane.f32.xlu0 %v447_v32  ;;  %451 = vadd.xlane.f32.xlu1 %v450_v33 }
 0x201   : > { %v547_v34 = vpop.xlane.xlu1 %546 }
 0x202   : > { %v554_v35 = vsub.f32 %v531_v13, %v547_v34 }
 0x203   : > { %v550_v36 = vpop.xlane.xlu0 %549 }
 0x204   : > { %v557_v37 = vmul.f32 1.442695, %v554_v35  ;;  %v555_v38 = vsub.f32 %v534_v16, %v550_v36 }
 0x205   : > { %v553_v39 = vpop.xlane.xlu1 %552 }
 0x206   : > { %1073 = vpow2.f32 %v557_v37  ;;  %v559_v40 = vmul.f32 1.442695, %v555_v38  ;;  %v556_v41 = vsub.f32 %v1003_v12, %v553_v39 }
 0x208   : > { %1075 = vpow2.f32 %v559_v40  ;;  %v561_v42 = vmul.f32 1.442695, %v556_v41 }
 0x20a   : > { %1077 = vpow2.f32 %v561_v42 }
 0x210   : > { %v1074_v43 = vpop.eup %1073 }
 0x211   : > { %v563_v44 = vsel %vm370_vm2, %v1074_v43, 0.0 }
 0x212   : > { %v1076_v45 = vpop.eup %1075  ;;  %564 = vadd.xlane.f32.xlu1 %v563_v44 }
 0x213   : > { %v566_v46 = vsel %vm370_vm2, %v1076_v45, 0.0 }
 0x214   : > { %v1078_v47 = vpop.eup %1077  ;;  %567 = vadd.xlane.f32.xlu0 %v566_v46 }
 0x215   : > { %v569_v48 = vsel %vm434_vm3, %v1078_v47, 0.0 }
 0x216   : > { %570 = vadd.xlane.f32.xlu1 %v569_v48 }
 0x22b   : > { %v455_v49 = vpop.xlane.xlu0 %454 }
 0x22c   : > { %1079 = vrcp.f32 %v455_v49 }
 0x22f   : > { %v452_v50 = vpop.xlane.xlu1 %451  ;;  %v449_v51 = vpop.xlane.xlu0 %448 }
 0x230   : > { %1081 = vrcp.f32 %v452_v50 }
 0x231   : > { %1083 = vrcp.f32 %v449_v51 }
 0x236   : > { %v1080_v52 = vpop.eup %1079 }
 0x237   : > { %v461_v53 = vmul.f32 %v1080_v52, %v1068_v28 }
 0x239   : > { %v956_v54 = vpack.c.bf16 %v461_v53, %v461_v53 }
 0x23a   : > { %v1082_v55 = vpop.eup %1081 }
 0x23b   : > { %v1084_v56 = vpop.eup %1083  ;;  %478 = vst.msk [vmem:[#allocation2 + $0x8] sm:$0x3] %vm477_vm4, %v956_v54  ;;  %v460_v57 = vmul.f32 %v1082_v55, %v1072_v31 }
 0x23c   : > { %v459_v58 = vmul.f32 %v1084_v56, %v1070_v30 }
 0x23d   : > { %v955_v59 = vpack.c.bf16 %v460_v57, %v460_v57 }
 0x23e   : > { %v954_v60 = vpack.c.bf16 %v459_v58, %v459_v58 }
 0x23f   : > { %476 = vst.msk [vmem:[#allocation2 + $0x4] sm:$0xf] %vm434_vm3, %v955_v59 }
 0x240   : > { %475 = vst.msk [vmem:[#allocation2] sm:$0xf] %vm434_vm3, %v954_v60 }
 0x29f   : > { %v565_v61 = vpop.xlane.xlu1 %564 }
 0x2a0   : > { %1085 = vrcp.f32 %v565_v61 }
 0x2a1   : > { %v568_v62 = vpop.xlane.xlu0 %567 }
 0x2a2   : > { %1087 = vrcp.f32 %v568_v62 }
 0x2a3   : > { %v571_v63 = vpop.xlane.xlu1 %570 }
 0x2a4   : > { %1089 = vrcp.f32 %v571_v63 }
 0x2aa   : > { %v1086_v0 = vpop.eup %1085 }
 0x2ab   : > { %v575_v1 = vmul.f32 %v1086_v0, %v1074_v43 }
 0x2ac   : > { %v1088_v2 = vpop.eup %1087 }
 0x2ad   : > { %v957_v3 = vpack.c.bf16 %v575_v1, %v575_v1  ;;  %v576_v4 = vmul.f32 %v1088_v2, %v1076_v45 }
 0x2ae   : > { %v1090_v5 = vpop.eup %1089 }
 0x2af   : > { %592 = vst.msk [vmem:[#allocation2 + $0xc] sm:$0xf] %vm434_vm3, %v957_v3  ;;  %v958_v6 = vpack.c.bf16 %v576_v4, %v576_v4  ;;  %v577_v7 = vmul.f32 %v1090_v5, %v1078_v47 }
 0x2b1   : > { %593 = vst.msk [vmem:[#allocation2 + $0x10] sm:$0xf] %vm434_vm3, %v958_v6  ;;  %v959_v8 = vpack.c.bf16 %v577_v7, %v577_v7 }
 0x2b3   : > { %594 = vst.msk [vmem:[#allocation2 + $0x14] sm:$0x3] %vm477_vm4, %v959_v8 }
 0x2b4 PF: > { %v595_v9 = vld [vmem:[%s1209_s7] sm:$0xf]  ;;  %vm614_vm5 = vcmask 1043456   ;;  %vm607_vm6 = vcmask 64512   ;;  %s1142_s13 = smov 120   ;;  %s1143_s19 = smov 8  }
 0x2b5   : > { %v945_v11 = vcombine.low %v595_v9, %v595_v9  ;;  %1019 = vmatprep.subr.msk.bf16.mxu0 %vm614_vm5, %v595_v9  ;;  %v616_v12 = vsel %vm614_vm5, %v595_v9, 0  ;;  %v1099_v13 = vld [vmem:[#allocation2] sm:$0xff]   ;;  %v1100_v14 = vld [vmem:[#allocation2 + $0x8] ss:$0 sps:$4 sm:$0x33]   ;;  %vm771_vm7 = vcmask 123904  }
 0x2b6   : > { %1006 = vmatpush3.bf16.msra.mxu0 %v616_v12  ;;  %1007 = vmatprep.mubr.msk.bf16.mxu0 %vm607_vm6, %v1099_v13  ;;  %vm768_vm8 = vcmask 125952  }
 0x2b7   : > { %681 = vrot.lane.b32.xlu0 %v945_v11, %s1142_s13 }
 0x2b8   : > { %v1097_v10 = vld [vmem:[#allocation2 + $0xc] sm:$0xff]  }
 0x2b9   : > { %1013 = vmatprep.mubr.msk.bf16.mxu1 %vm607_vm6, %v1097_v10  ;;  %1008 = vmatmul.mubr.msk.bf16.vlgmr.msra.gmra.mrb[0].mxu0 %vm607_vm6, %v1100_v14 }
 0x2ba   : > { %v1098_v17 = vld [vmem:[#allocation2 + $0x14] ss:$0 sps:$4 sm:$0x33]  }
 0x329   : > { %v682_v15 = vpop.permute.xlu0 %681 }
 0x32a   : > { %1020 = vmatprep.subr.msk.bf16.mxu1 %vm614_vm5, %v682_v15  ;;  %v690_v16 = vsel %vm614_vm5, %v682_v15, 0 }
 0x32b   : > { %1012 = vmatpush3.bf16.msra.mxu1 %v690_v16 }
 0x32e   : > { %1014 = vmatmul.mubr.msk.bf16.vlgmr.msra.gmra.mrb[0].mxu1 %vm607_vm6, %v1098_v17 }
 0x38c   : > { %v1009_v18 = vpop.f32.mrb[0].mxu0 }
 0x38d   : > { %v652_v19 = vpop.f32.mrb[1].mxu0 }
 0x38e   : > { %v1010_v20 = vpop.f32.mrb[2].mxu0 }
 0x38f   : > { %v655_v21 = vpop.f32.mrb[3].mxu0 }
 0x401   : > { %v1015_v22 = vpop.f32.mrb[0].mxu1 }
 0x402   : > { %747 = vrot.lane.b32.xlu1 %v1015_v22, %s1143_s19  ;;  %v726_v23 = vpop.f32.mrb[1].mxu1 }
 0x403   : > { %v1016_v24 = vpop.f32.mrb[2].mxu1 }
 0x404   : > { %v729_v25 = vpop.f32.mrb[3].mxu1 }
 0x405   : > { %v1091_v26 = vpack.i.bf16 %v729_v25, %v726_v23 }
 0x407   : > { %1092 = vrot.lane.b32.xlu0 %v1091_v26, %s1143_s19 }
 0x474   : > { %v748_v27 = vpop.permute.xlu1 %747 }
 0x475   : > { %v754_v28 = vsel %vm607_vm6, %v1009_v18, %v748_v27 }
 0x476   : > { %v962_v29 = vpack.c.bf16 %v754_v28, %v754_v28 }
 0x478   : > { %772 = vst.msk [vmem:[%s1214_s21 + $0x8] sm:$0x3] %vm771_vm7, %v962_v29 }
 0x479   : > { %v1093_v30 = vpop.permute.xlu0 %1092 }
 0x47a   : > { %v1095_v31 = vunpack.i.h.bf16 %v1093_v30  ;;  %v1094_v32 = vunpack.i.l.bf16 %v1093_v30 }
 0x47c   : > { %v752_v33 = vsel %vm607_vm6, %v652_v19, %v1094_v32  ;;  %v753_v34 = vsel %vm607_vm6, %v655_v21, %v1095_v31 }
 0x47d   : > { %v960_v35 = vpack.c.bf16 %v752_v33, %v752_v33  ;;  %v961_v36 = vpack.c.bf16 %v753_v34, %v753_v34 }
 0x47f   : > { %769 = vst.msk [vmem:[%s1214_s21] sm:$0xf] %vm768_vm8, %v960_v35  ;;  %770 = vst.msk [vmem:[%s1214_s21 + $0x4] sm:$0xf] %vm768_vm8, %v961_v36 }
 0x480 PF: > { %s13_s16 = sadd.s32 1, %s1139_s16   ;;  %s1297_s12 = smov %s1131_s14 }
 0x481   : > { %p10_p8 = scmp.ge.s32.totalorder %s13_s16, 10   ;;  %s1298_s13 = smov %s1135_s15 }
 0x482   : > { %s1299_s14 = smov %s1302_s17  ;;  %s1300_s15 = smov %s1306_s18 }
 0x483   :  { %12 = sbr.rel (!%p10_p8) target bundleno = 3 (0x3), region = 74 }

// kernel: schi_stage_forward.27
= control target key start
LH: loop header
LB: loop body
LE: loop exit
PB: predicated region body
PF: predicated region fallthrough
CT: control target
= control target key end

     0   :  { %s457_s15 = smov 0   ;;  %s494_s0 = inlined_call_operand.vmem [shape: bf16[48,16], index: 0, kind: input, shape index: {}]   ;;  %s495_s1 = inlined_call_operand.vmem [shape: f32[1,16], index: 1, kind: input, shape index: {}]   ;;  %s496_s2 = inlined_call_operand.vmem [shape: f32[1,16], index: 2, kind: input, shape index: {}]   ;;  %s497_s3 = inlined_call_operand.vmem [shape: bf16[48,16], index: 3, kind: input, shape index: {}]   ;;  %s498_s4 = inlined_call_operand.vmem [shape: bf16[48,16], index: 4, kind: output, shape index: {}]  }
   0x1 LB: > { %s384_s16 = sadd.s32 4294967295, %s430_s15   ;;  %p388_p0 = scmp.ge.s32.totalorder %s430_s15, 1  ;;  %s430_s15 = sphi %s457_s15, %s14_s15  }
   0x2   : > { %p174_p1 = scmp.lt.s32.totalorder %s430_s15, 3 }
   0x4   : > { %p175_p2 = pnand %p388_p0, %p174_p1 }
   0x5   : > { %s205_s17 = smul.u32 (!%p175_p2), 3, %s384_s16  ;;  %vm229_vm0 = vcmask (!%p175_p2), 130048   ;;  %v392_v34 = vld [vmem:[%s495_s1] ss:$0 sm:$0xff] (!%p175_p2)  ;;  %vm312_vm1 = vcmask (!%p175_p2), 125952  }
   0x6   : > { %178 = sbr.rel (%p175_p2) target bundleno = 342 (0x156), region = 36  ;;  %v393_v36 = vld [vmem:[%s496_s2] ss:$0 sm:$0xff] (!%p175_p2) }
   0x7   : > { %p206_p3 = scmp.lt.s32.totalorder (!%p175_p2), %s205_s17, 5 }
   0xd   : > { %s500_s17 = smov (!%p206_p3, %s205_s17), 5 }
   0xe   : > { %s465_s18 = sshll.u32 %s500_s17, 2 }
   0xf   : > { %s209_s21 = scalar_lea.vmem %s494_s0, %s465_s18  ;;  %s215_s24 = scalar_lea.vmem %s497_s3, %s465_s18 }
  0x10   : > { %v403_v0 = vld [vmem:[%s209_s21] sm:$0xff]   ;;  %v225_v2 = vld [vmem:[%s209_s21 + $0x8] sm:$0xf]  ;;  %s221_s5 = scalar_lea.vmem %s498_s4, %s465_s18 }
  0x11   : > { %v404_v1 = vunpack.c.l.bf16 %v403_v0  ;;  %v228_v3 = vunpack.c.l.bf16 %v225_v2  ;;  %v405_v4 = vunpack.c.h.bf16 %v403_v0  ;;  %v407_v33 = vld [vmem:[%s215_s24] sm:$0xff]   ;;  %v292_v40 = vld [vmem:[%s215_s24 + $0x8] sm:$0xf] }
  0x12   : > { %v408_v37 = vunpack.c.l.bf16 %v407_v33  ;;  %v295_v45 = vunpack.c.l.bf16 %v292_v40  ;;  %v409_v48 = vunpack.c.h.bf16 %v407_v33 }
  0x13   : > { %v230_v5 = vsel %vm229_vm0, %v404_v1, 0.0  ;;  %v236_v6 = vsel %vm229_vm0, %v228_v3, 0.0  ;;  %v233_v7 = vsel %vm229_vm0, %v405_v4, 0.0 }
  0x14   : > { %231 = vadd.xlane.f32.xlu0 %v230_v5  ;;  %237 = vadd.xlane.f32.xlu1 %v236_v6 }
  0x18   : > { %234 = vadd.xlane.f32.xlu0 %v233_v7 }
  0xa1   : > { %v232_v8 = vpop.xlane.xlu0 %231  ;;  %v238_v10 = vpop.xlane.xlu1 %237 }
  0xa2   : > { %v240_v9 = vmul.f32 0.0625, %v232_v8  ;;  %v242_v11 = vmul.f32 0.0625, %v238_v10 }
  0xa4   : > { %v243_v12 = vsub.f32 %v404_v1, %v240_v9  ;;  %v245_v13 = vsub.f32 %v228_v3, %v242_v11 }
  0xa5   : > { %v235_v14 = vpop.xlane.xlu0 %234 }
  0xa6   : > { %v241_v15 = vmul.f32 0.0625, %v235_v14  ;;  %v246_v16 = vmul.f32 %v243_v12, %v243_v12  ;;  %v248_v17 = vmul.f32 %v245_v13, %v245_v13 }
  0xa8   : > { %v244_v18 = vsub.f32 %v405_v4, %v241_v15  ;;  %v249_v19 = vsel %vm229_vm0, %v246_v16, 0.0  ;;  %v255_v20 = vsel %vm229_vm0, %v248_v17, 0.0 }
  0xa9   : > { %250 = vadd.xlane.f32.xlu1 %v249_v19 }
  0xaa   : > { %v247_v21 = vmul.f32 %v244_v18, %v244_v18 }
  0xac   : > { %v252_v22 = vsel %vm229_vm0, %v247_v21, 0.0 }
  0xad   : > { %256 = vadd.xlane.f32.xlu1 %v255_v20  ;;  %253 = vadd.xlane.f32.xlu0 %v252_v22 }
 0x136   : > { %v251_v23 = vpop.xlane.xlu1 %250 }
 0x137   : > { %v258_v24 = vmul.f32 0.0625, %v251_v23 }
 0x139   : > { %v261_v25 = vadd.f32 1e-05, %v258_v24 }
 0x13a   : > { %v257_v26 = vpop.xlane.xlu1 %256  ;;  %v254_v27 = vpop.xlane.xlu0 %253 }
 0x13b   : > { %418 = vrsqrt.f32 %v261_v25  ;;  %v260_v28 = vmul.f32 0.0625, %v257_v26  ;;  %v259_v29 = vmul.f32 0.0625, %v254_v27 }
 0x13d   : > { %v263_v30 = vadd.f32 1e-05, %v260_v28  ;;  %v262_v31 = vadd.f32 1e-05, %v259_v29 }
 0x13f   : > { %420 = vrsqrt.f32 %v263_v30 }
 0x140   : > { %422 = vrsqrt.f32 %v262_v31 }
 0x145   : > { %v419_v32 = vpop.eup %418 }
 0x146   : > { %v267_v35 = vmul.f32 %v419_v32, %v243_v12 }
 0x148   : > { %v277_v38 = vmul.f32 %v392_v34, %v267_v35 }
 0x149   : > { %v421_v39 = vpop.eup %420 }
 0x14a   : > { %v423_v41 = vpop.eup %422  ;;  %v287_v42 = vadd.f32 %v393_v36, %v277_v38  ;;  %v269_v43 = vmul.f32 %v421_v39, %v245_v13 }
 0x14b   : > { %v268_v44 = vmul.f32 %v423_v41, %v244_v18 }
 0x14c   : > { %v296_v46 = vadd.f32 %v408_v37, %v287_v42  ;;  %v279_v47 = vmul.f32 %v392_v34, %v269_v43 }
 0x14d   : > { %v278_v49 = vmul.f32 %v392_v34, %v268_v44 }
 0x14e   : > { %v399_v50 = vpack.c.bf16 %v296_v46, %v296_v46  ;;  %v289_v51 = vadd.f32 %v393_v36, %v279_v47 }
 0x14f   : > { %v288_v52 = vadd.f32 %v393_v36, %v278_v49 }
 0x150   : > { %313 = vst.msk [vmem:[%s221_s5] sm:$0xf] %vm312_vm1, %v399_v50  ;;  %v298_v53 = vadd.f32 %v295_v45, %v289_v51 }
 0x151   : > { %v297_v54 = vadd.f32 %v409_v48, %v288_v52 }
 0x152   : > { %v401_v55 = vpack.c.bf16 %v298_v53, %v298_v53 }
 0x153   : > { %v400_v56 = vpack.c.bf16 %v297_v54, %v297_v54 }
 0x154   : > { %315 = vst.msk [vmem:[%s221_s5 + $0x8] sm:$0xf] %vm312_vm1, %v401_v55 }
 0x155   : > { %314 = vst.msk [vmem:[%s221_s5 + $0x4] sm:$0xf] %vm312_vm1, %v400_v56 }
 0x156 PF: > { %s14_s15 = sadd.s32 1, %s430_s15  }
 0x157   : > { %p11_p4 = scmp.ge.s32.totalorder %s14_s15, 4  }
 0x159   :  { %13 = sbr.rel (!%p11_p4) target bundleno = 1 (0x1), region = 69 }

// kernel: schi_stage_forward.26
= control target key start
LH: loop header
LB: loop body
LE: loop exit
PB: predicated region body
PF: predicated region fallthrough
CT: control target
= control target key end

     0   :  { %s897_s12 = smov 0   ;;  %s899_s13 = smov 0   ;;  %s973_s0 = inlined_call_operand.vmem [shape: bf16[2,4,6,16], index: 0, kind: input, shape index: {}]   ;;  %s974_s1 = inlined_call_operand.vmem [shape: bf16[2,4,8,16], index: 1, kind: input, shape index: {}]   ;;  %s975_s2 = inlined_call_operand.vmem [shape: bf16[2,4,8,16], index: 2, kind: input, shape index: {}]   ;;  %s976_s3 = inlined_call_operand.vmem [shape: bf16[2,4,6,16], index: 3, kind: output, shape index: {}]  }
   0x1   :  { %s901_s14 = smov 0   ;;  %s903_s15 = smov 0  }
   0x2   :  { %s905_s16 = smov 0  }
   0x3 LB: > { %s25_s17 = sadd.s32 1, %s860_s14  ;;  %s32_s18 = sadd.s32 1, %s864_s15  ;;  %s868_s16 = sphi %s905_s16, %s13_s16   ;;  %s864_s15 = sphi %s903_s15, %s980_s15   ;;  %s860_s14 = sphi %s901_s14, %s979_s14   ;;  %s856_s13 = sphi %s899_s13, %s978_s13   ;;  %s852_s12 = sphi %s897_s12, %s977_s12  }
   0x4   : > { %p26_p0 = scmp.ge.s32.totalorder %s25_s17, 4  ;;  %p714_p1 = scmp.ge.s32.totalorder %s868_s16, 1 }
   0x5   : > { %p200_p2 = scmp.lt.s32.totalorder %s868_s16, 9 }
   0x6   : > { %s982_s17 = smov (%p26_p0, %s25_s17), 0  ;;  %s984_s18 = smov (!%p26_p0, %s32_s18), %s864_s15 }
   0x7   : > { %p201_p3 = pnand %p714_p1, %p200_p2  ;;  %p34_p4 = scmp.ge.s32.totalorder %s984_s18, 2 }
   0x8   : > { %p252_p5 = scmp.lt.s32.totalorder (!%p201_p3), %s856_s13, 1  ;;  %p270_p6 = scmp.lt.s32.totalorder (!%p201_p3), %s852_s12, 3 }
   0x9   : > { %s986_s18 = smov (%p34_p4, %s984_s18), 0  ;;  %204 = sbr.rel (%p201_p3) target bundleno = 1139 (0x473), region = 32 }
   0xa   : > { %p723_p7 = scmp.ne.s32.totalorder (!%p201_p3), %s852_s12, 0 }
  0x10   : > { %s988_s13 = smov (!%p252_p5, %s856_s13), 1  ;;  %294 = sbr.rel (%p723_p7) target bundleno = 686 (0x2ae), region = 36 }
  0x11   : > { %s271_s19 = scalar_select %p270_p6, %s852_s12, 3 }
  0x12   : > { %s731_s20 = sshll.u32 %s988_s13, 4  ;;  %s719_s21 = sshll.u32 %s988_s13, 2  ;;  %vm321_vm0 = vcmask (!%p723_p7), 130048   ;;  %v870_v2 = vmov (!%p723_p7), 0.0   ;;  %vm871_vm1 = vmmov (!%p723_p7), 0   ;;  %vm303_vm2 = vcmask (!%p723_p7), 128000  }
  0x13   : > { %s259_s24 = scalar_lea.vmem %s973_s0, %s731_s20  ;;  %s267_s27 = scalar_lea.vmem %s974_s1, %s731_s20  ;;  %750 = vmatprep.subr.bf16.mxu0 (!%p723_p7), %v870_v2  ;;  %756 = vmatprep.subr.bf16.mxu1 (!%p723_p7), %v870_v2  ;;  %vm333_vm3 = vcmask (!%p723_p7), 64512   ;;  %vm380_vm4 = vcmask (!%p723_p7), 62464   ;;  %vm393_vm5 = vcmask (!%p723_p7), 59392  }
  0x14   : > { %s276_s28 = sadd.s32 %s719_s21, %s271_s19  ;;  %v734_v0 = vld [vmem:[%s267_s27] sm:$0xff] (!%p723_p7)   ;;  %v741_v1 = vld [vmem:[%s267_s27 + $0x8] sm:$0xff] (!%p723_p7)   ;;  %752 = vmatprep.mubr.msk.bf16.mxu0 (!%p723_p7), %vm871_vm1, %v870_v2  ;;  %758 = vmatprep.mubr.msk.bf16.mxu1 (!%p723_p7), %vm871_vm1, %v870_v2  ;;  %s872_s9 = smov (!%p723_p7), 120  }
  0x15   : > { %s720_s29 = sshll.u32 %s276_s28, 2  ;;  %v735_v3 = vunpack.c.l.bf16 (!%p723_p7), %v734_v0  ;;  %v736_v4 = vunpack.c.h.bf16 (!%p723_p7), %v734_v0  ;;  %v739_v5 = vunpack.c.l.bf16 (!%p723_p7), %v741_v1  ;;  %v740_v6 = vunpack.c.h.bf16 (!%p723_p7), %v741_v1  ;;  %v295_v7 = vld [vmem:[%s259_s24] sm:$0x7] (!%p723_p7)  ;;  %v296_v8 = vld [vmem:[%s259_s24 + $0x4] sm:$0x7] (!%p723_p7) }
  0x16   : > { %s936_s5 = scalar_lea.vmem %s975_s2, %s720_s29  ;;  %s941_s8 = scalar_lea.vmem %s976_s3, %s720_s29  ;;  %v297_v9 = vld [vmem:[%s259_s24 + $0x8] sm:$0x7] (!%p723_p7)  ;;  %v298_v10 = vld [vmem:[%s259_s24 + $0xc] sm:$0x7] (!%p723_p7)  ;;  %v299_v11 = vunpack.c.l.bf16 (!%p723_p7), %v295_v7  ;;  %v300_v12 = vunpack.c.l.bf16 (!%p723_p7), %v296_v8 }
  0x17   : > { %v301_v13 = vunpack.c.l.bf16 %v297_v9  ;;  %v322_v14 = vsel %vm321_vm0, %v735_v3, 0.0  ;;  %v323_v15 = vsel %vm321_vm0, %v736_v4, 0.0  ;;  %v325_v16 = vsel %vm321_vm0, %v739_v5, 0.0 }
  0x18   : > { %v324_v17 = vadd.f32 %v323_v15, %v322_v14  ;;  %v302_v18 = vunpack.c.l.bf16 %v298_v10  ;;  %v327_v19 = vsel %vm321_vm0, %v740_v6, 0.0  ;;  %v304_v20 = vsel %vm303_vm2, %v299_v11, 0.0 }
  0x19   : > { %v305_v21 = vsel %vm303_vm2, %v300_v12, 0.0  ;;  %v307_v22 = vsel %vm303_vm2, %v301_v13, 0.0 }
  0x1a   : > { %v326_v23 = vadd.f32 %v325_v16, %v324_v17  ;;  %v306_v24 = vadd.f32 %v305_v21, %v304_v20  ;;  %v309_v25 = vsel %vm303_vm2, %v302_v18, 0.0 }
  0x1c   : > { %v328_v26 = vadd.f32 %v327_v19, %v326_v23  ;;  %v308_v27 = vadd.f32 %v307_v22, %v306_v24 }
  0x1e   : > { %v329_v28 = vmul.f32 0.25, %v328_v26  ;;  %v310_v29 = vadd.f32 %v309_v25, %v308_v27 }
  0x20   : > { %v332_v30 = vpack.c.bf16 %v329_v28, %v329_v28  ;;  %v312_v31 = vmul.f32 0.25, %v310_v29 }
  0x22   : > { %399 = vrot.lane.b32.xlu0 %v332_v30, %s872_s9  ;;  %v338_v32 = vsel %vm333_vm3, %v332_v30, 0  ;;  %v330_v33 = vmul.f32 0.35355338, %v312_v31 }
  0x23   : > { %751 = vmatpush3.bf16.xpose.msra.mxu0 %v338_v32 }
  0x24   : > { %v331_v34 = vpack.c.bf16 %v330_v33, %v330_v33 }
  0x26   : > { %396 = vrot.lane.b32.xlu0 %v331_v34, %s872_s9 }
  0x2a   : > { %753 = vmatmul.mubr.msk.bf16.vlgmr.msra.gmra.mrb[0].mxu0 %vm333_vm3, %v331_v34 }
  0x94   : > { %v400_v35 = vpop.permute.xlu0 %399 }
  0x95   : > { %v405_v36 = vsel %vm333_vm3, %v400_v35, 0 }
  0x96   : > { %757 = vmatpush3.bf16.xpose.msra.mxu1 %v405_v36 }
  0x98   : > { %v397_v37 = vpop.permute.xlu0 %396 }
  0x9d   : > { %759 = vmatmul.mubr.msk.bf16.vlgmr.msra.gmra.mrb[0].mxu1 %vm333_vm3, %v397_v37 }
  0xfd   : > { %v374_v38 = vpop.f32.mrb[0].mxu0 }
  0xfe   : > { %v381_v39 = vsel %vm380_vm4, %v374_v38, -inf  ;;  %v754_v40 = vpop.f32.mrb[1].mxu0 }
  0xff   : > { %382 = vmax.xlane.f32.xlu1 %v381_v39  ;;  %v377_v41 = vpop.f32.mrb[2].mxu0 }
 0x100   : > { %v755_v42 = vpop.f32.mrb[3].mxu0 }
 0x170   : > { %v441_v43 = vpop.f32.mrb[0].mxu1 }
 0x171   : > { %v760_v44 = vpop.f32.mrb[1].mxu1  ;;  %v447_v45 = vsel %vm380_vm4, %v441_v43, -inf }
 0x172   : > { %v444_v46 = vpop.f32.mrb[2].mxu1  ;;  %448 = vmax.xlane.f32.xlu1 %v447_v45 }
 0x173   : > { %v761_v47 = vpop.f32.mrb[3].mxu1 }
 0x18c   : > { %v383_v48 = vpop.xlane.xlu1 %382 }
 0x18d   : > { %v384_v49 = vsub.f32 %v374_v38, %v383_v48 }
 0x18f   : > { %v385_v50 = vmul.f32 1.442695, %v384_v49 }
 0x191   : > { %821 = vpow2.f32 %v385_v50 }
 0x19b   : > { %v822_v51 = vpop.eup %821 }
 0x19c   : > { %v387_v52 = vsel %vm380_vm4, %v822_v51, 0.0 }
 0x19d   : > { %388 = vadd.xlane.f32.xlu0 %v387_v52 }
 0x1ff   : > { %v449_v53 = vpop.xlane.xlu1 %448 }
 0x200   : > { %v450_v54 = vsub.f32 %v441_v43, %v449_v53 }
 0x202   : > { %v451_v55 = vmul.f32 1.442695, %v450_v54 }
 0x204   : > { %823 = vpow2.f32 %v451_v55 }
 0x20e   : > { %v824_v56 = vpop.eup %823 }
 0x20f   : > { %v453_v57 = vsel %vm380_vm4, %v824_v56, 0.0 }
 0x210   : > { %454 = vadd.xlane.f32.xlu1 %v453_v57 }
 0x22a   : > { %v389_v58 = vpop.xlane.xlu0 %388 }
 0x22b   : > { %825 = vrcp.f32 %v389_v58 }
 0x235   : > { %v826_v59 = vpop.eup %825 }
 0x236   : > { %v391_v60 = vmul.f32 %v826_v59, %v822_v51 }
 0x238   : > { %v392_v61 = vpack.c.bf16 %v391_v60, %v391_v60 }
 0x23a   : > { %394 = vst.msk [vmem:[#allocation2] sm:$0x7] %vm393_vm5, %v392_v61 }
 0x29d   : > { %v455_v62 = vpop.xlane.xlu1 %454 }
 0x29e   : > { %827 = vrcp.f32 %v455_v62 }
 0x2a8   : > { %v828_v63 = vpop.eup %827 }
 0x2a9   : > { %v457_v0 = vmul.f32 %v828_v63, %v824_v56 }
 0x2ab   : > { %v458_v1 = vpack.c.bf16 %v457_v0, %v457_v0 }
 0x2ad   : > { %460 = vst.msk [vmem:[#allocation2 + $0x4] sm:$0x7] %vm393_vm5, %v458_v1 }
 0x2ae PF: > { %v461_v2 = vld [vmem:[%s936_s5] sm:$0xf]  ;;  %vm467_vm6 = vcmask 1043456   ;;  %v873_v4 = vmov 0.0   ;;  %vm874_vm7 = vmmov 0   ;;  %s875_s10 = smov 120  }
 0x2af   : > { %v727_v3 = vcombine.low %v461_v2, %v461_v2  ;;  %768 = vmatprep.subr.bf16.mxu1 %v873_v4  ;;  %770 = vmatprep.mubr.msk.bf16.mxu1 %vm874_vm7, %v873_v4  ;;  %v469_v5 = vsel %vm467_vm6, %v461_v2, 0  ;;  %v462_v6 = vld [vmem:[#allocation2] sm:$0x7]  ;;  %vm463_vm8 = vcmask 64512   ;;  %s876_s11 = smov 8   ;;  %vm570_vm9 = vcmask 124928  }
 0x2b0   : > { %762 = vmatprep.subr.bf16.mxu0 %v873_v4  ;;  %764 = vmatprep.mubr.msk.bf16.mxu0 %vm874_vm7, %v873_v4 }
 0x2b1   : > { %516 = vrot.lane.b32.xlu0 %v727_v3, %s875_s10  ;;  %763 = vmatpush3.bf16.msra.mxu0 %v469_v5 }
 0x2b4   : > { %765 = vmatmul.mubr.msk.bf16.vlgmr.msra.gmra.mrb[0].mxu0 %vm463_vm8, %v462_v6  ;;  %v512_v9 = vld [vmem:[#allocation2 + $0x4] sm:$0x7] }
 0x323   : > { %v517_v7 = vpop.permute.xlu0 %516 }
 0x324   : > { %v522_v8 = vsel %vm467_vm6, %v517_v7, 0 }
 0x325   : > { %769 = vmatpush3.bf16.msra.mxu1 %v522_v8 }
 0x328   : > { %771 = vmatmul.mubr.msk.bf16.vlgmr.msra.gmra.mrb[0].mxu1 %vm463_vm8, %v512_v9 }
 0x387   : > { %v505_v10 = vpop.f32.mrb[0].mxu0 }
 0x388   : > { %v766_v11 = vpop.f32.mrb[1].mxu0 }
 0x389   : > { %v508_v12 = vpop.f32.mrb[2].mxu0 }
 0x38a   : > { %v767_v13 = vpop.f32.mrb[3].mxu0 }
 0x3fb   : > { %v558_v14 = vpop.f32.mrb[0].mxu1 }
 0x3fc   : > { %565 = vrot.lane.b32.xlu0 %v558_v14, %s876_s11  ;;  %v772_v15 = vpop.f32.mrb[1].mxu1 }
 0x3fd   : > { %v561_v16 = vpop.f32.mrb[2].mxu1 }
 0x3fe   : > { %v773_v17 = vpop.f32.mrb[3].mxu1 }
 0x46e   : > { %v566_v18 = vpop.permute.xlu0 %565 }
 0x46f   : > { %v568_v19 = vsel %vm463_vm8, %v505_v10, %v566_v18 }
 0x470   : > { %v569_v20 = vpack.c.bf16 %v568_v19, %v568_v19 }
 0x472   : > { %571 = vst.msk [vmem:[%s941_s8] sm:$0x7] %vm570_vm9, %v569_v20 }
 0x473 PF: > { %s13_s16 = sadd.s32 1, %s868_s16   ;;  %s977_s12 = smov %s860_s14 }
 0x474   : > { %p10_p8 = scmp.ge.s32.totalorder %s13_s16, 10   ;;  %s978_s13 = smov %s864_s15 }
 0x475   : > { %s979_s14 = smov %s982_s17  ;;  %s980_s15 = smov %s986_s18 }
 0x476   :  { %12 = sbr.rel (!%p10_p8) target bundleno = 3 (0x3), region = 74 }

</bundles_post_ra>
